<compile_context>
chip_gen: v7x
topology: tpu7x:2x2x1
jax: 0.10.0
libtpu: 0.0.40
codegen_flags: <defaults>
</compile_context>

<pallas_src>
import functools

import jax
import jax.numpy as jnp
from jax.experimental import pallas as pl
from jax.experimental.pallas import tpu as pltpu

EPS = 1e-5  # nn.LayerNorm default


def _layer_norm(x, w, b):
    # PyTorch LayerNorm: biased variance over the last dim, then affine.
    mu = jnp.mean(x, axis=-1, keepdims=True)
    var = jnp.mean(jnp.square(x - mu), axis=-1, keepdims=True)
    return (x - mu) * jax.lax.rsqrt(var + EPS) * w + b


# ---------------------------------------------------------------------------
# Kernel 1: LayerNorm + fused projection matmul + gating.
#   z tile (TM, D)  x  W_fused (D, 4C+D)  ->  a (TM, C), b (TM, C), g (TM, D)
# ---------------------------------------------------------------------------
def proj_kernel(z_ref, lnw_ref, lnb_ref, w_ref, bias_ref,
                a_ref, b_ref, g_ref, *, c, compute_dtype):
    zn = _layer_norm(z_ref[...], lnw_ref[...], lnb_ref[...])          # (TM, D)
    y = jnp.dot(zn.astype(compute_dtype), w_ref[...].astype(compute_dtype),
                preferred_element_type=jnp.float32) + bias_ref[...]   # (TM, 4C+D)

    a_lin = y[:, 0 * c:1 * c]
    a_gat = y[:, 1 * c:2 * c]
    b_lin = y[:, 2 * c:3 * c]
    b_gat = y[:, 3 * c:4 * c]
    g_lin = y[:, 4 * c:]

    a_ref[...] = a_lin * jax.nn.sigmoid(a_gat)
    b_ref[...] = b_lin * jax.nn.sigmoid(b_gat)
    g_ref[...] = jax.nn.sigmoid(g_lin)


# ---------------------------------------------------------------------------
# Kernel 2: fused triangle contraction + output LayerNorm + olinear + gate.
#   grid = (i-tiles [parallel], l-tiles [arbitrary reduction])
#   a block (TL, TI, C), b block (TL, L, C) -> acc (TI, L, C) f32 scratch
#   last l-tile: out (TI, L, D) = (LN_c(acc) @ wo + bo) * g
# ---------------------------------------------------------------------------
def tri_out_kernel(a_ref, b_ref, g_ref, onw_ref, onb_ref, wo_ref, bo_ref,
                   out_ref, acc_ref, *, compute_dtype):
    l_blk = pl.program_id(1)
    n_l = pl.num_programs(1)

    @pl.when(l_blk == 0)
    def _init():
        acc_ref[...] = jnp.zeros_like(acc_ref)

    tl = a_ref.shape[0]

    def body(l, carry):
        a_l = a_ref[l]                                   # (TI, C)
        b_l = b_ref[l]                                   # (L,  C)
        acc_ref[...] += a_l[:, None, :] * b_l[None, :, :]  # (TI, L, C) VPU MAC
        return carry

    jax.lax.fori_loop(0, tl, body, 0, unroll=True)

    @pl.when(l_blk == n_l - 1)
    def _finalize():
        o = acc_ref[...]                                          # (TI, L, C) f32
        on = _layer_norm(o, onw_ref[...], onb_ref[...])           # channel LN
        ti, lj, c = on.shape
        y = jnp.dot(on.reshape(ti * lj, c).astype(compute_dtype),
                    wo_ref[...].astype(compute_dtype),
                    preferred_element_type=jnp.float32) + bo_ref[...]
        d = y.shape[-1]
        out_ref[...] = (y.reshape(ti, lj, d) * g_ref[...]).astype(out_ref.dtype)


def _pick_tile(n, target, multiple=1):
    """Largest divisor of n that is <= target and a multiple of `multiple`;
    falls back to n itself (a full-extent block is always legal)."""
    for t in range(min(target, n), 0, -1):
        if n % t == 0 and t % multiple == 0:
            return t
    return n


def tri_in(z, p, *, tile_m=None, tile_i=None, tile_l=None,
           compute_dtype=jnp.float32):
    """z: (L, L, z_dim) float32 -> (L, L, z_dim) float32."""
    L, L2, D = z.shape
    assert L == L2
    C = p['wa'].shape[1]
    M = L * L
    Nf = 4 * C + D

    if tile_m is None:
        tile_m = _pick_tile(M, 512, 8)
    if tile_i is None:
        tile_i = _pick_tile(L, 16, 8)
    if tile_l is None:
        tile_l = _pick_tile(L, 16, 1)
    assert M % tile_m == 0 and L % tile_i == 0 and L % tile_l == 0

    # Fused projection weight / bias: columns are [a | a_gate | b | b_gate | g].
    w_fused = jnp.concatenate([p['wa'], p['wag'], p['wb'], p['wbg'], p['wg']], axis=1)
    b_fused = jnp.concatenate([p['ba'], p['bag'], p['bb'], p['bbg'], p['bg']], axis=1)

    z2 = z.reshape(M, D)
    cparams = dict(vmem_limit_bytes=32 * 1024 * 1024)

    proj_cost = pl.CostEstimate(
        flops=2 * M * D * Nf + 10 * M * D,
        transcendentals=M * (2 * C + D),
        bytes_accessed=4 * (M * D + D * Nf + M * (2 * C + D)),
    )

    a2, b2, g2 = pl.pallas_call(
        functools.partial(proj_kernel, c=C, compute_dtype=compute_dtype),
        grid_spec=pltpu.PrefetchScalarGridSpec(
            num_scalar_prefetch=0,
            grid=(M // tile_m,),
            in_specs=[
                pl.BlockSpec((tile_m, D), lambda i: (i, 0)),   # z rows
                pl.BlockSpec((1, D), lambda i: (0, 0)),        # ln_w (resident)
                pl.BlockSpec((1, D), lambda i: (0, 0)),        # ln_b
                pl.BlockSpec((D, Nf), lambda i: (0, 0)),       # fused weight
                pl.BlockSpec((1, Nf), lambda i: (0, 0)),       # fused bias
            ],
            out_specs=(
                pl.BlockSpec((tile_m, C), lambda i: (i, 0)),   # a
                pl.BlockSpec((tile_m, C), lambda i: (i, 0)),   # b
                pl.BlockSpec((tile_m, D), lambda i: (i, 0)),   # g (sigmoid applied)
            ),
        ),
        out_shape=(
            jax.ShapeDtypeStruct((M, C), jnp.float32),
            jax.ShapeDtypeStruct((M, C), jnp.float32),
            jax.ShapeDtypeStruct((M, D), jnp.float32),
        ),
        compiler_params=pltpu.CompilerParams(
            dimension_semantics=("parallel",), **cparams),
        cost_estimate=proj_cost,
    )(z2, p['ln_w'], p['ln_b'], w_fused, b_fused)

    # Free metadata-only reshapes: axis0 = l (z's first index), axis1 = i / j.
    a3 = a2.reshape(L, L, C)   # a[l, i, c]
    b3 = b2.reshape(L, L, C)   # b[l, j, c]
    g3 = g2.reshape(L, L, D)   # g[i, j, d]

    tri_cost = pl.CostEstimate(
        flops=2 * L * L * L * C + 2 * M * C * D,
        transcendentals=M,
        bytes_accessed=4 * (L * L * C * (1 + L // tile_i) + 2 * M * D + C * D),
    )

    out = pl.pallas_call(
        functools.partial(tri_out_kernel, compute_dtype=compute_dtype),
        grid_spec=pltpu.PrefetchScalarGridSpec(
            num_scalar_prefetch=0,
            grid=(L // tile_i, L // tile_l),
            in_specs=[
                pl.BlockSpec((tile_l, tile_i, C), lambda i, l: (l, i, 0)),  # a
                pl.BlockSpec((tile_l, L, C), lambda i, l: (l, 0, 0)),       # b
                pl.BlockSpec((tile_i, L, D), lambda i, l: (i, 0, 0)),       # g
                pl.BlockSpec((1, C), lambda i, l: (0, 0)),                  # on_w
                pl.BlockSpec((1, C), lambda i, l: (0, 0)),                  # on_b
                pl.BlockSpec((C, D), lambda i, l: (0, 0)),                  # wo
                pl.BlockSpec((1, D), lambda i, l: (0, 0)),                  # bo
            ],
            out_specs=pl.BlockSpec((tile_i, L, D), lambda i, l: (i, 0, 0)),
            scratch_shapes=[pltpu.VMEM((tile_i, L, C), jnp.float32)],
        ),
        out_shape=jax.ShapeDtypeStruct((L, L, D), jnp.float32),
        compiler_params=pltpu.CompilerParams(
            dimension_semantics=("parallel", "arbitrary"), **cparams),
        cost_estimate=tri_cost,
    )(a3, b3, g3, p['on_w'], p['on_b'], p['wo'], p['bo'])

    return out


def init_params(key, z_dim, c):
    ks = list(jax.random.split(key, 16))

    def w(k, shape, scale=0.1):
        return (scale * jax.random.normal(k, shape)).astype(jnp.float32)

    return {
        # LayerNorm(z_dim)
        'ln_w': (1.0 + 0.1 * jax.random.normal(ks[0], (1, z_dim))).astype(jnp.float32),
        'ln_b': w(ks[1], (1, z_dim)),
        # alinear / aglinear / blinear / bglinear : z_dim -> c
        'wa':  w(ks[2], (z_dim, c)),  'ba':  w(ks[3], (1, c)),
        'wag': w(ks[4], (z_dim, c)),  'bag': w(ks[5], (1, c)),
        'wb':  w(ks[6], (z_dim, c)),  'bb':  w(ks[7], (1, c)),
        'wbg': w(ks[8], (z_dim, c)),  'bbg': w(ks[9], (1, c)),
        # glinear : z_dim -> z_dim
        'wg':  w(ks[10], (z_dim, z_dim)), 'bg': w(ks[11], (1, z_dim)),
        # LayerNorm(c)
        'on_w': (1.0 + 0.1 * jax.random.normal(ks[12], (1, c))).astype(jnp.float32),
        'on_b': w(ks[13], (1, c)),
        # olinear : c -> z_dim
        'wo':  w(ks[14], (c, z_dim)), 'bo': w(ks[15], (1, z_dim)),
    }


def tri_in_ref(z, p):
    """Pure-JAX reference mirroring the PyTorch forward."""
    def ln(x, w, b):
        mu = x.mean(-1, keepdims=True)
        var = ((x - mu) ** 2).mean(-1, keepdims=True)
        return (x - mu) / jnp.sqrt(var + EPS) * w[0] + b[0]

    zn = ln(z, p['ln_w'], p['ln_b'])
    a = (zn @ p['wa'] + p['ba'][0]) * jax.nn.sigmoid(zn @ p['wag'] + p['bag'][0])
    b = (zn @ p['wb'] + p['bb'][0]) * jax.nn.sigmoid(zn @ p['wbg'] + p['bbg'][0])
    o = jnp.einsum('lic,ljc->ijc', a, b)
    o = ln(o, p['on_w'], p['on_b'])
    o = o @ p['wo'] + p['bo'][0]
    return o * jax.nn.sigmoid(zn @ p['wg'] + p['bg'][0])


if __name__ == "__main__":
    L, Z_DIM, C = 16, 32, 32
    key = jax.random.PRNGKey(0)
    kz, kp = jax.random.split(key)
    z = jax.random.normal(kz, (L, L, Z_DIM), dtype=jnp.float32)
    params = init_params(kp, Z_DIM, C)

    # Small tiles so the multi-step grid / accumulator paths are exercised.
    fn = jax.jit(functools.partial(tri_in, tile_m=128, tile_i=8, tile_l=8))
    out = jax.block_until_ready(fn(z, params))

    ref = jax.block_until_ready(tri_in_ref(z, params))
    assert out.shape == (L, L, Z_DIM)
    err = float(jnp.abs(out - ref).max())
    assert jnp.allclose(out, ref, rtol=2e-3, atol=2e-3), err
    print("KERNEL_OK")
</pallas_src>

<mosaic_0001>
module attributes {stable_mosaic.version = 11 : i64} {
  func.func @tri_out_kernel(%arg0: i32, %arg1: i32, %arg2: memref<8x8x32xf32, #tpu.memory_space<vmem>>, %arg3: memref<8x16x32xf32, #tpu.memory_space<vmem>>, %arg4: memref<8x16x32xf32, #tpu.memory_space<vmem>>, %arg5: memref<1x32xf32, #tpu.memory_space<vmem>>, %arg6: memref<1x32xf32, #tpu.memory_space<vmem>>, %arg7: memref<32x32xf32, #tpu.memory_space<vmem>>, %arg8: memref<1x32xf32, #tpu.memory_space<vmem>>, %arg9: memref<8x16x32xf32, #tpu.memory_space<vmem>>, %arg10: memref<8x16x32xf32, #tpu.memory_space<vmem>>) attributes {dimension_semantics = [#tpu.dimension_semantics<parallel>, #tpu.dimension_semantics<arbitrary>], iteration_bounds = array<i64: 2, 2>, scalar_prefetch = 0 : i64, scratch_operands = 1 : i64, tpu.core_type = #tpu.core_type<tc>, window_params = [{transform_indices = @transform_0, window_bounds = array<i64: 8, 8, 32>}, {transform_indices = @transform_1, window_bounds = array<i64: 8, 16, 32>}, {transform_indices = @transform_2, window_bounds = array<i64: 8, 16, 32>}, {pipeline_mode = #tpu.pipeline_mode<synchronous>, transform_indices = @transform_3, window_bounds = array<i64: 1, 32>}, {pipeline_mode = #tpu.pipeline_mode<synchronous>, transform_indices = @transform_4, window_bounds = array<i64: 1, 32>}, {pipeline_mode = #tpu.pipeline_mode<synchronous>, transform_indices = @transform_5, window_bounds = array<i64: 32, 32>}, {pipeline_mode = #tpu.pipeline_mode<synchronous>, transform_indices = @transform_6, window_bounds = array<i64: 1, 32>}, {transform_indices = @transform_7, window_bounds = array<i64: 8, 16, 32>}]} {
    %c0_i32 = arith.constant 0 : i32
    %0 = arith.cmpi eq, %arg1, %c0_i32 : i32
    %1 = arith.extui %0 : i1 to i32
    %c0_i32_0 = arith.constant 0 : i32
    %2 = arith.cmpi ne, %1, %c0_i32_0 : i32
    scf.if %2 {
      %cst = arith.constant 0.000000e+00 : f32
      %118 = vector.broadcast %cst : f32 to vector<8x16x32xf32>
      %c0_83 = arith.constant 0 : index
      %c0_84 = arith.constant 0 : index
      %c0_85 = arith.constant 0 : index
      %119 = vector.load %arg10[%c0_83, %c0_84, %c0_85] : memref<8x16x32xf32, #tpu.memory_space<vmem>>, vector<8x16x32xf32>
      tpu.vector_store %arg10[%c0_83, %c0_84, %c0_85], %118 {strides = array<i32>} : memref<8x16x32xf32, #tpu.memory_space<vmem>>, vector<8x16x32xf32>,
    } else {
    }
    %c0_i32_1 = arith.constant 0 : i32
    %3 = arith.index_cast %c0_i32_1 : i32 to index
    %c0 = arith.constant 0 : index
    %c0_2 = arith.constant 0 : index
    %4 = vector.load %arg2[%3, %c0, %c0_2] : memref<8x8x32xf32, #tpu.memory_space<vmem>>, vector<1x8x32xf32>
    %5 = vector.shape_cast %4 : vector<1x8x32xf32> to vector<8x32xf32>
    %6 = arith.index_cast %c0_i32_1 : i32 to index
    %c0_3 = arith.constant 0 : index
    %c0_4 = arith.constant 0 : index
    %7 = vector.load %arg3[%6, %c0_3, %c0_4] : memref<8x16x32xf32, #tpu.memory_space<vmem>>, vector<1x16x32xf32>
    %8 = vector.shape_cast %7 : vector<1x16x32xf32> to vector<16x32xf32>
    %c0_5 = arith.constant 0 : index
    %c0_6 = arith.constant 0 : index
    %c0_7 = arith.constant 0 : index
    %9 = vector.load %arg10[%c0_5, %c0_6, %c0_7] : memref<8x16x32xf32, #tpu.memory_space<vmem>>, vector<8x16x32xf32>
    %10 = vector.shape_cast %5 : vector<8x32xf32> to vector<8x1x32xf32>
    %11 = vector.shape_cast %8 : vector<16x32xf32> to vector<1x16x32xf32>
    %12 = vector.broadcast %10 : vector<8x1x32xf32> to vector<8x16x32xf32>
    %13 = vector.broadcast %11 : vector<1x16x32xf32> to vector<8x16x32xf32>
    %14 = arith.mulf %12, %13 : vector<8x16x32xf32>
    %15 = arith.addf %9, %14 : vector<8x16x32xf32>
    %c0_8 = arith.constant 0 : index
    %c0_9 = arith.constant 0 : index
    %c0_10 = arith.constant 0 : index
    %16 = vector.load %arg10[%c0_8, %c0_9, %c0_10] : memref<8x16x32xf32, #tpu.memory_space<vmem>>, vector<8x16x32xf32>
    tpu.vector_store %arg10[%c0_8, %c0_9, %c0_10], %15 {strides = array<i32>} : memref<8x16x32xf32, #tpu.memory_space<vmem>>, vector<8x16x32xf32>,
    %c1_i32 = arith.constant 1 : i32
    %17 = arith.index_cast %c1_i32 : i32 to index
    %c0_11 = arith.constant 0 : index
    %c0_12 = arith.constant 0 : index
    %18 = vector.load %arg2[%17, %c0_11, %c0_12] : memref<8x8x32xf32, #tpu.memory_space<vmem>>, vector<1x8x32xf32>
    %19 = vector.shape_cast %18 : vector<1x8x32xf32> to vector<8x32xf32>
    %20 = arith.index_cast %c1_i32 : i32 to index
    %c0_13 = arith.constant 0 : index
    %c0_14 = arith.constant 0 : index
    %21 = vector.load %arg3[%20, %c0_13, %c0_14] : memref<8x16x32xf32, #tpu.memory_space<vmem>>, vector<1x16x32xf32>
    %22 = vector.shape_cast %21 : vector<1x16x32xf32> to vector<16x32xf32>
    %c0_15 = arith.constant 0 : index
    %c0_16 = arith.constant 0 : index
    %c0_17 = arith.constant 0 : index
    %23 = vector.load %arg10[%c0_15, %c0_16, %c0_17] : memref<8x16x32xf32, #tpu.memory_space<vmem>>, vector<8x16x32xf32>
    %24 = vector.shape_cast %19 : vector<8x32xf32> to vector<8x1x32xf32>
    %25 = vector.shape_cast %22 : vector<16x32xf32> to vector<1x16x32xf32>
    %26 = vector.broadcast %24 : vector<8x1x32xf32> to vector<8x16x32xf32>
    %27 = vector.broadcast %25 : vector<1x16x32xf32> to vector<8x16x32xf32>
    %28 = arith.mulf %26, %27 : vector<8x16x32xf32>
    %29 = arith.addf %23, %28 : vector<8x16x32xf32>
    %c0_18 = arith.constant 0 : index
    %c0_19 = arith.constant 0 : index
    %c0_20 = arith.constant 0 : index
    %30 = vector.load %arg10[%c0_18, %c0_19, %c0_20] : memref<8x16x32xf32, #tpu.memory_space<vmem>>, vector<8x16x32xf32>
    tpu.vector_store %arg10[%c0_18, %c0_19, %c0_20], %29 {strides = array<i32>} : memref<8x16x32xf32, #tpu.memory_space<vmem>>, vector<8x16x32xf32>,
    %c2_i32 = arith.constant 2 : i32
    %31 = arith.index_cast %c2_i32 : i32 to index
    %c0_21 = arith.constant 0 : index
    %c0_22 = arith.constant 0 : index
    %32 = vector.load %arg2[%31, %c0_21, %c0_22] : memref<8x8x32xf32, #tpu.memory_space<vmem>>, vector<1x8x32xf32>
    %33 = vector.shape_cast %32 : vector<1x8x32xf32> to vector<8x32xf32>
    %34 = arith.index_cast %c2_i32 : i32 to index
    %c0_23 = arith.constant 0 : index
    %c0_24 = arith.constant 0 : index
    %35 = vector.load %arg3[%34, %c0_23, %c0_24] : memref<8x16x32xf32, #tpu.memory_space<vmem>>, vector<1x16x32xf32>
    %36 = vector.shape_cast %35 : vector<1x16x32xf32> to vector<16x32xf32>
    %c0_25 = arith.constant 0 : index
    %c0_26 = arith.constant 0 : index
    %c0_27 = arith.constant 0 : index
    %37 = vector.load %arg10[%c0_25, %c0_26, %c0_27] : memref<8x16x32xf32, #tpu.memory_space<vmem>>, vector<8x16x32xf32>
    %38 = vector.shape_cast %33 : vector<8x32xf32> to vector<8x1x32xf32>
    %39 = vector.shape_cast %36 : vector<16x32xf32> to vector<1x16x32xf32>
    %40 = vector.broadcast %38 : vector<8x1x32xf32> to vector<8x16x32xf32>
    %41 = vector.broadcast %39 : vector<1x16x32xf32> to vector<8x16x32xf32>
    %42 = arith.mulf %40, %41 : vector<8x16x32xf32>
    %43 = arith.addf %37, %42 : vector<8x16x32xf32>
    %c0_28 = arith.constant 0 : index
    %c0_29 = arith.constant 0 : index
    %c0_30 = arith.constant 0 : index
    %44 = vector.load %arg10[%c0_28, %c0_29, %c0_30] : memref<8x16x32xf32, #tpu.memory_space<vmem>>, vector<8x16x32xf32>
    tpu.vector_store %arg10[%c0_28, %c0_29, %c0_30], %43 {strides = array<i32>} : memref<8x16x32xf32, #tpu.memory_space<vmem>>, vector<8x16x32xf32>,
    %c3_i32 = arith.constant 3 : i32
    %45 = arith.index_cast %c3_i32 : i32 to index
    %c0_31 = arith.constant 0 : index
    %c0_32 = arith.constant 0 : index
    %46 = vector.load %arg2[%45, %c0_31, %c0_32] : memref<8x8x32xf32, #tpu.memory_space<vmem>>, vector<1x8x32xf32>
    %47 = vector.shape_cast %46 : vector<1x8x32xf32> to vector<8x32xf32>
    %48 = arith.index_cast %c3_i32 : i32 to index
    %c0_33 = arith.constant 0 : index
    %c0_34 = arith.constant 0 : index
    %49 = vector.load %arg3[%48, %c0_33, %c0_34] : memref<8x16x32xf32, #tpu.memory_space<vmem>>, vector<1x16x32xf32>
    %50 = vector.shape_cast %49 : vector<1x16x32xf32> to vector<16x32xf32>
    %c0_35 = arith.constant 0 : index
    %c0_36 = arith.constant 0 : index
    %c0_37 = arith.constant 0 : index
    %51 = vector.load %arg10[%c0_35, %c0_36, %c0_37] : memref<8x16x32xf32, #tpu.memory_space<vmem>>, vector<8x16x32xf32>
    %52 = vector.shape_cast %47 : vector<8x32xf32> to vector<8x1x32xf32>
    %53 = vector.shape_cast %50 : vector<16x32xf32> to vector<1x16x32xf32>
    %54 = vector.broadcast %52 : vector<8x1x32xf32> to vector<8x16x32xf32>
    %55 = vector.broadcast %53 : vector<1x16x32xf32> to vector<8x16x32xf32>
    %56 = arith.mulf %54, %55 : vector<8x16x32xf32>
    %57 = arith.addf %51, %56 : vector<8x16x32xf32>
    %c0_38 = arith.constant 0 : index
    %c0_39 = arith.constant 0 : index
    %c0_40 = arith.constant 0 : index
    %58 = vector.load %arg10[%c0_38, %c0_39, %c0_40] : memref<8x16x32xf32, #tpu.memory_space<vmem>>, vector<8x16x32xf32>
    tpu.vector_store %arg10[%c0_38, %c0_39, %c0_40], %57 {strides = array<i32>} : memref<8x16x32xf32, #tpu.memory_space<vmem>>, vector<8x16x32xf32>,
    %c4_i32 = arith.constant 4 : i32
    %59 = arith.index_cast %c4_i32 : i32 to index
    %c0_41 = arith.constant 0 : index
    %c0_42 = arith.constant 0 : index
    %60 = vector.load %arg2[%59, %c0_41, %c0_42] : memref<8x8x32xf32, #tpu.memory_space<vmem>>, vector<1x8x32xf32>
    %61 = vector.shape_cast %60 : vector<1x8x32xf32> to vector<8x32xf32>
    %62 = arith.index_cast %c4_i32 : i32 to index
    %c0_43 = arith.constant 0 : index
    %c0_44 = arith.constant 0 : index
    %63 = vector.load %arg3[%62, %c0_43, %c0_44] : memref<8x16x32xf32, #tpu.memory_space<vmem>>, vector<1x16x32xf32>
    %64 = vector.shape_cast %63 : vector<1x16x32xf32> to vector<16x32xf32>
    %c0_45 = arith.constant 0 : index
    %c0_46 = arith.constant 0 : index
    %c0_47 = arith.constant 0 : index
    %65 = vector.load %arg10[%c0_45, %c0_46, %c0_47] : memref<8x16x32xf32, #tpu.memory_space<vmem>>, vector<8x16x32xf32>
    %66 = vector.shape_cast %61 : vector<8x32xf32> to vector<8x1x32xf32>
    %67 = vector.shape_cast %64 : vector<16x32xf32> to vector<1x16x32xf32>
    %68 = vector.broadcast %66 : vector<8x1x32xf32> to vector<8x16x32xf32>
    %69 = vector.broadcast %67 : vector<1x16x32xf32> to vector<8x16x32xf32>
    %70 = arith.mulf %68, %69 : vector<8x16x32xf32>
    %71 = arith.addf %65, %70 : vector<8x16x32xf32>
    %c0_48 = arith.constant 0 : index
    %c0_49 = arith.constant 0 : index
    %c0_50 = arith.constant 0 : index
    %72 = vector.load %arg10[%c0_48, %c0_49, %c0_50] : memref<8x16x32xf32, #tpu.memory_space<vmem>>, vector<8x16x32xf32>
    tpu.vector_store %arg10[%c0_48, %c0_49, %c0_50], %71 {strides = array<i32>} : memref<8x16x32xf32, #tpu.memory_space<vmem>>, vector<8x16x32xf32>,
    %c5_i32 = arith.constant 5 : i32
    %73 = arith.index_cast %c5_i32 : i32 to index
    %c0_51 = arith.constant 0 : index
    %c0_52 = arith.constant 0 : index
    %74 = vector.load %arg2[%73, %c0_51, %c0_52] : memref<8x8x32xf32, #tpu.memory_space<vmem>>, vector<1x8x32xf32>
    %75 = vector.shape_cast %74 : vector<1x8x32xf32> to vector<8x32xf32>
    %76 = arith.index_cast %c5_i32 : i32 to index
    %c0_53 = arith.constant 0 : index
    %c0_54 = arith.constant 0 : index
    %77 = vector.load %arg3[%76, %c0_53, %c0_54] : memref<8x16x32xf32, #tpu.memory_space<vmem>>, vector<1x16x32xf32>
    %78 = vector.shape_cast %77 : vector<1x16x32xf32> to vector<16x32xf32>
    %c0_55 = arith.constant 0 : index
    %c0_56 = arith.constant 0 : index
    %c0_57 = arith.constant 0 : index
    %79 = vector.load %arg10[%c0_55, %c0_56, %c0_57] : memref<8x16x32xf32, #tpu.memory_space<vmem>>, vector<8x16x32xf32>
    %80 = vector.shape_cast %75 : vector<8x32xf32> to vector<8x1x32xf32>
    %81 = vector.shape_cast %78 : vector<16x32xf32> to vector<1x16x32xf32>
    %82 = vector.broadcast %80 : vector<8x1x32xf32> to vector<8x16x32xf32>
    %83 = vector.broadcast %81 : vector<1x16x32xf32> to vector<8x16x32xf32>
    %84 = arith.mulf %82, %83 : vector<8x16x32xf32>
    %85 = arith.addf %79, %84 : vector<8x16x32xf32>
    %c0_58 = arith.constant 0 : index
    %c0_59 = arith.constant 0 : index
    %c0_60 = arith.constant 0 : index
    %86 = vector.load %arg10[%c0_58, %c0_59, %c0_60] : memref<8x16x32xf32, #tpu.memory_space<vmem>>, vector<8x16x32xf32>
    tpu.vector_store %arg10[%c0_58, %c0_59, %c0_60], %85 {strides = array<i32>} : memref<8x16x32xf32, #tpu.memory_space<vmem>>, vector<8x16x32xf32>,
    %c6_i32 = arith.constant 6 : i32
    %87 = arith.index_cast %c6_i32 : i32 to index
    %c0_61 = arith.constant 0 : index
    %c0_62 = arith.constant 0 : index
    %88 = vector.load %arg2[%87, %c0_61, %c0_62] : memref<8x8x32xf32, #tpu.memory_space<vmem>>, vector<1x8x32xf32>
    %89 = vector.shape_cast %88 : vector<1x8x32xf32> to vector<8x32xf32>
    %90 = arith.index_cast %c6_i32 : i32 to index
    %c0_63 = arith.constant 0 : index
    %c0_64 = arith.constant 0 : index
    %91 = vector.load %arg3[%90, %c0_63, %c0_64] : memref<8x16x32xf32, #tpu.memory_space<vmem>>, vector<1x16x32xf32>
    %92 = vector.shape_cast %91 : vector<1x16x32xf32> to vector<16x32xf32>
    %c0_65 = arith.constant 0 : index
    %c0_66 = arith.constant 0 : index
    %c0_67 = arith.constant 0 : index
    %93 = vector.load %arg10[%c0_65, %c0_66, %c0_67] : memref<8x16x32xf32, #tpu.memory_space<vmem>>, vector<8x16x32xf32>
    %94 = vector.shape_cast %89 : vector<8x32xf32> to vector<8x1x32xf32>
    %95 = vector.shape_cast %92 : vector<16x32xf32> to vector<1x16x32xf32>
    %96 = vector.broadcast %94 : vector<8x1x32xf32> to vector<8x16x32xf32>
    %97 = vector.broadcast %95 : vector<1x16x32xf32> to vector<8x16x32xf32>
    %98 = arith.mulf %96, %97 : vector<8x16x32xf32>
    %99 = arith.addf %93, %98 : vector<8x16x32xf32>
    %c0_68 = arith.constant 0 : index
    %c0_69 = arith.constant 0 : index
    %c0_70 = arith.constant 0 : index
    %100 = vector.load %arg10[%c0_68, %c0_69, %c0_70] : memref<8x16x32xf32, #tpu.memory_space<vmem>>, vector<8x16x32xf32>
    tpu.vector_store %arg10[%c0_68, %c0_69, %c0_70], %99 {strides = array<i32>} : memref<8x16x32xf32, #tpu.memory_space<vmem>>, vector<8x16x32xf32>,
    %c7_i32 = arith.constant 7 : i32
    %101 = arith.index_cast %c7_i32 : i32 to index
    %c0_71 = arith.constant 0 : index
    %c0_72 = arith.constant 0 : index
    %102 = vector.load %arg2[%101, %c0_71, %c0_72] : memref<8x8x32xf32, #tpu.memory_space<vmem>>, vector<1x8x32xf32>
    %103 = vector.shape_cast %102 : vector<1x8x32xf32> to vector<8x32xf32>
    %104 = arith.index_cast %c7_i32 : i32 to index
    %c0_73 = arith.constant 0 : index
    %c0_74 = arith.constant 0 : index
    %105 = vector.load %arg3[%104, %c0_73, %c0_74] : memref<8x16x32xf32, #tpu.memory_space<vmem>>, vector<1x16x32xf32>
    %106 = vector.shape_cast %105 : vector<1x16x32xf32> to vector<16x32xf32>
    %c0_75 = arith.constant 0 : index
    %c0_76 = arith.constant 0 : index
    %c0_77 = arith.constant 0 : index
    %107 = vector.load %arg10[%c0_75, %c0_76, %c0_77] : memref<8x16x32xf32, #tpu.memory_space<vmem>>, vector<8x16x32xf32>
    %108 = vector.shape_cast %103 : vector<8x32xf32> to vector<8x1x32xf32>
    %109 = vector.shape_cast %106 : vector<16x32xf32> to vector<1x16x32xf32>
    %110 = vector.broadcast %108 : vector<8x1x32xf32> to vector<8x16x32xf32>
    %111 = vector.broadcast %109 : vector<1x16x32xf32> to vector<8x16x32xf32>
    %112 = arith.mulf %110, %111 : vector<8x16x32xf32>
    %113 = arith.addf %107, %112 : vector<8x16x32xf32>
    %c0_78 = arith.constant 0 : index
    %c0_79 = arith.constant 0 : index
    %c0_80 = arith.constant 0 : index
    %114 = vector.load %arg10[%c0_78, %c0_79, %c0_80] : memref<8x16x32xf32, #tpu.memory_space<vmem>>, vector<8x16x32xf32>
    tpu.vector_store %arg10[%c0_78, %c0_79, %c0_80], %113 {strides = array<i32>} : memref<8x16x32xf32, #tpu.memory_space<vmem>>, vector<8x16x32xf32>,
    %c8_i32 = arith.constant 8 : i32
    %c1_i32_81 = arith.constant 1 : i32
    %115 = arith.cmpi eq, %arg1, %c1_i32_81 : i32
    %116 = arith.extui %115 : i1 to i32
    %c0_i32_82 = arith.constant 0 : i32
    %117 = arith.cmpi ne, %116, %c0_i32_82 : i32
    scf.if %117 {
      %c0_83 = arith.constant 0 : index
      %c0_84 = arith.constant 0 : index
      %c0_85 = arith.constant 0 : index
      %118 = vector.load %arg10[%c0_83, %c0_84, %c0_85] : memref<8x16x32xf32, #tpu.memory_space<vmem>>, vector<8x16x32xf32>
      %c0_86 = arith.constant 0 : index
      %c0_87 = arith.constant 0 : index
      %119 = vector.load %arg5[%c0_86, %c0_87] : memref<1x32xf32, #tpu.memory_space<vmem>>, vector<1x32xf32>
      %c0_88 = arith.constant 0 : index
      %c0_89 = arith.constant 0 : index
      %120 = vector.load %arg6[%c0_88, %c0_89] : memref<1x32xf32, #tpu.memory_space<vmem>>, vector<1x32xf32>
      %cst = arith.constant dense<0.000000e+00> : vector<8x16xf32>
      %121 = vector.multi_reduction <add>, %118, %cst [2] : vector<8x16x32xf32> to vector<8x16xf32>
      %122 = vector.shape_cast %121 : vector<8x16xf32> to vector<8x16x1xf32>
      %cst_90 = arith.constant 3.200000e+01 : f32
      %123 = vector.broadcast %cst_90 : f32 to vector<8x16x1xf32>
      %124 = arith.divf %122, %123 : vector<8x16x1xf32>
      %125 = vector.broadcast %124 : vector<8x16x1xf32> to vector<8x16x32xf32>
      %126 = arith.subf %118, %125 : vector<8x16x32xf32>
      %127 = arith.mulf %126, %126 : vector<8x16x32xf32>
      %cst_91 = arith.constant dense<0.000000e+00> : vector<8x16xf32>
      %128 = vector.multi_reduction <add>, %127, %cst_91 [2] : vector<8x16x32xf32> to vector<8x16xf32>
      %129 = vector.shape_cast %128 : vector<8x16xf32> to vector<8x16x1xf32>
      %cst_92 = arith.constant 3.200000e+01 : f32
      %130 = vector.broadcast %cst_92 : f32 to vector<8x16x1xf32>
      %131 = arith.divf %129, %130 : vector<8x16x1xf32>
      %132 = vector.broadcast %124 : vector<8x16x1xf32> to vector<8x16x32xf32>
      %133 = arith.subf %118, %132 : vector<8x16x32xf32>
      %cst_93 = arith.constant 9.99999974E-6 : f32
      %134 = vector.broadcast %cst_93 : f32 to vector<8x16x1xf32>
      %135 = arith.addf %131, %134 : vector<8x16x1xf32>
      %136 = math.rsqrt %135 : vector<8x16x1xf32>
      %137 = vector.broadcast %136 : vector<8x16x1xf32> to vector<8x16x32xf32>
      %138 = arith.mulf %133, %137 : vector<8x16x32xf32>
      %139 = vector.shape_cast %119 : vector<1x32xf32> to vector<1x1x32xf32>
      %140 = vector.broadcast %139 : vector<1x1x32xf32> to vector<8x16x32xf32>
      %141 = arith.mulf %138, %140 : vector<8x16x32xf32>
      %142 = vector.shape_cast %120 : vector<1x32xf32> to vector<1x1x32xf32>
      %143 = vector.broadcast %142 : vector<1x1x32xf32> to vector<8x16x32xf32>
      %144 = arith.addf %141, %143 : vector<8x16x32xf32>
      %145 = vector.shape_cast %144 : vector<8x16x32xf32> to vector<128x32xf32>
      %c0_94 = arith.constant 0 : index
      %c0_95 = arith.constant 0 : index
      %146 = vector.load %arg7[%c0_94, %c0_95] : memref<32x32xf32, #tpu.memory_space<vmem>>, vector<32x32xf32>
      %cst_96 = arith.constant dense<0.000000e+00> : vector<128x32xf32>
      %147 = tpu.matmul %145, %146, %cst_96 {dimension_numbers = #tpu.dot_dimension_numbers<[1], [0], [0], [1], [0, 0, 1, 1], [], []>} : vector<128x32xf32>, vector<32x32xf32>, vector<128x32xf32> -> vector<128x32xf32>
      %c0_97 = arith.constant 0 : index
      %c0_98 = arith.constant 0 : index
      %148 = vector.load %arg8[%c0_97, %c0_98] : memref<1x32xf32, #tpu.memory_space<vmem>>, vector<1x32xf32>
      %149 = vector.broadcast %148 : vector<1x32xf32> to vector<128x32xf32>
      %150 = arith.addf %147, %149 : vector<128x32xf32>
      %151 = vector.shape_cast %150 : vector<128x32xf32> to vector<8x16x32xf32>
      %c0_99 = arith.constant 0 : index
      %c0_100 = arith.constant 0 : index
      %c0_101 = arith.constant 0 : index
      %152 = vector.load %arg4[%c0_99, %c0_100, %c0_101] : memref<8x16x32xf32, #tpu.memory_space<vmem>>, vector<8x16x32xf32>
      %153 = arith.mulf %151, %152 : vector<8x16x32xf32>
      %c0_102 = arith.constant 0 : index
      %c0_103 = arith.constant 0 : index
      %c0_104 = arith.constant 0 : index
      %154 = vector.load %arg9[%c0_102, %c0_103, %c0_104] : memref<8x16x32xf32, #tpu.memory_space<vmem>>, vector<8x16x32xf32>
      tpu.vector_store %arg9[%c0_102, %c0_103, %c0_104], %153 {strides = array<i32>} : memref<8x16x32xf32, #tpu.memory_space<vmem>>, vector<8x16x32xf32>,
    } else {
    }
    return
  }
  func.func @transform_0(%arg0: i32, %arg1: i32) -> (i32, i32, i32) {
    %c0_i32 = arith.constant 0 : i32
    %c0_i32_0 = arith.constant 0 : i32
    return %arg1, %arg0, %c0_i32 : i32, i32, i32
  }
  func.func @transform_1(%arg0: i32, %arg1: i32) -> (i32, i32, i32) {
    %c0_i32 = arith.constant 0 : i32
    %c0_i32_0 = arith.constant 0 : i32
    %c0_i32_1 = arith.constant 0 : i32
    return %arg1, %c0_i32, %c0_i32_0 : i32, i32, i32
  }
  func.func @transform_2(%arg0: i32, %arg1: i32) -> (i32, i32, i32) {
    %c0_i32 = arith.constant 0 : i32
    %c0_i32_0 = arith.constant 0 : i32
    %c0_i32_1 = arith.constant 0 : i32
    return %arg0, %c0_i32, %c0_i32_0 : i32, i32, i32
  }
  func.func @transform_3(%arg0: i32, %arg1: i32) -> (i32, i32) {
    %c0_i32 = arith.constant 0 : i32
    %c0_i32_0 = arith.constant 0 : i32
    %c0_i32_1 = arith.constant 0 : i32
    return %c0_i32, %c0_i32_0 : i32, i32
  }
  func.func @transform_4(%arg0: i32, %arg1: i32) -> (i32, i32) {
    %c0_i32 = arith.constant 0 : i32
    %c0_i32_0 = arith.constant 0 : i32
    %c0_i32_1 = arith.constant 0 : i32
    return %c0_i32, %c0_i32_0 : i32, i32
  }
  func.func @transform_5(%arg0: i32, %arg1: i32) -> (i32, i32) {
    %c0_i32 = arith.constant 0 : i32
    %c0_i32_0 = arith.constant 0 : i32
    %c0_i32_1 = arith.constant 0 : i32
    return %c0_i32, %c0_i32_0 : i32, i32
  }
  func.func @transform_6(%arg0: i32, %arg1: i32) -> (i32, i32) {
    %c0_i32 = arith.constant 0 : i32
    %c0_i32_0 = arith.constant 0 : i32
    %c0_i32_1 = arith.constant 0 : i32
    return %c0_i32, %c0_i32_0 : i32, i32
  }
  func.func @transform_7(%arg0: i32, %arg1: i32) -> (i32, i32, i32) {
    %c0_i32 = arith.constant 0 : i32
    %c0_i32_0 = arith.constant 0 : i32
    %c0_i32_1 = arith.constant 0 : i32
    return %arg0, %c0_i32, %c0_i32_0 : i32, i32, i32
  }
}

module attributes {stable_mosaic.version = 11 : i64} {
  func.func @proj_kernel(%arg0: i32, %arg1: memref<128x32xf32, #tpu.memory_space<vmem>>, %arg2: memref<1x32xf32, #tpu.memory_space<vmem>>, %arg3: memref<1x32xf32, #tpu.memory_space<vmem>>, %arg4: memref<32x160xf32, #tpu.memory_space<vmem>>, %arg5: memref<1x160xf32, #tpu.memory_space<vmem>>, %arg6: memref<128x32xf32, #tpu.memory_space<vmem>>, %arg7: memref<128x32xf32, #tpu.memory_space<vmem>>, %arg8: memref<128x32xf32, #tpu.memory_space<vmem>>) attributes {dimension_semantics = [#tpu.dimension_semantics<parallel>], iteration_bounds = array<i64: 2>, scalar_prefetch = 0 : i64, scratch_operands = 0 : i64, tpu.core_type = #tpu.core_type<tc>, window_params = [{transform_indices = @transform_0, window_bounds = array<i64: 128, 32>}, {pipeline_mode = #tpu.pipeline_mode<synchronous>, transform_indices = @transform_1, window_bounds = array<i64: 1, 32>}, {pipeline_mode = #tpu.pipeline_mode<synchronous>, transform_indices = @transform_2, window_bounds = array<i64: 1, 32>}, {pipeline_mode = #tpu.pipeline_mode<synchronous>, transform_indices = @transform_3, window_bounds = array<i64: 32, 160>}, {pipeline_mode = #tpu.pipeline_mode<synchronous>, transform_indices = @transform_4, window_bounds = array<i64: 1, 160>}, {transform_indices = @transform_5, window_bounds = array<i64: 128, 32>}, {transform_indices = @transform_6, window_bounds = array<i64: 128, 32>}, {transform_indices = @transform_7, window_bounds = array<i64: 128, 32>}]} {
    %c0 = arith.constant 0 : index
    %c0_0 = arith.constant 0 : index
    %0 = vector.load %arg1[%c0, %c0_0] : memref<128x32xf32, #tpu.memory_space<vmem>>, vector<128x32xf32>
    %c0_1 = arith.constant 0 : index
    %c0_2 = arith.constant 0 : index
    %1 = vector.load %arg2[%c0_1, %c0_2] : memref<1x32xf32, #tpu.memory_space<vmem>>, vector<1x32xf32>
    %c0_3 = arith.constant 0 : index
    %c0_4 = arith.constant 0 : index
    %2 = vector.load %arg3[%c0_3, %c0_4] : memref<1x32xf32, #tpu.memory_space<vmem>>, vector<1x32xf32>
    %cst = arith.constant dense<0.000000e+00> : vector<128xf32>
    %3 = vector.multi_reduction <add>, %0, %cst [1] : vector<128x32xf32> to vector<128xf32>
    %4 = vector.shape_cast %3 : vector<128xf32> to vector<128x1xf32>
    %cst_5 = arith.constant 3.200000e+01 : f32
    %5 = vector.broadcast %cst_5 : f32 to vector<128x1xf32>
    %6 = arith.divf %4, %5 : vector<128x1xf32>
    %7 = vector.broadcast %6 : vector<128x1xf32> to vector<128x32xf32>
    %8 = arith.subf %0, %7 : vector<128x32xf32>
    %9 = arith.mulf %8, %8 : vector<128x32xf32>
    %cst_6 = arith.constant dense<0.000000e+00> : vector<128xf32>
    %10 = vector.multi_reduction <add>, %9, %cst_6 [1] : vector<128x32xf32> to vector<128xf32>
    %11 = vector.shape_cast %10 : vector<128xf32> to vector<128x1xf32>
    %cst_7 = arith.constant 3.200000e+01 : f32
    %12 = vector.broadcast %cst_7 : f32 to vector<128x1xf32>
    %13 = arith.divf %11, %12 : vector<128x1xf32>
    %14 = vector.broadcast %6 : vector<128x1xf32> to vector<128x32xf32>
    %15 = arith.subf %0, %14 : vector<128x32xf32>
    %cst_8 = arith.constant 9.99999974E-6 : f32
    %16 = vector.broadcast %cst_8 : f32 to vector<128x1xf32>
    %17 = arith.addf %13, %16 : vector<128x1xf32>
    %18 = math.rsqrt %17 : vector<128x1xf32>
    %19 = vector.broadcast %18 : vector<128x1xf32> to vector<128x32xf32>
    %20 = arith.mulf %15, %19 : vector<128x32xf32>
    %21 = vector.broadcast %1 : vector<1x32xf32> to vector<128x32xf32>
    %22 = arith.mulf %20, %21 : vector<128x32xf32>
    %23 = vector.broadcast %2 : vector<1x32xf32> to vector<128x32xf32>
    %24 = arith.addf %22, %23 : vector<128x32xf32>
    %c0_9 = arith.constant 0 : index
    %c0_10 = arith.constant 0 : index
    %25 = vector.load %arg4[%c0_9, %c0_10] : memref<32x160xf32, #tpu.memory_space<vmem>>, vector<32x160xf32>
    %cst_11 = arith.constant dense<0.000000e+00> : vector<128x160xf32>
    %26 = tpu.matmul %24, %25, %cst_11 {dimension_numbers = #tpu.dot_dimension_numbers<[1], [0], [0], [1], [0, 0, 1, 1], [], []>} : vector<128x32xf32>, vector<32x160xf32>, vector<128x160xf32> -> vector<128x160xf32>
    %c0_12 = arith.constant 0 : index
    %c0_13 = arith.constant 0 : index
    %27 = vector.load %arg5[%c0_12, %c0_13] : memref<1x160xf32, #tpu.memory_space<vmem>>, vector<1x160xf32>
    %28 = vector.broadcast %27 : vector<1x160xf32> to vector<128x160xf32>
    %29 = arith.addf %26, %28 : vector<128x160xf32>
    %30 = vector.extract_strided_slice %29 {offsets = [0, 0], sizes = [128, 32], strides = [1, 1]} : vector<128x160xf32> to vector<128x32xf32>
    %31 = vector.extract_strided_slice %29 {offsets = [0, 32], sizes = [128, 32], strides = [1, 1]} : vector<128x160xf32> to vector<128x32xf32>
    %32 = vector.extract_strided_slice %29 {offsets = [0, 64], sizes = [128, 32], strides = [1, 1]} : vector<128x160xf32> to vector<128x32xf32>
    %33 = vector.extract_strided_slice %29 {offsets = [0, 96], sizes = [128, 32], strides = [1, 1]} : vector<128x160xf32> to vector<128x32xf32>
    %34 = vector.extract_strided_slice %29 {offsets = [0, 128], sizes = [128, 32], strides = [1, 1]} : vector<128x160xf32> to vector<128x32xf32>
    %35 = arith.negf %31 : vector<128x32xf32>
    %36 = math.exp %35 : vector<128x32xf32>
    %cst_14 = arith.constant 1.000000e+00 : f32
    %37 = vector.broadcast %cst_14 : f32 to vector<128x32xf32>
    %38 = arith.addf %37, %36 : vector<128x32xf32>
    %39 = arith.divf %37, %38 : vector<128x32xf32>
    %40 = arith.mulf %30, %39 : vector<128x32xf32>
    %c0_15 = arith.constant 0 : index
    %c0_16 = arith.constant 0 : index
    %41 = vector.load %arg6[%c0_15, %c0_16] : memref<128x32xf32, #tpu.memory_space<vmem>>, vector<128x32xf32>
    tpu.vector_store %arg6[%c0_15, %c0_16], %40 {strides = array<i32>} : memref<128x32xf32, #tpu.memory_space<vmem>>, vector<128x32xf32>,
    %42 = arith.negf %33 : vector<128x32xf32>
    %43 = math.exp %42 : vector<128x32xf32>
    %cst_17 = arith.constant 1.000000e+00 : f32
    %44 = vector.broadcast %cst_17 : f32 to vector<128x32xf32>
    %45 = arith.addf %44, %43 : vector<128x32xf32>
    %46 = arith.divf %44, %45 : vector<128x32xf32>
    %47 = arith.mulf %32, %46 : vector<128x32xf32>
    %c0_18 = arith.constant 0 : index
    %c0_19 = arith.constant 0 : index
    %48 = vector.load %arg7[%c0_18, %c0_19] : memref<128x32xf32, #tpu.memory_space<vmem>>, vector<128x32xf32>
    tpu.vector_store %arg7[%c0_18, %c0_19], %47 {strides = array<i32>} : memref<128x32xf32, #tpu.memory_space<vmem>>, vector<128x32xf32>,
    %49 = arith.negf %34 : vector<128x32xf32>
    %50 = math.exp %49 : vector<128x32xf32>
    %cst_20 = arith.constant 1.000000e+00 : f32
    %51 = vector.broadcast %cst_20 : f32 to vector<128x32xf32>
    %52 = arith.addf %51, %50 : vector<128x32xf32>
    %53 = arith.divf %51, %52 : vector<128x32xf32>
    %c0_21 = arith.constant 0 : index
    %c0_22 = arith.constant 0 : index
    %54 = vector.load %arg8[%c0_21, %c0_22] : memref<128x32xf32, #tpu.memory_space<vmem>>, vector<128x32xf32>
    tpu.vector_store %arg8[%c0_21, %c0_22], %53 {strides = array<i32>} : memref<128x32xf32, #tpu.memory_space<vmem>>, vector<128x32xf32>,
    return
  }
  func.func @transform_0(%arg0: i32) -> (i32, i32) {
    %c0_i32 = arith.constant 0 : i32
    %c0_i32_0 = arith.constant 0 : i32
    return %arg0, %c0_i32 : i32, i32
  }
  func.func @transform_1(%arg0: i32) -> (i32, i32) {
    %c0_i32 = arith.constant 0 : i32
    %c0_i32_0 = arith.constant 0 : i32
    %c0_i32_1 = arith.constant 0 : i32
    return %c0_i32, %c0_i32_0 : i32, i32
  }
  func.func @transform_2(%arg0: i32) -> (i32, i32) {
    %c0_i32 = arith.constant 0 : i32
    %c0_i32_0 = arith.constant 0 : i32
    %c0_i32_1 = arith.constant 0 : i32
    return %c0_i32, %c0_i32_0 : i32, i32
  }
  func.func @transform_3(%arg0: i32) -> (i32, i32) {
    %c0_i32 = arith.constant 0 : i32
    %c0_i32_0 = arith.constant 0 : i32
    %c0_i32_1 = arith.constant 0 : i32
    return %c0_i32, %c0_i32_0 : i32, i32
  }
  func.func @transform_4(%arg0: i32) -> (i32, i32) {
    %c0_i32 = arith.constant 0 : i32
    %c0_i32_0 = arith.constant 0 : i32
    %c0_i32_1 = arith.constant 0 : i32
    return %c0_i32, %c0_i32_0 : i32, i32
  }
  func.func @transform_5(%arg0: i32) -> (i32, i32) {
    %c0_i32 = arith.constant 0 : i32
    %c0_i32_0 = arith.constant 0 : i32
    return %arg0, %c0_i32 : i32, i32
  }
  func.func @transform_6(%arg0: i32) -> (i32, i32) {
    %c0_i32 = arith.constant 0 : i32
    %c0_i32_0 = arith.constant 0 : i32
    return %arg0, %c0_i32 : i32, i32
  }
  func.func @transform_7(%arg0: i32) -> (i32, i32) {
    %c0_i32 = arith.constant 0 : i32
    %c0_i32_0 = arith.constant 0 : i32
    return %arg0, %c0_i32 : i32, i32
  }
}

</mosaic_0001>

<bundles_post_ra>
// kernel: tri_in.2
= control target key start
LH: loop header
LB: loop body
LE: loop exit
PB: predicated region body
PF: predicated region fallthrough
CT: control target
= control target key end

     0   :  { %13 = vsyncpa [#allocation3], 0  ;;  %s2397_s0 = inlined_call_operand.hbm [shape: f32[256,32], index: 0, kind: input, shape index: {}]   ;;  %s2398_s1 = inlined_call_operand.vmem [shape: f32[1,32], index: 1, kind: input, shape index: {}]   ;;  %s2399_s2 = inlined_call_operand.vmem [shape: f32[1,32], index: 2, kind: input, shape index: {}]   ;;  %s2400_s3 = inlined_call_operand.vmem [shape: f32[32,160], index: 3, kind: input, shape index: {}]   ;;  %s2401_s4 = inlined_call_operand.vmem [shape: f32[1,160], index: 4, kind: input, shape index: {}]   ;;  %s2402_s5 = inlined_call_operand.vmem [shape: f32[256,32], index: 5, kind: output, shape index: {0}]   ;;  %s2403_s6 = inlined_call_operand.vmem [shape: f32[256,32], index: 6, kind: output, shape index: {1}]   ;;  %s2404_s7 = inlined_call_operand.vmem [shape: f32[256,32], index: 7, kind: output, shape index: {2}]  }
   0x1   :  { %15 = vsyncpa [#allocation3 + $0x1], 0  ;;  %s1744_s24 = smov 0   ;;  %s1746_s25 = smov 0  }
   0x2   :  { %s1748_s26 = smov 0   ;;  %s1750_s27 = smov 0  }
   0x3 LB: > { %s1348_s28 = sadd.s32 4294967295, %s1696_s27   ;;  %s1764_s29 = sadd.s32 1, %s1696_s27   ;;  %s1696_s27 = sphi %s1750_s27, %s2411_s27   ;;  %s1692_s26 = sphi %s1748_s26, %s2410_s26   ;;  %s1688_s25 = sphi %s1746_s25, %s2409_s25   ;;  %s1684_s24 = sphi %s1744_s24, %s2408_s24  }
   0x4   : > { %s25_s30 = ssub.s32 %s1696_s27, %s1764_s29  ;;  %s28_s8 = sadd.s32 1, %s1692_s26 }
   0x5   : > { %p26_p0 = scmp.eq.s32.totalorder %s25_s30, 0  ;;  %p35_p1 = scmp.ne.s32.totalorder %s1692_s26, %s1688_s25 }
   0x6   : > { %p36_p2 = scmp.eq.s32.totalorder %s1696_s27, 0  ;;  %p41_p3 = scmp.ne.s32.totalorder %s1688_s25, %s1684_s24 }
   0x7   : > { %s1774_s9 = scalar_select %p26_p0, %s1692_s26, %s28_s8  }
   0x8   : > { %p37_p4 = por %p36_p2, %p35_p1  ;;  %p42_p5 = scmp.eq.s32.totalorder %s1348_s28, 0 }
   0x9   : > { %p1434_p6 = scmp.lt.s32.totalorder %s1696_s27, 2  ;;  %s239_s11 = sand.u32 1, %s1692_s26  }
   0xa   : > { %p1779_p7 = por %p42_p5, %p41_p3  ;;  %s1352_s12 = sshll.u32 %s239_s11, 7 }
   0xb   : > { %s1415_s13 = sshll.u32 %s1696_s27, 11  ;;  %s243_s17 = scalar_lea.vmem [#allocation2], %s1352_s12 }
   0xc   : > { %s1788_s16 = scalar_lea.hbm %s2397_s0, %s1415_s13  ;;  %s250_s18 = sshll.u32 %s243_s17, 4  ;;  %s1790_s18 = int_to_ptr.vmem [resolvable:$true] %s250_s18 }
   0xd   : > { %p1792_p8 = pnand %p1434_p6, %p37_p4  ;;  %s1797_s20 = scalar_lea.sflag [#allocation3], %s239_s11 }
   0xe   : > { %s1632_s21 = scalar_lea.hbm %s1788_s16, 2048  ;;  %s1637_s24 = scalar_lea.hbm %s2397_s0, 4096 }
   0xf   : > { %p1633_p10 = scmp.ne.s32.totalorder %s1788_s16, %s1632_s21  ;;  %p1634_p11 = pneg %p1792_p8 }
  0x10   : > { %p1638_p0 = scmp.lt.u32.totalorder %s1788_s16, %s2397_s0  ;;  %p1639_p1 = scmp.lt.u32.totalorder %s1637_s24, %s1632_s21 }
  0x11   : > { %p1635_p12 = pnand %p1634_p11, %p1633_p10  ;;  %p1641_p3 = scmp.lt.u32.totalorder %s1632_s21, %s1788_s16 }
  0x12   : > { %p1640_p2 = por %p1639_p1, %p1638_p0 }
  0x13   : > { %p1636_p13 = pneg %p1635_p12 }
  0x14   : > { %p1642_p4 = por %p1641_p3, %p1640_p2 }
  0x16   : > { %p1643_p5 = pnand %p1642_p4, %p1636_p13 }
  0x18   : > { %1646 = shalt.err (!%p1643_p5)
}
  0x19   : > { %s1647_s11 = scalar_lea.vmem %s1790_s18, 2048  ;;  %s1698_s12 = smov [#allocation2]  }
  0x1a   : > { %p1648_p6 = scmp.ne.s32.totalorder %s1790_s18, %s1647_s11  ;;  %s1652_s13 = sshll.u32 %s1698_s12, 4  ;;  %s1653_s13 = int_to_ptr.vmem [resolvable:$false] %s1652_s13 }
  0x1b   : > { %s1654_s14 = scalar_lea.vmem %s1653_s13, 4096  ;;  %p1655_p9 = scmp.lt.s32.totalorder %s1790_s18, %s1653_s13 }
  0x1c   : > { %p1650_p10 = pnand %p1648_p6, %p1634_p11  ;;  %p1656_p0 = scmp.lt.s32.totalorder %s1654_s14, %s1647_s11 }
  0x1e   : > { %p1651_p12 = pneg %p1650_p10  ;;  %p1657_p1 = por %p1656_p0, %p1655_p9 }
  0x20   : > { %p1658_p2 = pnand %p1657_p1, %p1651_p12 }
  0x22   : > { %1661 = shalt.err (!%p1658_p2)
}
  0x23   : > { %s1699_s15 = smov 128   ;;  %s1700_s17 = smov 8  }
  0x24   : > { %1433 = dma.hbm_to_vmem [thread:$0]  (!%p1792_p8), %s1788_s16, 2048, %s1790_s18, %s1797_s20, %s1699_s15, %s1699_s15, %s1700_s17  }
  0x25   : > { %p258_p11 = scmp.lt.s32.totalorder %s1696_s27, 3  ;;  %p2407_p13 = scmp.ge.s32.totalorder %s1696_s27, 1 }
  0x27   : > { %p259_p3 = pnand %p2407_p13, %p258_p11 }
  0x28   : > { %s264_s21 = sand.u32 (!%p259_p3), 1, %s1688_s25  }
  0x29   : > { %262 = sbr.rel (%p259_p3) target bundleno = 894 (0x37e), region = 40  ;;  %s1356_s22 = sshll.u32 (!%p259_p3), %s264_s21, 7 }
  0x2a   : > { %s265_s23 = scalar_lea.sflag (!%p259_p3), [#allocation3], %s264_s21  ;;  %s1829_s24 = scalar_lea.vmem (!%p259_p3), [#allocation2], %s1356_s22 }
  0x30   : > { %1679 = dma.done.wait (%p1779_p7), %s265_s23, 2048  }
  0x31   : > { %1681 = vsyncadd (%p1779_p7), %s265_s23, 4294965248  ;;  %vm346_vm0 = vcmask 261120   ;;  %v328_v0 = vld [vmem:[%s1829_s24] sm:$0xff]  ;;  %v329_v1 = vld [vmem:[%s1829_s24 + $0x8] sm:$0xff]  ;;  %s2134_s30 = sshll.u32 %s1348_s28, 4  ;;  %s1702_s12 = smov 96  }
  0x32   : > { %v336_v2 = vld [vmem:[%s1829_s24 + $0x40] sm:$0xff]  ;;  %v347_v3 = vsel %vm346_vm0, %v328_v0, 0.0  ;;  %v350_v4 = vsel %vm346_vm0, %v329_v1, 0.0  ;;  %v337_v5 = vld [vmem:[%s1829_s24 + $0x48] sm:$0xff]  ;;  %v330_v8 = vld [vmem:[%s1829_s24 + $0x10] sm:$0xff]  ;;  %p311_p7 = scmp.lt.s32.totalorder %s2134_s30, 31 }
  0x33   : > { %348 = vadd.xlane.f32.xlu0 %v347_v3  ;;  %351 = vadd.xlane.f32.xlu1 %v350_v4  ;;  %v371_v6 = vsel %vm346_vm0, %v336_v2, 0.0  ;;  %v374_v7 = vsel %vm346_vm0, %v337_v5, 0.0  ;;  %v338_v9 = vld [vmem:[%s1829_s24 + $0x50] sm:$0xff]  ;;  %v353_v10 = vsel %vm346_vm0, %v330_v8, 0.0  ;;  %v1848_v12 = vld [vmem:[%s1829_s24 + $0x18] sm:$0xff]  ;;  %v1858_v16 = vld [vmem:[%s1829_s24 + $0x20] sm:$0xff] }
  0x34   : > { %v377_v11 = vsel %vm346_vm0, %v338_v9, 0.0  ;;  %v1851_v13 = vld [vmem:[%s1829_s24 + $0x58] sm:$0xff]  ;;  %v356_v14 = vsel %vm346_vm0, %v1848_v12, 0.0  ;;  %v1861_v17 = vld [vmem:[%s1829_s24 + $0x60] sm:$0xff]  ;;  %v359_v18 = vsel %vm346_vm0, %v1858_v16, 0.0  ;;  %v1868_v20 = vld [vmem:[%s1829_s24 + $0x28] sm:$0xff] }
  0x35   : > { %v380_v15 = vsel %vm346_vm0, %v1851_v13, 0.0  ;;  %v383_v19 = vsel %vm346_vm0, %v1861_v17, 0.0  ;;  %v1871_v21 = vld [vmem:[%s1829_s24 + $0x68] sm:$0xff]  ;;  %v362_v22 = vsel %vm346_vm0, %v1868_v20, 0.0  ;;  %v1878_v24 = vld [vmem:[%s1829_s24 + $0x30] sm:$0xff]  ;;  %v1888_v28 = vld [vmem:[%s1829_s24 + $0x38] sm:$0xff] }
  0x36   : > { %v386_v23 = vsel %vm346_vm0, %v1871_v21, 0.0  ;;  %v1881_v25 = vld [vmem:[%s1829_s24 + $0x70] sm:$0xff]  ;;  %v365_v26 = vsel %vm346_vm0, %v1878_v24, 0.0  ;;  %v1891_v29 = vld [vmem:[%s1829_s24 + $0x78] sm:$0xff]  ;;  %v368_v30 = vsel %vm346_vm0, %v1888_v28, 0.0  ;;  %s2413_s30 = smov (!%p311_p7, %s2134_s30), 31 }
  0x37   : > { %372 = vadd.xlane.f32.xlu0 %v371_v6  ;;  %375 = vadd.xlane.f32.xlu1 %v374_v7  ;;  %v389_v27 = vsel %vm346_vm0, %v1881_v25, 0.0  ;;  %v392_v31 = vsel %vm346_vm0, %v1891_v29, 0.0  ;;  %s2153_s27 = sshll.u32 %s2413_s30, 3  ;;  %s1703_s17 = smov 64  }
  0x38   : > { %s2164_s11 = scalar_lea.vmem %s2404_s7, %s2153_s27  ;;  %s2280_s15 = scalar_lea.vmem %s2402_s5, %s2153_s27 }
  0x39   : > { %s2350_s23 = scalar_lea.vmem %s2403_s6, %s2153_s27 }
  0x3b   : > { %354 = vadd.xlane.f32.xlu0 %v353_v10  ;;  %378 = vadd.xlane.f32.xlu1 %v377_v11 }
  0x3f   : > { %357 = vadd.xlane.f32.xlu0 %v356_v14  ;;  %381 = vadd.xlane.f32.xlu1 %v380_v15 }
  0x43   : > { %360 = vadd.xlane.f32.xlu0 %v359_v18  ;;  %384 = vadd.xlane.f32.xlu1 %v383_v19 }
  0x47   : > { %363 = vadd.xlane.f32.xlu0 %v362_v22  ;;  %387 = vadd.xlane.f32.xlu1 %v386_v23 }
  0x4b   : > { %366 = vadd.xlane.f32.xlu0 %v365_v26  ;;  %390 = vadd.xlane.f32.xlu1 %v389_v27 }
  0x4f   : > { %369 = vadd.xlane.f32.xlu0 %v368_v30  ;;  %393 = vadd.xlane.f32.xlu1 %v392_v31 }
  0xc0   : > { %v349_v32 = vpop.xlane.xlu0 %348  ;;  %v352_v33 = vpop.xlane.xlu1 %351 }
  0xc1   : > { %v396_v34 = vmul.f32 0.03125, %v349_v32  ;;  %v397_v35 = vmul.f32 0.03125, %v352_v33 }
  0xc3   : > { %v1897_v36 = vsub.f32 %v328_v0, %v396_v34  ;;  %v1899_v37 = vsub.f32 %v329_v1, %v397_v35 }
  0xc4   : > { %v373_v38 = vpop.xlane.xlu0 %372  ;;  %v376_v39 = vpop.xlane.xlu1 %375 }
  0xc5   : > { %v404_v40 = vmul.f32 0.03125, %v373_v38  ;;  %v405_v41 = vmul.f32 0.03125, %v376_v39  ;;  %v428_v42 = vmul.f32 %v1897_v36, %v1897_v36  ;;  %v429_v43 = vmul.f32 %v1899_v37, %v1899_v37 }
  0xc7   : > { %v1905_v44 = vsub.f32 %v336_v2, %v404_v40  ;;  %v1907_v45 = vsub.f32 %v337_v5, %v405_v41  ;;  %v444_v46 = vsel %vm346_vm0, %v428_v42, 0.0  ;;  %v447_v49 = vsel %vm346_vm0, %v429_v43, 0.0 }
  0xc8   : > { %445 = vadd.xlane.f32.xlu0 %v444_v46  ;;  %v355_v47 = vpop.xlane.xlu0 %354  ;;  %v379_v48 = vpop.xlane.xlu1 %378 }
  0xc9   : > { %v398_v50 = vmul.f32 0.03125, %v355_v47  ;;  %v406_v51 = vmul.f32 0.03125, %v379_v48  ;;  %v436_v52 = vmul.f32 %v1905_v44, %v1905_v44  ;;  %v437_v53 = vmul.f32 %v1907_v45, %v1907_v45 }
  0xcb   : > { %v1915_v54 = vsub.f32 %v330_v8, %v398_v50  ;;  %v1917_v55 = vsub.f32 %v338_v9, %v406_v51  ;;  %v468_v56 = vsel %vm346_vm0, %v436_v52, 0.0  ;;  %v471_v59 = vsel %vm346_vm0, %v437_v53, 0.0  ;;  %v600_v53 = vld [vmem:[%s2400_s3] sm:$0xff] }
  0xcc   : > { %448 = vadd.xlane.f32.xlu0 %v447_v49  ;;  %469 = vadd.xlane.f32.xlu1 %v468_v56  ;;  %v358_v57 = vpop.xlane.xlu0 %357  ;;  %v382_v58 = vpop.xlane.xlu1 %381  ;;  %v602_v56 = vld [vmem:[%s2400_s3 + $0x10] sm:$0xff] }
  0xcd   : > { %v399_v60 = vmul.f32 0.03125, %v358_v57  ;;  %v407_v61 = vmul.f32 0.03125, %v382_v58  ;;  %v430_v62 = vmul.f32 %v1915_v54, %v1915_v54  ;;  %v438_v63 = vmul.f32 %v1917_v55, %v1917_v55 }
  0xce   : > { %v1418_v58 = vpack.c.bf16 %v602_v56, %v600_v53 }
  0xcf   : > { %v1926_v0 = vsub.f32 %v1848_v12, %v399_v60  ;;  %v1929_v1 = vsub.f32 %v1851_v13, %v407_v61  ;;  %v450_v2 = vsel %vm346_vm0, %v430_v62, 0.0  ;;  %v474_v5 = vsel %vm346_vm0, %v438_v63, 0.0  ;;  %v605_v60 = vld [vmem:[%s2400_s3 + $0x28] sm:$0xff]  ;;  %v607_v61 = vld [vmem:[%s2400_s3 + $0x38] sm:$0xff]  ;;  %v604_v63 = vld [vmem:[%s2400_s3 + $0x20] sm:$0xff] }
  0xd0   : > { %472 = vadd.xlane.f32.xlu1 %v471_v59  ;;  %451 = vadd.xlane.f32.xlu0 %v450_v2  ;;  %v361_v3 = vpop.xlane.xlu0 %360  ;;  %v385_v4 = vpop.xlane.xlu1 %384  ;;  %v1420_v62 = vpack.c.bf16 %v607_v61, %v605_v60  ;;  %v606_v2 = vld [vmem:[%s2400_s3 + $0x30] sm:$0xff] }
  0xd1   : > { %v400_v6 = vmul.f32 0.03125, %v361_v3  ;;  %v408_v7 = vmul.f32 0.03125, %v385_v4  ;;  %v431_v8 = vmul.f32 %v1926_v0, %v1926_v0  ;;  %v439_v9 = vmul.f32 %v1929_v1, %v1929_v1 }
  0xd2   : > { %v1422_v3 = vpack.c.bf16 %v606_v2, %v604_v63  ;;  %v1701_v4 = vmov 0.0  }
  0xd3   : > { %v1938_v10 = vsub.f32 %v1858_v16, %v400_v6  ;;  %v1941_v11 = vsub.f32 %v1861_v17, %v408_v7  ;;  %v453_v12 = vsel %vm346_vm0, %v431_v8, 0.0  ;;  %v477_v15 = vsel %vm346_vm0, %v439_v9, 0.0  ;;  %732 = vmatprep.mubr.f32.mxu0 %v1701_v4  ;;  %780 = vmatprep.mubr.f32.mxu1 %v1701_v4 }
  0xd4   : > { %475 = vadd.xlane.f32.xlu1 %v474_v5  ;;  %454 = vadd.xlane.f32.xlu0 %v453_v12  ;;  %v364_v13 = vpop.xlane.xlu0 %363  ;;  %v388_v14 = vpop.xlane.xlu1 %387 }
  0xd5   : > { %v401_v18 = vmul.f32 0.03125, %v364_v13  ;;  %v409_v19 = vmul.f32 0.03125, %v388_v14  ;;  %v432_v22 = vmul.f32 %v1938_v10, %v1938_v10  ;;  %v440_v16 = vmul.f32 %v1941_v11, %v1941_v11 }
  0xd7   : > { %v1950_v23 = vsub.f32 %v1868_v20, %v401_v18  ;;  %v1953_v17 = vsub.f32 %v1871_v21, %v409_v19  ;;  %v456_v26 = vsel %vm346_vm0, %v432_v22, 0.0  ;;  %v480_v31 = vsel %vm346_vm0, %v440_v16, 0.0 }
  0xd8   : > { %478 = vadd.xlane.f32.xlu1 %v477_v15  ;;  %457 = vadd.xlane.f32.xlu0 %v456_v26  ;;  %v367_v27 = vpop.xlane.xlu0 %366  ;;  %v391_v30 = vpop.xlane.xlu1 %390 }
  0xd9   : > { %v402_v32 = vmul.f32 0.03125, %v367_v27  ;;  %v410_v33 = vmul.f32 0.03125, %v391_v30  ;;  %v433_v34 = vmul.f32 %v1950_v23, %v1950_v23  ;;  %v441_v20 = vmul.f32 %v1953_v17, %v1953_v17 }
  0xdb   : > { %v1962_v35 = vsub.f32 %v1878_v24, %v402_v32  ;;  %v1965_v21 = vsub.f32 %v1881_v25, %v410_v33  ;;  %v459_v38 = vsel %vm346_vm0, %v433_v34, 0.0  ;;  %v483_v41 = vsel %vm346_vm0, %v441_v20, 0.0 }
  0xdc   : > { %481 = vadd.xlane.f32.xlu1 %v480_v31  ;;  %460 = vadd.xlane.f32.xlu0 %v459_v38  ;;  %v370_v39 = vpop.xlane.xlu0 %369  ;;  %v394_v40 = vpop.xlane.xlu1 %393 }
  0xdd   : > { %v403_v42 = vmul.f32 0.03125, %v370_v39  ;;  %v411_v43 = vmul.f32 0.03125, %v394_v40  ;;  %v434_v46 = vmul.f32 %v1962_v35, %v1962_v35  ;;  %v442_v24 = vmul.f32 %v1965_v21, %v1965_v21  ;;  %v2016_v39 = vld [vmem:[%s2398_s1] ss:$0 sm:$0xff] }
  0xdf   : > { %v1974_v47 = vsub.f32 %v1888_v28, %v403_v42  ;;  %v1977_v25 = vsub.f32 %v1891_v29, %v411_v43  ;;  %v462_v48 = vsel %vm346_vm0, %v434_v46, 0.0  ;;  %v486_v49 = vsel %vm346_vm0, %v442_v24, 0.0  ;;  %v601_v28 = vld [vmem:[%s2400_s3 + $0x8] sm:$0xff]  ;;  %v603_v29 = vld [vmem:[%s2400_s3 + $0x18] sm:$0xff]  ;;  %v2022_v24 = vld [vmem:[%s2399_s2] ss:$0 sm:$0xff] }
  0xe0   : > { %484 = vadd.xlane.f32.xlu1 %v483_v41  ;;  %463 = vadd.xlane.f32.xlu0 %v462_v48  ;;  %v1416_v52 = vpack.c.bf16 %v603_v29, %v601_v28 }
  0xe1   : > { %v435_v50 = vmul.f32 %v1974_v47, %v1974_v47  ;;  %v443_v51 = vmul.f32 %v1977_v25, %v1977_v25 }
  0xe2   : > { %1417 = vmatprep.subr.bf16.mxu0 %v1416_v52  ;;  %1424 = vmatprep.subr.bf16.mxu1 %v1416_v52 }
  0xe3   : > { %v465_v57 = vsel %vm346_vm0, %v435_v50, 0.0  ;;  %v489_v59 = vsel %vm346_vm0, %v443_v51, 0.0  ;;  %1419 = vmatpush1.bf16.msra.mxu0 %v1418_v58  ;;  %1426 = vmatpush1.bf16.msra.mxu1 %v1418_v58 }
  0xe4   : > { %487 = vadd.xlane.f32.xlu1 %v486_v49  ;;  %466 = vadd.xlane.f32.xlu0 %v465_v57 }
  0xe5   : > { %1421 = vmatprep.subr.bf16.mxu0 %v1420_v62  ;;  %1425 = vmatprep.subr.bf16.mxu1 %v1420_v62 }
  0xe7   : > { %1423 = vmatpush1.bf16.msra.mxu0 %v1422_v3  ;;  %1427 = vmatpush1.bf16.msra.mxu1 %v1422_v3 }
  0xe8   : > { %490 = vadd.xlane.f32.xlu1 %v489_v59 }
 0x155   : > { %v446_v5 = vpop.xlane.xlu0 %445 }
 0x156   : > { %v492_v6 = vmul.f32 0.03125, %v446_v5 }
 0x158   : > { %v508_v7 = vadd.f32 1e-05, %v492_v6 }
 0x159   : > { %v470_v8 = vpop.xlane.xlu1 %469  ;;  %v449_v9 = vpop.xlane.xlu0 %448 }
 0x15a   : > { %1472 = vrsqrt.f32 %v508_v7  ;;  %v500_v12 = vmul.f32 0.03125, %v470_v8  ;;  %v493_v13 = vmul.f32 0.03125, %v449_v9 }
 0x15c   : > { %v516_v14 = vadd.f32 1e-05, %v500_v12  ;;  %v509_v15 = vadd.f32 1e-05, %v493_v13 }
 0x15d   : > { %v473_v18 = vpop.xlane.xlu1 %472  ;;  %v452_v19 = vpop.xlane.xlu0 %451 }
 0x15e   : > { %1474 = vrsqrt.f32 %v516_v14  ;;  %v501_v22 = vmul.f32 0.03125, %v473_v18  ;;  %v494_v16 = vmul.f32 0.03125, %v452_v19 }
 0x15f   : > { %1476 = vrsqrt.f32 %v509_v15 }
 0x160   : > { %v517_v26 = vadd.f32 1e-05, %v501_v22  ;;  %v510_v27 = vadd.f32 1e-05, %v494_v16 }
 0x161   : > { %v476_v30 = vpop.xlane.xlu1 %475  ;;  %v455_v31 = vpop.xlane.xlu0 %454 }
 0x162   : > { %1478 = vrsqrt.f32 %v517_v26  ;;  %v502_v32 = vmul.f32 0.03125, %v476_v30  ;;  %v495_v33 = vmul.f32 0.03125, %v455_v31 }
 0x163   : > { %1480 = vrsqrt.f32 %v510_v27 }
 0x164   : > { %v1473_v34 = vpop.eup %1472  ;;  %v518_v20 = vadd.f32 1e-05, %v502_v32  ;;  %v511_v38 = vadd.f32 1e-05, %v495_v33 }
 0x165   : > { %v479_v40 = vpop.xlane.xlu1 %478  ;;  %v458_v41 = vpop.xlane.xlu0 %457  ;;  %v540_v42 = vmul.f32 %v1473_v34, %v1897_v36 }
 0x166   : > { %1482 = vrsqrt.f32 %v518_v20  ;;  %v503_v43 = vmul.f32 0.03125, %v479_v40  ;;  %v496_v46 = vmul.f32 0.03125, %v458_v41 }
 0x167   : > { %1484 = vrsqrt.f32 %v511_v38  ;;  %v562_v48 = vmul.f32 %v2016_v39, %v540_v42 }
 0x168   : > { %v1475_v49 = vpop.eup %1474  ;;  %v519_v50 = vadd.f32 1e-05, %v503_v43  ;;  %v512_v51 = vadd.f32 1e-05, %v496_v46 }
 0x169   : > { %v1477_v28 = vpop.eup %1476  ;;  %v482_v29 = vpop.xlane.xlu1 %481  ;;  %v584_v53 = vadd.f32 %v2022_v24, %v562_v48  ;;  %v548_v36 = vmul.f32 %v1475_v49, %v1905_v44 }
 0x16a   : > { %v461_v52 = vpop.xlane.xlu0 %460  ;;  %1486 = vrsqrt.f32 %v519_v50  ;;  %v504_v56 = vmul.f32 0.03125, %v482_v29  ;;  %v541_v58 = vmul.f32 %v1477_v28, %v1899_v37 }
 0x16b   : > { %v497_v57 = vmul.f32 0.03125, %v461_v52  ;;  %1488 = vrsqrt.f32 %v512_v51  ;;  %1365 = vmatmul.mubr.msk.f32.vlgmr.msra.gmra.mrb[0].mxu0 %vm346_vm0, %v584_v53  ;;  %v570_v59 = vmul.f32 %v2016_v39, %v548_v36 }
 0x16c   : > { %v1479_v60 = vpop.eup %1478  ;;  %v520_v61 = vadd.f32 1e-05, %v504_v56  ;;  %738 = vmatprep.mubr.f32.mxu0 %v1701_v4  ;;  %v563_v63 = vmul.f32 %v2016_v39, %v541_v58 }
 0x16d   : > { %v513_v62 = vadd.f32 1e-05, %v497_v57  ;;  %v1481_v2 = vpop.eup %1480  ;;  %v485_v3 = vpop.xlane.xlu1 %484  ;;  %v592_v5 = vadd.f32 %v2022_v24, %v570_v59  ;;  %v549_v6 = vmul.f32 %v1479_v60, %v1907_v45 }
 0x16e   : > { %v464_v44 = vpop.xlane.xlu0 %463  ;;  %1490 = vrsqrt.f32 %v520_v61  ;;  %v505_v37 = vmul.f32 0.03125, %v485_v3  ;;  %v585_v8 = vadd.f32 %v2022_v24, %v563_v63  ;;  %v542_v9 = vmul.f32 %v1481_v2, %v1915_v54 }
 0x16f   : > { %v498_v7 = vmul.f32 0.03125, %v464_v44  ;;  %1492 = vrsqrt.f32 %v513_v62  ;;  %1373 = vmatmul.mubr.msk.f32.vlgmr.msra.gmra.mrb[0].mxu1 %vm346_vm0, %v592_v5  ;;  %v571_v12 = vmul.f32 %v2016_v39, %v549_v6 }
 0x170   : > { %v1483_v13 = vpop.eup %1482  ;;  %v521_v14 = vadd.f32 1e-05, %v505_v37  ;;  %1366 = vmatmul.mubr.msk.f32.gmra.mrb[2].mxu0 %vm346_vm0, %v585_v8  ;;  %786 = vmatprep.mubr.f32.mxu1 %v1701_v4  ;;  %v564_v22 = vmul.f32 %v2016_v39, %v542_v9  ;;  %v610_v9 = vlaneseq }
 0x171   : > { %v514_v15 = vadd.f32 1e-05, %v498_v7  ;;  %v1485_v45 = vpop.eup %1484  ;;  %v488_v18 = vpop.xlane.xlu1 %487  ;;  %744 = vmatprep.mubr.f32.mxu0 %v1701_v4  ;;  %v593_v16 = vadd.f32 %v2022_v24, %v571_v12  ;;  %v550_v54 = vmul.f32 %v1483_v13, %v1917_v55 }
 0x172   : > { %v467_v19 = vpop.xlane.xlu0 %466  ;;  %1494 = vrsqrt.f32 %v521_v14  ;;  %v506_v26 = vmul.f32 0.03125, %v488_v18  ;;  %v543_v30 = vmul.f32 %v1485_v45, %v1926_v0  ;;  %v586_v31 = vadd.f32 %v2022_v24, %v564_v22 }
 0x173   : > { %v499_v27 = vmul.f32 0.03125, %v467_v19  ;;  %1496 = vrsqrt.f32 %v514_v15  ;;  %1374 = vmatmul.mubr.msk.f32.gmra.mrb[2].mxu1 %vm346_vm0, %v593_v16  ;;  %v572_v32 = vmul.f32 %v2016_v39, %v550_v54  ;;  %v611_v12 = vshrl.u32 %v610_v9, 7 }
 0x174   : > { %v1487_v33 = vpop.eup %1486  ;;  %v522_v34 = vadd.f32 1e-05, %v506_v26  ;;  %792 = vmatprep.mubr.f32.mxu1 %v1701_v4  ;;  %v565_v38 = vmul.f32 %v2016_v39, %v543_v30  ;;  %1367 = vmatmul.mubr.msk.f32.gmra.mrb[4].mxu0 %vm346_vm0, %v586_v31 }
 0x175   : > { %v515_v20 = vadd.f32 1e-05, %v499_v27  ;;  %v1489_v55 = vpop.eup %1488  ;;  %v491_v40 = vpop.xlane.xlu1 %490  ;;  %v594_v0 = vadd.f32 %v2022_v24, %v572_v32  ;;  %v551_v41 = vmul.f32 %v1487_v33, %v1929_v1  ;;  %750 = vmatprep.mubr.f32.mxu0 %v1701_v4  ;;  %v612_v13 = vsub.s32 0, %v611_v12 }
 0x176   : > { %1498 = vrsqrt.f32 %v522_v34  ;;  %v507_v42 = vmul.f32 0.03125, %v491_v40  ;;  %v587_v43 = vadd.f32 %v2022_v24, %v565_v38  ;;  %v544_v46 = vmul.f32 %v1489_v55, %v1938_v10 }
 0x177   : > { %1500 = vrsqrt.f32 %v515_v20  ;;  %1375 = vmatmul.mubr.msk.f32.gmra.mrb[4].mxu1 %vm346_vm0, %v594_v0  ;;  %v573_v48 = vmul.f32 %v2016_v39, %v551_v41  ;;  %v616_v14 = vsub.s32 1, %v611_v12 }
 0x178   : > { %v1491_v49 = vpop.eup %1490  ;;  %v523_v50 = vadd.f32 1e-05, %v507_v42  ;;  %798 = vmatprep.mubr.f32.mxu1 %v1701_v4  ;;  %v566_v51 = vmul.f32 %v2016_v39, %v544_v46  ;;  %1368 = vmatmul.mubr.msk.f32.gmra.mrb[6].mxu0 %vm346_vm0, %v587_v43 }
 0x179   : > { %v1493_v1 = vpop.eup %1492  ;;  %v595_v28 = vadd.f32 %v2022_v24, %v573_v48  ;;  %v552_v29 = vmul.f32 %v1491_v49, %v1941_v11  ;;  %756 = vmatprep.mubr.f32.mxu0 %v1701_v4 }
 0x17a   : > { %1502 = vrsqrt.f32 %v523_v50  ;;  %v588_v10 = vadd.f32 %v2022_v24, %v566_v51  ;;  %v545_v52 = vmul.f32 %v1493_v1, %v1950_v23 }
 0x17b   : > { %1376 = vmatmul.mubr.msk.f32.gmra.mrb[6].mxu1 %vm346_vm0, %v595_v28  ;;  %v574_v53 = vmul.f32 %v2016_v39, %v552_v29 }
 0x17c   : > { %v1495_v36 = vpop.eup %1494  ;;  %804 = vmatprep.mubr.f32.mxu1 %v1701_v4  ;;  %v567_v56 = vmul.f32 %v2016_v39, %v545_v52  ;;  %1369 = vmatmul.mubr.msk.f32.gmra.mrb[8].mxu0 %vm346_vm0, %v588_v10 }
 0x17d   : > { %v1497_v57 = vpop.eup %1496  ;;  %v596_v11 = vadd.f32 %v2022_v24, %v574_v53  ;;  %v553_v58 = vmul.f32 %v1495_v36, %v1953_v17  ;;  %762 = vmatprep.mubr.f32.mxu0 %v1701_v4 }
 0x17e   : > { %v589_v23 = vadd.f32 %v2022_v24, %v567_v56  ;;  %v546_v59 = vmul.f32 %v1497_v57, %v1962_v35 }
 0x17f   : > { %1377 = vmatmul.mubr.msk.f32.gmra.mrb[8].mxu1 %vm346_vm0, %v596_v11  ;;  %v575_v60 = vmul.f32 %v2016_v39, %v553_v58 }
 0x180   : > { %v1499_v61 = vpop.eup %1498  ;;  %810 = vmatprep.mubr.f32.mxu1 %v1701_v4  ;;  %v568_v62 = vmul.f32 %v2016_v39, %v546_v59  ;;  %1370 = vmatmul.mubr.msk.f32.gmra.mrb[10].mxu0 %vm346_vm0, %v589_v23 }
 0x181   : > { %v1501_v63 = vpop.eup %1500  ;;  %v597_v17 = vadd.f32 %v2022_v24, %v575_v60  ;;  %v554_v2 = vmul.f32 %v1499_v61, %v1965_v21  ;;  %768 = vmatprep.mubr.f32.mxu0 %v1701_v4 }
 0x182   : > { %v590_v35 = vadd.f32 %v2022_v24, %v568_v62  ;;  %v547_v3 = vmul.f32 %v1501_v63, %v1974_v47 }
 0x183   : > { %1378 = vmatmul.mubr.msk.f32.gmra.mrb[10].mxu1 %vm346_vm0, %v597_v17  ;;  %v576_v44 = vmul.f32 %v2016_v39, %v554_v2 }
 0x184   : > { %v1503_v5 = vpop.eup %1502  ;;  %816 = vmatprep.mubr.f32.mxu1 %v1701_v4  ;;  %v569_v6 = vmul.f32 %v2016_v39, %v547_v3  ;;  %1371 = vmatmul.mubr.msk.f32.gmra.mrb[12].mxu0 %vm346_vm0, %v590_v35 }
 0x185   : > { %v598_v37 = vadd.f32 %v2022_v24, %v576_v44  ;;  %v555_v21 = vmul.f32 %v1503_v5, %v1977_v25  ;;  %774 = vmatprep.mubr.f32.mxu0 %v1701_v4  ;;  %v608_v25 = vld [vmem:[%s2401_s4] sm:$0x3] }
 0x186   : > { %v591_v7 = vadd.f32 %v2022_v24, %v569_v6  ;;  %v2104_v15 = vrot.slane %v608_v25, %v612_v13  ;;  %v2106_v45 = vrot.slane %v608_v25, %v616_v14 }
 0x187   : > { %1379 = vmatmul.mubr.msk.f32.gmra.mrb[12].mxu1 %vm346_vm0, %v598_v37  ;;  %v577_v47 = vmul.f32 %v2016_v39, %v555_v21 }
 0x188   : > { %822 = vmatprep.mubr.f32.mxu1 %v1701_v4  ;;  %1372 = vmatmul.mubr.msk.f32.gmra.mrb[14].mxu0 %vm346_vm0, %v591_v7 }
 0x189   : > { %v599_v8 = vadd.f32 %v2022_v24, %v577_v47 }
 0x18b   : > { %1380 = vmatmul.mubr.msk.f32.gmra.mrb[14].mxu1 %vm346_vm0, %v599_v8 }
 0x23e   : > { %v734_v39 = vpop.f32.mrb[0].mxu0 }
 0x23f   : > { %v2109_v4 = vadd.f32 %v734_v39, %v2104_v15  ;;  %v736_v18 = vpop.f32.mrb[1].mxu0 }
 0x240   : > { %v737_v24 = vadd.f32 %v736_v18, %v2106_v45 }
 0x241   : > { %v1381_v19 = vmul.f32 -1.442695, %v2109_v4 }
 0x242   : > { %v1397_v22 = vmul.f32 -1.442695, %v737_v24  ;;  %v782_v16 = vpop.f32.mrb[0].mxu1 }
 0x243   : > { %1504 = vpow2.f32 %v1381_v19  ;;  %v740_v54 = vpop.f32.mrb[2].mxu0  ;;  %v2114_v26 = vadd.f32 %v782_v16, %v2104_v15  ;;  %v784_v27 = vpop.f32.mrb[1].mxu1 }
 0x244   : > { %1506 = vpow2.f32 %v1397_v22  ;;  %v2117_v30 = vadd.f32 %v740_v54, %v2104_v15  ;;  %v742_v31 = vpop.f32.mrb[3].mxu0  ;;  %v785_v32 = vadd.f32 %v784_v27, %v2106_v45 }
 0x245   : > { %v1389_v33 = vmul.f32 -1.442695, %v2114_v26  ;;  %v743_v34 = vadd.f32 %v742_v31, %v2106_v45 }
 0x246   : > { %v1382_v20 = vmul.f32 -1.442695, %v2117_v30  ;;  %v1405_v38 = vmul.f32 -1.442695, %v785_v32  ;;  %v788_v55 = vpop.f32.mrb[2].mxu1 }
 0x247   : > { %1508 = vpow2.f32 %v1389_v33  ;;  %v1398_v40 = vmul.f32 -1.442695, %v743_v34  ;;  %v2124_v0 = vadd.f32 %v788_v55, %v2104_v15  ;;  %v790_v41 = vpop.f32.mrb[3].mxu1  ;;  %v746_v42 = vpop.f32.mrb[4].mxu0 }
 0x248   : > { %1510 = vpow2.f32 %v1382_v20  ;;  %v791_v43 = vadd.f32 %v790_v41, %v2106_v45  ;;  %v2128_v46 = vadd.f32 %v746_v42, %v2104_v15  ;;  %v748_v49 = vpop.f32.mrb[5].mxu0 }
 0x249   : > { %1512 = vpow2.f32 %v1398_v40  ;;  %v1390_v48 = vmul.f32 -1.442695, %v2124_v0  ;;  %v749_v50 = vadd.f32 %v748_v49, %v2106_v45 }
 0x24a   : > { %1514 = vpow2.f32 %v1405_v38  ;;  %v1406_v51 = vmul.f32 -1.442695, %v791_v43  ;;  %v794_v1 = vpop.f32.mrb[4].mxu1  ;;  %v1383_v28 = vmul.f32 -1.442695, %v2128_v46 }
 0x24b   : > { %1516 = vpow2.f32 %v1390_v48  ;;  %v2138_v29 = vadd.f32 %v794_v1, %v2104_v15  ;;  %v796_v10 = vpop.f32.mrb[5].mxu1  ;;  %v1399_v52 = vmul.f32 -1.442695, %v749_v50  ;;  %v752_v53 = vpop.f32.mrb[6].mxu0 }
 0x24c   : > { %1518 = vpow2.f32 %v1406_v51  ;;  %v2141_v56 = vadd.f32 %v752_v53, %v2104_v15  ;;  %v754_v11 = vpop.f32.mrb[7].mxu0  ;;  %v797_v25 = vadd.f32 %v796_v10, %v2106_v45 }
 0x24d   : > { %v1505_v36 = vpop.eup %1504  ;;  %1520 = vpow2.f32 %v1383_v28  ;;  %v1391_v57 = vmul.f32 -1.442695, %v2138_v29  ;;  %v755_v59 = vadd.f32 %v754_v11, %v2106_v45 }
 0x24e   : > { %v1507_v58 = vpop.eup %1506  ;;  %v877_v23 = vadd.f32 1.0, %v1505_v36  ;;  %1522 = vpow2.f32 %v1399_v52  ;;  %v800_v60 = vpop.f32.mrb[6].mxu1  ;;  %v1384_v62 = vmul.f32 -1.442695, %v2141_v56  ;;  %v1407_v20 = vmul.f32 -1.442695, %v797_v25 }
 0x24f   : > { %v1149_v61 = vadd.f32 1.0, %v1507_v58  ;;  %1524 = vpow2.f32 %v1391_v57  ;;  %v802_v63 = vpop.f32.mrb[7].mxu1  ;;  %v1400_v17 = vmul.f32 -1.442695, %v755_v59  ;;  %v758_v2 = vpop.f32.mrb[8].mxu0  ;;  %v2167_v38 = vadd.f32 %v800_v60, %v2104_v15 }
 0x250   : > { %1526 = vrcp.f32 %v877_v23  ;;  %v760_v3 = vpop.f32.mrb[9].mxu0  ;;  %v2156_v24 = vadd.f32 %v758_v2, %v2104_v15  ;;  %v803_v50 = vadd.f32 %v802_v63, %v2106_v45 }
 0x251   : > { %v1509_v35 = vpop.eup %1508  ;;  %1528 = vrcp.f32 %v1149_v61  ;;  %v761_v43 = vadd.f32 %v760_v3, %v2106_v45  ;;  %v1392_v36 = vmul.f32 -1.442695, %v2167_v38 }
 0x252   : > { %v1511_v44 = vpop.eup %1510  ;;  %v885_v5 = vadd.f32 1.0, %v1509_v35  ;;  %1530 = vpow2.f32 %v1384_v62  ;;  %v806_v6 = vpop.f32.mrb[8].mxu1  ;;  %v1385_v42 = vmul.f32 -1.442695, %v2156_v24  ;;  %v1408_v63 = vmul.f32 -1.442695, %v803_v50 }
 0x253   : > { %v1513_v37 = vpop.eup %1512  ;;  %v878_v21 = vadd.f32 1.0, %v1511_v44  ;;  %1532 = vpow2.f32 %v1400_v17  ;;  %v2150_v7 = vpop.f32.mrb[9].mxu1  ;;  %v2186_v57 = vadd.f32 %v806_v6, %v2104_v15  ;;  %v1401_v59 = vmul.f32 -1.442695, %v761_v43 }
 0x254   : > { %v1515_v47 = vpop.eup %1514  ;;  %1534 = vrcp.f32 %v885_v5  ;;  %v1150_v8 = vadd.f32 1.0, %v1513_v37  ;;  %v764_v9 = vpop.f32.mrb[10].mxu0  ;;  %v809_v17 = vadd.f32 %v2150_v7, %v2106_v45 }
 0x255   : > { %v1517_v12 = vpop.eup %1516  ;;  %1536 = vrcp.f32 %v878_v21  ;;  %v1157_v13 = vadd.f32 1.0, %v1515_v47  ;;  %v766_v14 = vpop.f32.mrb[11].mxu0  ;;  %v2180_v28 = vadd.f32 %v764_v9, %v2104_v15  ;;  %v1393_v6 = vmul.f32 -1.442695, %v2186_v57 }
 0x256   : > { %v1519_v39 = vpop.eup %1518  ;;  %1538 = vrcp.f32 %v1150_v8  ;;  %v886_v18 = vadd.f32 1.0, %v1517_v12  ;;  %v812_v19 = vpop.f32.mrb[10].mxu1  ;;  %v767_v60 = vadd.f32 %v766_v14, %v2106_v45  ;;  %v1409_v8 = vmul.f32 -1.442695, %v809_v17 }
 0x257   : > { %v1521_v22 = vpop.eup %1520  ;;  %1540 = vrcp.f32 %v1157_v13  ;;  %v1158_v16 = vadd.f32 1.0, %v1519_v39  ;;  %v2158_v54 = vpop.f32.mrb[11].mxu1  ;;  %v1386_v3 = vmul.f32 -1.442695, %v2180_v28  ;;  %v2207_v37 = vadd.f32 %v812_v19, %v2104_v15 }
 0x258   : > { %v1523_v27 = vpop.eup %1522  ;;  %v879_v31 = vadd.f32 1.0, %v1521_v22  ;;  %1542 = vrcp.f32 %v886_v18  ;;  %v770_v32 = vpop.f32.mrb[12].mxu0  ;;  %v1402_v7 = vmul.f32 -1.442695, %v767_v60  ;;  %v815_v39 = vadd.f32 %v2158_v54, %v2106_v45 }
 0x259   : > { %v1525_v33 = vpop.eup %1524  ;;  %v1151_v34 = vadd.f32 1.0, %v1523_v27  ;;  %1544 = vrcp.f32 %v1158_v16  ;;  %v772_v55 = vpop.f32.mrb[13].mxu0  ;;  %v2200_v44 = vadd.f32 %v770_v32, %v2104_v15  ;;  %v1394_v14 = vmul.f32 -1.442695, %v2207_v37 }
 0x25a   : > { %v1527_v40 = vpop.eup %1526  ;;  %1546 = vrcp.f32 %v879_v31  ;;  %v887_v41 = vadd.f32 1.0, %v1525_v33  ;;  %v2171_v48 = vpop.f32.mrb[12].mxu1  ;;  %v773_v13 = vadd.f32 %v772_v55, %v2106_v45  ;;  %v1410_v33 = vmul.f32 -1.442695, %v815_v39 }
 0x25b   : > { %v1529_v49 = vpop.eup %1528  ;;  %1548 = vrcp.f32 %v1151_v34  ;;  %v2174_v51 = vpop.f32.mrb[13].mxu1  ;;  %941 = vrot.lane.b32.xlu0 %v1527_v40, %s1702_s12  ;;  %v1387_v12 = vmul.f32 -1.442695, %v2200_v44 }
 0x25c   : > { %v1531_v1 = vpop.eup %1530  ;;  %1197 = vst.msk [vmem:[%s2164_s11] sm:$0xff] %vm346_vm0, %v1529_v49  ;;  %1550 = vrcp.f32 %v887_v41  ;;  %v2182_v10 = vpop.f32.mrb[14].mxu0  ;;  %v1403_v27 = vmul.f32 -1.442695, %v773_v13  ;;  %v821_v17 = vadd.f32 %v2174_v51, %v2106_v45 }
 0x25d   : > { %v1533_v52 = vpop.eup %1532  ;;  %v880_v53 = vadd.f32 1.0, %v1531_v1  ;;  %1552 = vpow2.f32 %v1407_v20  ;;  %v2188_v11 = vpop.f32.mrb[15].mxu0  ;;  %v2228_v1 = vadd.f32 %v2182_v10, %v2104_v15 }
 0x25e   : > { %v1535_v58 = vpop.eup %1534  ;;  %v1152_v23 = vadd.f32 1.0, %v1533_v52  ;;  %1554 = vpow2.f32 %v1385_v42  ;;  %v2191_v61 = vpop.f32.mrb[14].mxu1 }
 0x25f   : > { %v1537_v62 = vpop.eup %1536  ;;  %1556 = vrcp.f32 %v880_v53  ;;  %v2195_v2 = vpop.f32.mrb[15].mxu1  ;;  %957 = vrot.lane.b32.xlu0 %v1535_v58, %s1702_s12  ;;  %v1388_v10 = vmul.f32 -1.442695, %v2228_v1 }
 0x260   : > { %v1539_v35 = vpop.eup %1538  ;;  %1558 = vrcp.f32 %v1152_v23  ;;  %943 = vrot.lane.b32.xlu1 %v1537_v62, %s1702_s12  ;;  %v827_v51 = vadd.f32 %v2195_v2, %v2106_v45 }
 0x261   : > { %v1541_v5 = vpop.eup %1540  ;;  %1198 = vst.msk [vmem:[%s2164_s11 + $0x8] sm:$0xff] %vm346_vm0, %v1539_v35  ;;  %1560 = vpow2.f32 %v1392_v36  ;;  %v2232_v36 = vadd.f32 %v2171_v48, %v2104_v15 }
 0x262   : > { %v1543_v21 = vpop.eup %1542  ;;  %1205 = vst.msk [vmem:[%s2164_s11 + $0x40] sm:$0xff] %vm346_vm0, %v1541_v5  ;;  %1562 = vpow2.f32 %v1401_v59  ;;  %v779_v5 = vadd.f32 %v2188_v11, %v2106_v45  ;;  %v1411_v11 = vmul.f32 -1.442695, %v821_v17  ;;  %v1412_v45 = vmul.f32 -1.442695, %v827_v51 }
 0x263   : > { %v1545_v47 = vpop.eup %1544  ;;  %1564 = vpow2.f32 %v1408_v63  ;;  %v1395_v48 = vmul.f32 -1.442695, %v2232_v36 }
 0x264   : > { %v1547_v9 = vpop.eup %1546  ;;  %1206 = vst.msk [vmem:[%s2164_s11 + $0x48] sm:$0xff] %vm346_vm0, %v1545_v47  ;;  %1566 = vpow2.f32 %v1386_v3  ;;  %959 = vrot.lane.b32.xlu1 %v1543_v21, %s1702_s12  ;;  %v2244_v21 = vadd.f32 %v2191_v61, %v2104_v15  ;;  %v1404_v13 = vmul.f32 -1.442695, %v779_v5 }
 0x265   : > { %v1549_v25 = vpop.eup %1548  ;;  %1568 = vpow2.f32 %v1393_v6 }
 0x266   : > { %v1551_v18 = vpop.eup %1550  ;;  %1199 = vst.msk [vmem:[%s2164_s11 + $0x10] sm:$0xff] %vm346_vm0, %v1549_v25  ;;  %1570 = vpow2.f32 %v1402_v7  ;;  %v1396_v15 = vmul.f32 -1.442695, %v2244_v21 }
 0x267   : > { %v1553_v19 = vpop.eup %1552  ;;  %1572 = vpow2.f32 %v1409_v8  ;;  %961 = vrot.lane.b32.xlu0 %v1551_v18, %s1702_s12 }
 0x268   : > { %v1555_v22 = vpop.eup %1554  ;;  %v1159_v16 = vadd.f32 1.0, %v1553_v19  ;;  %1574 = vpow2.f32 %v1387_v12  ;;  %945 = vrot.lane.b32.xlu1 %v1547_v9, %s1702_s12 }
 0x269   : > { %v1557_v31 = vpop.eup %1556  ;;  %v881_v32 = vadd.f32 1.0, %v1555_v22  ;;  %1576 = vpow2.f32 %v1394_v14 }
 0x26a   : > { %v1559_v54 = vpop.eup %1558  ;;  %1578 = vrcp.f32 %v1159_v16 }
 0x26b   : > { %v1561_v34 = vpop.eup %1560  ;;  %1200 = vst.msk [vmem:[%s2164_s11 + $0x18] sm:$0xff] %vm346_vm0, %v1559_v54  ;;  %1580 = vrcp.f32 %v881_v32 }
 0x26c   : > { %v1563_v20 = vpop.eup %1562  ;;  %v888_v55 = vadd.f32 1.0, %v1561_v34  ;;  %1582 = vpow2.f32 %v1403_v27  ;;  %947 = vrot.lane.b32.xlu1 %v1557_v31, %s1702_s12 }
 0x26d   : > { %v1565_v40 = vpop.eup %1564  ;;  %v1153_v41 = vadd.f32 1.0, %v1563_v20  ;;  %1584 = vpow2.f32 %v1410_v33 }
 0x26e   : > { %v1567_v42 = vpop.eup %1566  ;;  %1586 = vrcp.f32 %v888_v55  ;;  %v1160_v43 = vadd.f32 1.0, %v1565_v40 }
 0x26f   : > { %v1569_v49 = vpop.eup %1568  ;;  %1588 = vrcp.f32 %v1153_v41  ;;  %v882_v50 = vadd.f32 1.0, %v1567_v42 }
 0x270   : > { %v1571_v52 = vpop.eup %1570  ;;  %1590 = vrcp.f32 %v1160_v43  ;;  %v889_v53 = vadd.f32 1.0, %v1569_v49 }
 0x271   : > { %v1573_v58 = vpop.eup %1572  ;;  %1592 = vrcp.f32 %v882_v50  ;;  %v1154_v23 = vadd.f32 1.0, %v1571_v52 }
 0x272   : > { %v1575_v59 = vpop.eup %1574  ;;  %1594 = vrcp.f32 %v889_v53  ;;  %v1161_v60 = vadd.f32 1.0, %v1573_v58 }
 0x273   : > { %v1577_v62 = vpop.eup %1576  ;;  %1596 = vrcp.f32 %v1154_v23  ;;  %v883_v63 = vadd.f32 1.0, %v1575_v59 }
 0x274   : > { %v1579_v35 = vpop.eup %1578  ;;  %1598 = vrcp.f32 %v1161_v60  ;;  %v890_v3 = vadd.f32 1.0, %v1577_v62 }
 0x275   : > { %v1581_v6 = vpop.eup %1580  ;;  %1207 = vst.msk [vmem:[%s2164_s11 + $0x50] sm:$0xff] %vm346_vm0, %v1579_v35  ;;  %1600 = vrcp.f32 %v883_v63 }
 0x276   : > { %v1583_v7 = vpop.eup %1582  ;;  %1602 = vrcp.f32 %v890_v3  ;;  %949 = vrot.lane.b32.xlu0 %v1581_v6, %s1702_s12 }
 0x277   : > { %v1585_v47 = vpop.eup %1584  ;;  %v1155_v8 = vadd.f32 1.0, %v1583_v7  ;;  %1604 = vpow2.f32 %v1388_v10 }
 0x278   : > { %v1587_v9 = vpop.eup %1586  ;;  %v1162_v12 = vadd.f32 1.0, %v1585_v47  ;;  %1606 = vpow2.f32 %v1395_v48 }
 0x279   : > { %v1589_v25 = vpop.eup %1588  ;;  %1608 = vrcp.f32 %v1155_v8  ;;  %963 = vrot.lane.b32.xlu1 %v1587_v9, %s1702_s12 }
 0x27a   : > { %v1591_v61 = vpop.eup %1590  ;;  %1201 = vst.msk [vmem:[%s2164_s11 + $0x20] sm:$0xff] %vm346_vm0, %v1589_v25  ;;  %1610 = vrcp.f32 %v1162_v12 }
 0x27b   : > { %v1593_v2 = vpop.eup %1592  ;;  %1208 = vst.msk [vmem:[%s2164_s11 + $0x58] sm:$0xff] %vm346_vm0, %v1591_v61  ;;  %1612 = vpow2.f32 %v1411_v11 }
 0x27c   : > { %v1595_v14 = vpop.eup %1594  ;;  %1614 = vpow2.f32 %v1404_v13 }
 0x27d   : > { %v1597_v39 = vpop.eup %1596  ;;  %1616 = vpow2.f32 %v1396_v15  ;;  %965 = vrot.lane.b32.xlu0 %v1595_v14, %s1702_s12  ;;  %951 = vrot.lane.b32.xlu1 %v1593_v2, %s1702_s12 }
 0x27e   : > { %v1599_v18 = vpop.eup %1598  ;;  %1202 = vst.msk [vmem:[%s2164_s11 + $0x28] sm:$0xff] %vm346_vm0, %v1597_v39  ;;  %1618 = vpow2.f32 %v1412_v45 }
 0x27f   : > { %v1601_v19 = vpop.eup %1600  ;;  %1209 = vst.msk [vmem:[%s2164_s11 + $0x60] sm:$0xff] %vm346_vm0, %v1599_v18 }
 0x280   : > { %v1603_v22 = vpop.eup %1602 }
 0x281   : > { %v1605_v16 = vpop.eup %1604  ;;  %953 = vrot.lane.b32.xlu0 %v1601_v19, %s1702_s12  ;;  %967 = vrot.lane.b32.xlu1 %v1603_v22, %s1702_s12 }
 0x282   : > { %v1607_v27 = vpop.eup %1606  ;;  %v884_v31 = vadd.f32 1.0, %v1605_v16 }
 0x283   : > { %v1609_v32 = vpop.eup %1608  ;;  %v891_v33 = vadd.f32 1.0, %v1607_v27 }
 0x284   : > { %v1611_v54 = vpop.eup %1610  ;;  %1203 = vst.msk [vmem:[%s2164_s11 + $0x30] sm:$0xff] %vm346_vm0, %v1609_v32  ;;  %1620 = vrcp.f32 %v884_v31 }
 0x285   : > { %v1613_v34 = vpop.eup %1612  ;;  %1210 = vst.msk [vmem:[%s2164_s11 + $0x68] sm:$0xff] %vm346_vm0, %v1611_v54  ;;  %1622 = vrcp.f32 %v891_v33 }
 0x286   : > { %v1615_v20 = vpop.eup %1614  ;;  %v1163_v55 = vadd.f32 1.0, %v1613_v34 }
 0x287   : > { %v1617_v40 = vpop.eup %1616  ;;  %v1156_v41 = vadd.f32 1.0, %v1615_v20 }
 0x288   : > { %v1619_v42 = vpop.eup %1618  ;;  %1624 = vrcp.f32 %v1163_v55  ;;  %v892_v43 = vadd.f32 1.0, %v1617_v40 }
 0x289   : > { %1626 = vrcp.f32 %v1156_v41  ;;  %v1164_v49 = vadd.f32 1.0, %v1619_v42 }
 0x28a   : > { %1628 = vrcp.f32 %v892_v43 }
 0x28b   : > { %1630 = vrcp.f32 %v1164_v49 }
 0x28e   : > { %v1621_v50 = vpop.eup %1620 }
 0x28f   : > { %v1623_v52 = vpop.eup %1622  ;;  %955 = vrot.lane.b32.xlu1 %v1621_v50, %s1702_s12 }
 0x290   : > { %969 = vrot.lane.b32.xlu0 %v1623_v52, %s1702_s12 }
 0x292   : > { %v1625_v53 = vpop.eup %1624 }
 0x293   : > { %v1627_v58 = vpop.eup %1626  ;;  %1211 = vst.msk [vmem:[%s2164_s11 + $0x70] sm:$0xff] %vm346_vm0, %v1625_v53 }
 0x294   : > { %v1629_v23 = vpop.eup %1628  ;;  %1204 = vst.msk [vmem:[%s2164_s11 + $0x38] sm:$0xff] %vm346_vm0, %v1627_v58 }
 0x295   : > { %v1631_v59 = vpop.eup %1630  ;;  %971 = vrot.lane.b32.xlu1 %v1629_v23, %s1702_s12 }
 0x296   : > { %1212 = vst.msk [vmem:[%s2164_s11 + $0x78] sm:$0xff] %vm346_vm0, %v1631_v59 }
 0x2cd   : > { %v942_v60 = vpop.permute.xlu0 %941 }
 0x2ce   : > { %v989_v62 = vmul.f32 %v942_v60, %v2109_v4 }
 0x2d0   : > { %1005 = vst.msk [vmem:[%s2280_s15] sm:$0xff] %vm346_vm0, %v989_v62  ;;  %1037 = vrot.lane.b32.xlu0 %v989_v62, %s1703_s17 }
 0x2d1   : > { %v958_v63 = vpop.permute.xlu0 %957 }
 0x2d2   : > { %v944_v10 = vpop.permute.xlu1 %943  ;;  %v997_v17 = vmul.f32 %v958_v63, %v2114_v26 }
 0x2d3   : > { %v990_v35 = vmul.f32 %v944_v10, %v2117_v30 }
 0x2d4   : > { %1013 = vst.msk [vmem:[%s2280_s15 + $0x40] sm:$0xff] %vm346_vm0, %v997_v17  ;;  %1053 = vrot.lane.b32.xlu0 %v997_v17, %s1703_s17 }
 0x2d5   : > { %1006 = vst.msk [vmem:[%s2280_s15 + $0x8] sm:$0xff] %vm346_vm0, %v990_v35  ;;  %1039 = vrot.lane.b32.xlu1 %v990_v35, %s1703_s17 }
 0x2d6   : > { %v960_v4 = vpop.permute.xlu1 %959 }
 0x2d7   : > { %v998_v3 = vmul.f32 %v960_v4, %v2124_v0 }
 0x2d9   : > { %1014 = vst.msk [vmem:[%s2280_s15 + $0x48] sm:$0xff] %vm346_vm0, %v998_v3  ;;  %1055 = vrot.lane.b32.xlu1 %v998_v3, %s1703_s17  ;;  %v962_v26 = vpop.permute.xlu0 %961 }
 0x2da   : > { %v946_v48 = vpop.permute.xlu1 %945  ;;  %v999_v30 = vmul.f32 %v962_v26, %v2138_v29 }
 0x2db   : > { %v991_v5 = vmul.f32 %v946_v48, %v2128_v46 }
 0x2dc   : > { %1015 = vst.msk [vmem:[%s2280_s15 + $0x50] sm:$0xff] %vm346_vm0, %v999_v30 }
 0x2dd   : > { %1007 = vst.msk [vmem:[%s2280_s15 + $0x10] sm:$0xff] %vm346_vm0, %v991_v5  ;;  %1041 = vrot.lane.b32.xlu0 %v991_v5, %s1703_s17 }
 0x2de   : > { %v948_v6 = vpop.permute.xlu1 %947 }
 0x2df   : > { %v992_v0 = vmul.f32 %v948_v6, %v2141_v56 }
 0x2e1   : > { %1008 = vst.msk [vmem:[%s2280_s15 + $0x18] sm:$0xff] %vm346_vm0, %v992_v0  ;;  %1043 = vrot.lane.b32.xlu1 %v992_v0, %s1703_s17  ;;  %1057 = vrot.lane.b32.xlu0 %v999_v30, %s1703_s17 }
 0x2e8   : > { %v950_v29 = vpop.permute.xlu0 %949 }
 0x2e9   : > { %v993_v46 = vmul.f32 %v950_v29, %v2156_v24 }
 0x2eb   : > { %1009 = vst.msk [vmem:[%s2280_s15 + $0x20] sm:$0xff] %vm346_vm0, %v993_v46  ;;  %v964_v7 = vpop.permute.xlu1 %963  ;;  %1045 = vrot.lane.b32.xlu0 %v993_v46, %s1703_s17 }
 0x2ec   : > { %v1000_v51 = vmul.f32 %v964_v7, %v2167_v38 }
 0x2ee   : > { %1016 = vst.msk [vmem:[%s2280_s15 + $0x58] sm:$0xff] %vm346_vm0, %v1000_v51  ;;  %1059 = vrot.lane.b32.xlu1 %v1000_v51, %s1703_s17 }
 0x2ef   : > { %v966_v56 = vpop.permute.xlu0 %965  ;;  %v952_v47 = vpop.permute.xlu1 %951 }
 0x2f0   : > { %v1001_v8 = vmul.f32 %v966_v56, %v2186_v57  ;;  %v994_v11 = vmul.f32 %v952_v47, %v2180_v28 }
 0x2f2   : > { %1017 = vst.msk [vmem:[%s2280_s15 + $0x60] sm:$0xff] %vm346_vm0, %v1001_v8  ;;  %1010 = vst.msk [vmem:[%s2280_s15 + $0x28] sm:$0xff] %vm346_vm0, %v994_v11  ;;  %1047 = vrot.lane.b32.xlu1 %v994_v11, %s1703_s17  ;;  %1061 = vrot.lane.b32.xlu0 %v1001_v8, %s1703_s17 }
 0x2f3   : > { %v954_v24 = vpop.permute.xlu0 %953  ;;  %v968_v38 = vpop.permute.xlu1 %967 }
 0x2f4   : > { %v995_v9 = vmul.f32 %v954_v24, %v2200_v44  ;;  %v1002_v12 = vmul.f32 %v968_v38, %v2207_v37 }
 0x2f6   : > { %1011 = vst.msk [vmem:[%s2280_s15 + $0x30] sm:$0xff] %vm346_vm0, %v995_v9  ;;  %1018 = vst.msk [vmem:[%s2280_s15 + $0x68] sm:$0xff] %vm346_vm0, %v1002_v12  ;;  %1063 = vrot.lane.b32.xlu1 %v1002_v12, %s1703_s17  ;;  %1049 = vrot.lane.b32.xlu0 %v995_v9, %s1703_s17 }
 0x301   : > { %v956_v28 = vpop.permute.xlu1 %955 }
 0x302   : > { %v970_v57 = vpop.permute.xlu0 %969  ;;  %v996_v13 = vmul.f32 %v956_v28, %v2228_v1 }
 0x303   : > { %v1003_v25 = vmul.f32 %v970_v57, %v2232_v36 }
 0x304   : > { %1012 = vst.msk [vmem:[%s2280_s15 + $0x38] sm:$0xff] %vm346_vm0, %v996_v13  ;;  %1051 = vrot.lane.b32.xlu1 %v996_v13, %s1703_s17 }
 0x305   : > { %1019 = vst.msk [vmem:[%s2280_s15 + $0x70] sm:$0xff] %vm346_vm0, %v1003_v25  ;;  %1065 = vrot.lane.b32.xlu0 %v1003_v25, %s1703_s17 }
 0x307   : > { %v972_v44 = vpop.permute.xlu1 %971 }
 0x308   : > { %v1004_v37 = vmul.f32 %v972_v44, %v2244_v21 }
 0x30a   : > { %1020 = vst.msk [vmem:[%s2280_s15 + $0x78] sm:$0xff] %vm346_vm0, %v1004_v37  ;;  %1067 = vrot.lane.b32.xlu1 %v1004_v37, %s1703_s17 }
 0x342   : > { %v1038_v1 = vpop.permute.xlu0 %1037 }
 0x343   : > { %1085 = vst.msk [vmem:[%s2350_s23] sm:$0xff] %vm346_vm0, %v1038_v1 }
 0x346   : > { %v1054_v36 = vpop.permute.xlu0 %1053 }
 0x347   : > { %v1040_v21 = vpop.permute.xlu1 %1039  ;;  %1093 = vst.msk [vmem:[%s2350_s23 + $0x40] sm:$0xff] %vm346_vm0, %v1054_v36 }
 0x348   : > { %1086 = vst.msk [vmem:[%s2350_s23 + $0x8] sm:$0xff] %vm346_vm0, %v1040_v21 }
 0x34b   : > { %v1056_v15 = vpop.permute.xlu1 %1055 }
 0x34c   : > { %1094 = vst.msk [vmem:[%s2350_s23 + $0x48] sm:$0xff] %vm346_vm0, %v1056_v15 }
 0x34f   : > { %v1042_v61 = vpop.permute.xlu0 %1041 }
 0x350   : > { %1087 = vst.msk [vmem:[%s2350_s23 + $0x10] sm:$0xff] %vm346_vm0, %v1042_v61 }
 0x353   : > { %v1044_v45 = vpop.permute.xlu1 %1043  ;;  %v1058_v2 = vpop.permute.xlu0 %1057 }
 0x354   : > { %1088 = vst.msk [vmem:[%s2350_s23 + $0x18] sm:$0xff] %vm346_vm0, %v1044_v45  ;;  %1095 = vst.msk [vmem:[%s2350_s23 + $0x50] sm:$0xff] %vm346_vm0, %v1058_v2 }
 0x35d   : > { %v1046_v14 = vpop.permute.xlu0 %1045 }
 0x35e   : > { %1089 = vst.msk [vmem:[%s2350_s23 + $0x20] sm:$0xff] %vm346_vm0, %v1046_v14 }
 0x360   : > { %v1060_v39 = vpop.permute.xlu1 %1059 }
 0x361   : > { %1096 = vst.msk [vmem:[%s2350_s23 + $0x58] sm:$0xff] %vm346_vm0, %v1060_v39 }
 0x364   : > { %v1048_v18 = vpop.permute.xlu1 %1047  ;;  %v1062_v19 = vpop.permute.xlu0 %1061 }
 0x365   : > { %1090 = vst.msk [vmem:[%s2350_s23 + $0x28] sm:$0xff] %vm346_vm0, %v1048_v18  ;;  %1097 = vst.msk [vmem:[%s2350_s23 + $0x60] sm:$0xff] %vm346_vm0, %v1062_v19 }
 0x368   : > { %v1064_v22 = vpop.permute.xlu1 %1063  ;;  %v1050_v16 = vpop.permute.xlu0 %1049 }
 0x369   : > { %1098 = vst.msk [vmem:[%s2350_s23 + $0x68] sm:$0xff] %vm346_vm0, %v1064_v22  ;;  %1091 = vst.msk [vmem:[%s2350_s23 + $0x30] sm:$0xff] %vm346_vm0, %v1050_v16 }
 0x376   : > { %v1052_v27 = vpop.permute.xlu1 %1051 }
 0x377   : > { %1092 = vst.msk [vmem:[%s2350_s23 + $0x38] sm:$0xff] %vm346_vm0, %v1052_v27  ;;  %v1066_v31 = vpop.permute.xlu0 %1065 }
 0x378   : > { %1099 = vst.msk [vmem:[%s2350_s23 + $0x70] sm:$0xff] %vm346_vm0, %v1066_v31 }
 0x37c   : > { %v1068_v32 = vpop.permute.xlu1 %1067 }
 0x37d   : > { %1100 = vst.msk [vmem:[%s2350_s23 + $0x78] sm:$0xff] %vm346_vm0, %v1068_v32 }
 0x37e PF: > { %p18_p8 = scmp.ge.s32.totalorder %s1764_s29, 4   ;;  %s2408_s24 = smov %s1688_s25 }
 0x37f   : > { %s2409_s25 = smov %s1692_s26  ;;  %s2410_s26 = smov %s1774_s9 }
 0x380   : > { %s2411_s27 = smov %s1764_s29  ;;  %20 = sbr.rel (!%p18_p8) target bundleno = 3 (0x3), region = 104 }
 0x387   :  { %1269 = vsyncpa [#allocation3], 1 }
 0x388   :  { %1271 = vsyncpa [#allocation3 + $0x1], 1 }

// kernel: tri_in.3
= control target key start
LH: loop header
LB: loop body
LE: loop exit
PB: predicated region body
PF: predicated region fallthrough
CT: control target
= control target key end

     0   :  { %s3791_s0 = inlined_call_operand.vmem [shape: f32[16,16,32], index: 0, kind: input, shape index: {}]   ;;  %s3792_s1 = inlined_call_operand.vmem [shape: f32[16,16,32], index: 1, kind: input, shape index: {}]   ;;  %s3793_s2 = inlined_call_operand.vmem [shape: f32[16,16,32], index: 2, kind: input, shape index: {}]   ;;  %s3794_s3 = inlined_call_operand.vmem [shape: f32[1,32], index: 3, kind: input, shape index: {}]   ;;  %s3795_s4 = inlined_call_operand.vmem [shape: f32[1,32], index: 4, kind: input, shape index: {}]   ;;  %s3796_s5 = inlined_call_operand.vmem [shape: f32[32,32], index: 5, kind: input, shape index: {}]   ;;  %s3797_s6 = inlined_call_operand.vmem [shape: f32[1,32], index: 6, kind: input, shape index: {}]   ;;  %s3798_s7 = inlined_call_operand.hbm [shape: f32[16,16,32], index: 7, kind: output, shape index: {}]  }
   0x1   :  { %3805 = sst [smem:[#allocation12_spill]] %s3791_s0 }
   0x2   :  { %12 = vsyncpa [#allocation5], 0 }
   0x3   :  { %14 = vsyncpa [#allocation5 + $0x1], 0  ;;  %s2761_s24 = smov 0   ;;  %s2763_s25 = smov 0  }
   0x4   :  { %s2765_s26 = smov 0   ;;  %s2767_s27 = smov 0  }
   0x5   :  { %s2769_s28 = smov 0   ;;  %s2771_s29 = smov 0  }
   0x6   :  { %s2773_s30 = smov 0   ;;  %s2775_s8 = smov 0  }
   0x7   :  { %s2777_s9 = smov 0   ;;  %s2779_s10 = smov 0  }
   0x8 LB: > { %3806 = sst [smem:[#allocation7_spill]] %s2706_s8  ;;  %s2347_s11 = sadd.s32 4294967295, %s2714_s10   ;;  %s2714_s10 = sphi %s2779_s10, %s20_s10   ;;  %s2710_s9 = sphi %s2777_s9, %s3820_s9   ;;  %s2706_s8 = sphi %s2775_s8, %s3819_s8   ;;  %s2702_s30 = sphi %s2773_s30, %s3818_s30   ;;  %s2698_s29 = sphi %s2771_s29, %s3817_s29   ;;  %s2694_s28 = sphi %s2769_s28, %s3825_s28   ;;  %s2690_s27 = sphi %s2767_s27, %s3824_s27   ;;  %s2686_s26 = sphi %s2765_s26, %s3823_s26   ;;  %s2682_s25 = sphi %s2763_s25, %s3822_s25   ;;  %s2678_s24 = sphi %s2761_s24, %s3821_s24  }
   0x9   : > { %3807 = sst [smem:[#allocation8_spill]] %s2710_s9  ;;  %s2348_s12 = sadd.s32 4294967294, %s2714_s10  }
   0xa   : > { %s29_s13 = sadd.s32 1, %s2706_s8  ;;  %s32_s14 = sadd.s32 1, %s2710_s9 }
   0xb   : > { %p30_p0 = scmp.ge.s32.totalorder %s29_s13, 2  ;;  %s41_s15 = sadd.s32 1, %s2694_s28 }
   0xc   : > { %p48_p1 = scmp.ne.s32.totalorder %s2694_s28, %s2690_s27  ;;  %p49_p2 = scmp.eq.s32.totalorder %s2714_s10, 0 }
   0xd   : > { %s3827_s13 = smov (%p30_p0, %s29_s13), 0  ;;  %s3829_s14 = smov (!%p30_p0, %s32_s14), %s2710_s9 }
   0xe   : > { %3808 = sst [smem:[#allocation9_spill]] %s3827_s13  ;;  %s36_s16 = ssub.s32 %s2706_s8, %s3827_s13 }
   0xf   : > { %p2824_p3 = por %p49_p2, %p48_p1  ;;  %p34_p4 = scmp.ge.s32.totalorder %s3829_s14, 2 }
  0x10   : > { %s203_s18 = sadd.s32 1, %s2686_s26  ;;  %p213_p5 = scmp.ne.s32.totalorder %s2686_s26, %s2682_s25 }
  0x11   : > { %p214_p6 = scmp.eq.s32.totalorder %s2347_s11, 3  ;;  %s3831_s14 = smov (%p34_p4, %s3829_s14), 0 }
  0x12   : > { %3810 = sst [smem:[#allocation10_spill]] %s3831_s14  ;;  %p219_p8 = scmp.ne.s32.totalorder %s2682_s25, %s2678_s24 }
  0x13   : > { %p2833_p7 = por %p214_p6, %p213_p5  ;;  %s37_s20 = ssub.s32 %s2710_s9, %s3831_s14 }
  0x14   : > { %p220_p9 = scmp.eq.s32.totalorder %s2348_s12, 3  ;;  %s38_s21 = sor.u32 %s37_s20, %s36_s16 }
  0x15   : > { %p201_p10 = scmp.eq.s32.totalorder %s37_s20, 0  ;;  %p39_p11 = scmp.eq.s32.totalorder %s38_s21, 0 }
  0x16   : > { %p2841_p12 = por %p220_p9, %p219_p8  ;;  %p2350_p13 = scmp.ge.s32.totalorder %s2714_s10, 4 }
  0x17   : > { %s2846_s23 = scalar_select %p201_p10, %s2686_s26, %s203_s18  }
  0x18   : > { %s3812_s22 = scalar_select %p2841_p12, 1, 0 }
  0x19   : > { %s2849_s11 = scalar_select %p39_p11, %s2694_s28, %s41_s15  }
  0x1a   : > { %3813 = sst [smem:[#allocation11_spill]] %s3812_s22  ;;  %248 = sbr.rel (%p2350_p13) target bundleno = 47 (0x2f), region = 32 }
  0x21   : > { %251 = sbr.rel (!%p2824_p3) target bundleno = 47 (0x2f), region = 36  ;;  %s253_s12 = sand.u32 (%p2824_p3), 1, %s2694_s28  }
  0x22   : > { %s2412_s16 = sshll.u32 (%p2824_p3), %s2706_s8, 4  ;;  %s2351_s20 = sshll.u32 (%p2824_p3), %s253_s12, 6 }
  0x23   : > { %s258_s21 = sadd.s32 (%p2824_p3), %s2710_s9, %s2412_s16  ;;  %s3814_s0 = sld [smem:[#allocation12_spill]] (%p2824_p3) }
  0x24   : > { %s2354_s14 = sshll.u32 (%p2824_p3), %s258_s21, 3  ;;  %s255_s15 = scalar_lea.vmem (%p2824_p3), [#allocation3], %s2351_s20 }
  0x29   : > { %s260_s18 = scalar_lea.vmem %s3814_s0, %s2354_s14 }
  0x2a   : > { %v302_v0 = vld [vmem:[%s260_s18] sm:$0xff]  ;;  %v304_v1 = vld [vmem:[%s260_s18 + $0x10] sm:$0xff] }
  0x2b   : > { %v306_v2 = vld [vmem:[%s260_s18 + $0x20] sm:$0xff]  ;;  %303 = vst [vmem:[%s255_s15] sm:$0xff] %v302_v0  ;;  %305 = vst [vmem:[%s255_s15 + $0x8] sm:$0xff] %v304_v1  ;;  %v308_v3 = vld [vmem:[%s260_s18 + $0x30] sm:$0xff] }
  0x2c   : > { %307 = vst [vmem:[%s255_s15 + $0x10] sm:$0xff] %v306_v2  ;;  %v310_v4 = vld [vmem:[%s260_s18 + $0x40] sm:$0xff]  ;;  %v312_v5 = vld [vmem:[%s260_s18 + $0x50] sm:$0xff]  ;;  %309 = vst [vmem:[%s255_s15 + $0x18] sm:$0xff] %v308_v3 }
  0x2d   : > { %311 = vst [vmem:[%s255_s15 + $0x20] sm:$0xff] %v310_v4  ;;  %313 = vst [vmem:[%s255_s15 + $0x28] sm:$0xff] %v312_v5  ;;  %v314_v6 = vld [vmem:[%s260_s18 + $0x60] sm:$0xff]  ;;  %v316_v7 = vld [vmem:[%s260_s18 + $0x70] sm:$0xff] }
  0x2e   : > { %315 = vst [vmem:[%s255_s15 + $0x30] sm:$0xff] %v314_v6  ;;  %317 = vst [vmem:[%s255_s15 + $0x38] sm:$0xff] %v316_v7 }
  0x2f PF: > { %p2355_p0 = scmp.ge.s32.totalorder %s2714_s10, 1  ;;  %p342_p1 = scmp.lt.s32.totalorder %s2714_s10, 5 }
  0x31   : > { %p343_p2 = pnand %p2355_p0, %p342_p1 }
  0x32   : > { %s349_s13 = sand.u32 (!%p343_p2), 1, %s2690_s27   ;;  %s3804_s14 = sand.u32 (!%p343_p2), 1, %s2682_s25  }
  0x33   : > { %346 = sbr.rel (%p343_p2) target bundleno = 785 (0x311), region = 82  ;;  %s2356_s17 = sshll.u32 (!%p343_p2), %s349_s13, 6 }
  0x34   : > { %s2357_s22 = sshll.u32 (!%p343_p2), %s3804_s14, 7  ;;  %s2358_s12 = sshll.u32 (!%p343_p2), %s2698_s29, 3 }
  0x35   : > { %s2361_s16 = sshll.u32 (!%p343_p2), %s2702_s30, 3  ;;  %p394_p3 = scmp.lt.s32.totalorder (!%p343_p2), %s2358_s12, 15 }
  0x36   : > { %p401_p4 = scmp.lt.s32.totalorder (!%p343_p2), %s2361_s16, 15  ;;  %s2878_s13 = scalar_lea.vmem (!%p343_p2), [#allocation3], %s2356_s17 }
  0x37   : > { %s2880_s14 = scalar_lea.vmem (!%p343_p2), [#allocation4], %s2357_s22  ;;  %p2364_p5 = scmp.ne.s32.totalorder (!%p343_p2), %s2698_s29, 0 }
  0x3a   : > { %s3833_s12 = smov (!%p394_p3, %s2358_s12), 15  ;;  %s3835_s16 = smov (!%p401_p4, %s2361_s16), 15 }
  0x3b   : > { %s2413_s20 = sshll.u32 %s3833_s12, 4  ;;  %s2414_s0 = sshll.u32 %s3835_s16, 4  ;;  %vm412_vm0 = vcmask (!%p2364_p5), 261120   ;;  %v2716_v8 = vmov (!%p2364_p5), 0.0  }
  0x3c   : > { %s2871_s15 = scalar_lea.vmem %s3792_s1, %s2413_s20  ;;  %s2876_s27 = scalar_lea.vmem %s3793_s2, %s2414_s0  ;;  %413 = vst.msk [vmem:[#allocation2] sm:$0xff] (!%p2364_p5), %vm412_vm0, %v2716_v8  ;;  %414 = vst.msk [vmem:[#allocation2 + $0x8] sm:$0xff] (!%p2364_p5), %vm412_vm0, %v2716_v8 }
  0x3d   : > { %411 = sbr.rel (%p2364_p5) target bundleno = 68 (0x44), region = 90  ;;  %415 = vst.msk [vmem:[#allocation2 + $0x10] sm:$0xff] (!%p2364_p5), %vm412_vm0, %v2716_v8  ;;  %416 = vst.msk [vmem:[#allocation2 + $0x18] sm:$0xff] (!%p2364_p5), %vm412_vm0, %v2716_v8 }
  0x3e   : > { %417 = vst.msk [vmem:[#allocation2 + $0x20] sm:$0xff] (!%p2364_p5), %vm412_vm0, %v2716_v8  ;;  %418 = vst.msk [vmem:[#allocation2 + $0x28] sm:$0xff] (!%p2364_p5), %vm412_vm0, %v2716_v8 }
  0x3f   : > { %419 = vst.msk [vmem:[#allocation2 + $0x30] sm:$0xff] (!%p2364_p5), %vm412_vm0, %v2716_v8  ;;  %420 = vst.msk [vmem:[#allocation2 + $0x38] sm:$0xff] (!%p2364_p5), %vm412_vm0, %v2716_v8 }
  0x40   : > { %421 = vst.msk [vmem:[#allocation2 + $0x40] sm:$0xff] (!%p2364_p5), %vm412_vm0, %v2716_v8  ;;  %422 = vst.msk [vmem:[#allocation2 + $0x48] sm:$0xff] (!%p2364_p5), %vm412_vm0, %v2716_v8 }
  0x41   : > { %423 = vst.msk [vmem:[#allocation2 + $0x50] sm:$0xff] (!%p2364_p5), %vm412_vm0, %v2716_v8  ;;  %424 = vst.msk [vmem:[#allocation2 + $0x58] sm:$0xff] (!%p2364_p5), %vm412_vm0, %v2716_v8 }
  0x42   : > { %425 = vst.msk [vmem:[#allocation2 + $0x60] sm:$0xff] (!%p2364_p5), %vm412_vm0, %v2716_v8  ;;  %426 = vst.msk [vmem:[#allocation2 + $0x68] sm:$0xff] (!%p2364_p5), %vm412_vm0, %v2716_v8 }
  0x43   : > { %427 = vst.msk [vmem:[#allocation2 + $0x70] sm:$0xff] (!%p2364_p5), %vm412_vm0, %v2716_v8  ;;  %428 = vst.msk [vmem:[#allocation2 + $0x78] sm:$0xff] (!%p2364_p5), %vm412_vm0, %v2716_v8 }
  0x44 PF: > { %v429_v9 = vld [vmem:[%s2878_s13] sm:$0xff]  ;;  %v453_v10 = vlaneseq  ;;  %v2717_v11 = vmov 1966171168   ;;  %v2365_v18 = vld [vmem:[%s2878_s13 + $0x8] sm:$0xff]  ;;  %v2909_v23 = vld [vmem:[%s2878_s13 + $0x10] sm:$0xff]  ;;  %vm570_vm1 = vcmask 261120  }
  0x45   : > { %v451_v12 = vunpack.c.l.s4 %v2717_v11  ;;  %v449_v15 = vcombine.high %v429_v9, %v429_v9  ;;  %v609_v22 = vcombine.high %v2365_v18, %v2365_v18  ;;  %v768_v25 = vcombine.high %v2909_v23, %v2909_v23  ;;  %v2922_v30 = vld [vmem:[%s2871_s15] sm:$0xff]  ;;  %v2925_v31 = vld [vmem:[%s2871_s15 + $0x8] sm:$0xff]  ;;  %v434_v51 = vld [vmem:[#allocation2 + $0x10] sm:$0xff]  ;;  %p2386_p6 = scmp.ne.s32.totalorder %s2698_s29, 1 }
  0x46   : > { %v454_v13 = vshrl.u32 %v453_v10, 7  ;;  %v432_v40 = vld [vmem:[#allocation2] sm:$0xff]  ;;  %v433_v41 = vld [vmem:[#allocation2 + $0x8] sm:$0xff]  ;;  %v435_v52 = vld [vmem:[#allocation2 + $0x18] sm:$0xff] }
  0x47   : > { %v452_v14 = vunpack.c.0.s8 %v451_v12  ;;  %v440_v50 = vld [vmem:[#allocation2 + $0x40] sm:$0xff]  ;;  %v441_v55 = vld [vmem:[#allocation2 + $0x48] sm:$0xff]  ;;  %v438_v2 = vld [vmem:[#allocation2 + $0x30] sm:$0xff] }
  0x48   : > { %v2902_v17 = vsub.s32 0, %v454_v13  ;;  %v436_v62 = vld [vmem:[#allocation2 + $0x20] sm:$0xff]  ;;  %v437_v63 = vld [vmem:[#allocation2 + $0x28] sm:$0xff]  ;;  %v442_v5 = vld [vmem:[#allocation2 + $0x50] sm:$0xff] }
  0x49   : > { %v2900_v16 = vsub.s32 %v452_v14, %v454_v13  ;;  %v439_v8 = vld [vmem:[#allocation2 + $0x38] sm:$0xff]  ;;  %v2968_v11 = vld [vmem:[%s2871_s15 + $0x10] sm:$0xff] }
  0x4a   : > { %v2971_v12 = vld [vmem:[%s2871_s15 + $0x18] sm:$0xff] }
  0x4b   : > { %v456_v19 = vrot.slane %v429_v9, %v2900_v16  ;;  %v463_v20 = vrot.slane %v449_v15, %v2900_v16  ;;  %v616_v21 = vrot.slane %v2365_v18, %v2900_v16  ;;  %v2913_v24 = vrot.slane %v2909_v23, %v2900_v16 }
  0x4c   : > { %v2931_v34 = vrot.slane %v609_v22, %v2900_v16 }
  0x4d   : > { %v472_v26 = vrot.slane %v456_v19, %v2900_v16  ;;  %v464_v27 = vcombine.high %v456_v19, %v456_v19  ;;  %v2919_v28 = vrot.slane %v463_v20, %v2900_v16  ;;  %v465_v29 = vcombine.high %v463_v20, %v463_v20  ;;  %v443_v19 = vld [vmem:[#allocation2 + $0x58] sm:$0xff] }
  0x4e   : > { %v2928_v32 = vrot.slane %v616_v21, %v2900_v16  ;;  %v624_v33 = vcombine.high %v616_v21, %v616_v21  ;;  %v2935_v35 = vrot.slane %v2913_v24, %v2900_v16 }
  0x4f   : > { %v501_v36 = vrot.slane %v472_v26, %v2902_v17  ;;  %v486_v37 = vrot.slane %v464_v27, %v2900_v16  ;;  %v494_v38 = vcombine.high %v472_v26, %v472_v26  ;;  %v517_v39 = vrot.slane %v2919_v28, %v2902_v17 }
  0x50   : > { %v2942_v42 = vrot.slane %v465_v29, %v2900_v16  ;;  %v495_v43 = vcombine.high %v2919_v28, %v2919_v28  ;;  %v661_v44 = vrot.slane %v2928_v32, %v2902_v17  ;;  %v2949_v45 = vrot.slane %v624_v33, %v2900_v16  ;;  %v444_v29 = vld [vmem:[#allocation2 + $0x60] sm:$0xff]  ;;  %v445_v33 = vld [vmem:[#allocation2 + $0x68] sm:$0xff] }
  0x51   : > { %v538_v46 = vmul.f32 %v501_v36, %v2922_v30  ;;  %v539_v47 = vmul.f32 %v501_v36, %v2925_v31  ;;  %v505_v48 = vrot.slane %v486_v37, %v2902_v17  ;;  %v509_v49 = vrot.slane %v494_v38, %v2902_v17 }
  0x52   : > { %v496_v53 = vcombine.high %v486_v37, %v486_v37  ;;  %v546_v54 = vmul.f32 %v517_v39, %v2922_v30  ;;  %v547_v56 = vmul.f32 %v517_v39, %v2925_v31  ;;  %v521_v57 = vrot.slane %v2942_v42, %v2902_v17 }
  0x53   : > { %v554_v58 = vadd.f32 %v538_v46, %v432_v40  ;;  %v555_v59 = vadd.f32 %v539_v47, %v433_v41  ;;  %v540_v60 = vmul.f32 %v505_v48, %v2922_v30  ;;  %v541_v61 = vmul.f32 %v505_v48, %v2925_v31 }
  0x54   : > { %v542_v0 = vmul.f32 %v509_v49, %v2922_v30  ;;  %v543_v1 = vmul.f32 %v509_v49, %v2925_v31  ;;  %v513_v3 = vrot.slane %v496_v53, %v2902_v17  ;;  %v562_v4 = vadd.f32 %v546_v54, %v440_v50 }
  0x55   : > { %571 = vst.msk [vmem:[#allocation2] sm:$0xff] %vm570_vm1, %v554_v58  ;;  %572 = vst.msk [vmem:[#allocation2 + $0x8] sm:$0xff] %vm570_vm1, %v555_v59  ;;  %v556_v6 = vadd.f32 %v540_v60, %v434_v51  ;;  %v557_v7 = vadd.f32 %v541_v61, %v435_v52  ;;  %v563_v9 = vadd.f32 %v547_v56, %v441_v55 }
  0x56   : > { %v548_v10 = vmul.f32 %v521_v57, %v2922_v30  ;;  %v558_v13 = vadd.f32 %v542_v0, %v436_v62  ;;  %v559_v14 = vadd.f32 %v543_v1, %v437_v63  ;;  %v544_v15 = vmul.f32 %v513_v3, %v2922_v30  ;;  %579 = vst.msk [vmem:[#allocation2 + $0x40] sm:$0xff] %vm570_vm1, %v562_v4 }
  0x57   : > { %v545_v18 = vmul.f32 %v513_v3, %v2925_v31  ;;  %573 = vst.msk [vmem:[#allocation2 + $0x10] sm:$0xff] %vm570_vm1, %v556_v6  ;;  %574 = vst.msk [vmem:[#allocation2 + $0x18] sm:$0xff] %vm570_vm1, %v557_v7  ;;  %v549_v21 = vmul.f32 %v521_v57, %v2925_v31  ;;  %v525_v22 = vrot.slane %v495_v43, %v2902_v17  ;;  %v447_v43 = vld [vmem:[#allocation2 + $0x78] sm:$0xff]  ;;  %v3022_v7 = vld [vmem:[%s2871_s15 + $0x20] sm:$0xff] }
  0x58   : > { %580 = vst.msk [vmem:[#allocation2 + $0x48] sm:$0xff] %vm570_vm1, %v563_v9  ;;  %v564_v20 = vadd.f32 %v548_v10, %v442_v5  ;;  %v497_v26 = vcombine.high %v2942_v42, %v2942_v42  ;;  %575 = vst.msk [vmem:[#allocation2 + $0x20] sm:$0xff] %vm570_vm1, %v558_v13  ;;  %v560_v27 = vadd.f32 %v544_v15, %v438_v2  ;;  %v446_v42 = vld [vmem:[#allocation2 + $0x70] sm:$0xff] }
  0x59   : > { %576 = vst.msk [vmem:[#allocation2 + $0x28] sm:$0xff] %vm570_vm1, %v559_v14  ;;  %v561_v28 = vadd.f32 %v545_v18, %v439_v8  ;;  %v698_v36 = vmul.f32 %v2968_v11, %v661_v44  ;;  %v699_v37 = vmul.f32 %v2971_v12, %v661_v44  ;;  %v565_v38 = vadd.f32 %v549_v21, %v443_v19 }
  0x5a   : > { %581 = vst.msk [vmem:[#allocation2 + $0x50] sm:$0xff] %vm570_vm1, %v564_v20  ;;  %v550_v39 = vmul.f32 %v525_v22, %v2922_v30  ;;  %v551_v40 = vmul.f32 %v525_v22, %v2925_v31  ;;  %v529_v41 = vrot.slane %v497_v26, %v2902_v17  ;;  %577 = vst.msk [vmem:[#allocation2 + $0x30] sm:$0xff] %vm570_vm1, %v560_v27  ;;  %v3032_v22 = vld [vmem:[%s2871_s15 + $0x28] sm:$0xff] }
  0x5b   : > { %578 = vst.msk [vmem:[#allocation2 + $0x38] sm:$0xff] %vm570_vm1, %v561_v28  ;;  %v665_v46 = vrot.slane %v2949_v45, %v2902_v17  ;;  %v654_v44 = vcombine.high %v2928_v32, %v2928_v32  ;;  %v656_v47 = vcombine.high %v2949_v45, %v2949_v45  ;;  %v639_v48 = vrot.slane %v2931_v34, %v2900_v16 }
  0x5c   : > { %582 = vst.msk [vmem:[#allocation2 + $0x58] sm:$0xff] %vm570_vm1, %v565_v38  ;;  %v566_v49 = vadd.f32 %v550_v39, %v444_v29  ;;  %v567_v50 = vadd.f32 %v551_v40, %v445_v33  ;;  %v552_v51 = vmul.f32 %v529_v41, %v2922_v30  ;;  %v553_v52 = vmul.f32 %v529_v41, %v2925_v31  ;;  %v592_v53 = vld [vmem:[#allocation2] sm:$0xff]  ;;  %v593_v54 = vld [vmem:[#allocation2 + $0x8] sm:$0xff] }
  0x5d   : > { %v700_v55 = vmul.f32 %v2968_v11, %v665_v46  ;;  %v701_v32 = vmul.f32 %v2971_v12, %v665_v46  ;;  %v669_v56 = vrot.slane %v654_v44, %v2902_v17  ;;  %v673_v45 = vrot.slane %v656_v47, %v2902_v17  ;;  %v600_v10 = vld [vmem:[#allocation2 + $0x40] sm:$0xff] }
  0x5e   : > { %583 = vst.msk [vmem:[#allocation2 + $0x60] sm:$0xff] %vm570_vm1, %v566_v49  ;;  %584 = vst.msk [vmem:[#allocation2 + $0x68] sm:$0xff] %vm570_vm1, %v567_v50  ;;  %v568_v57 = vadd.f32 %v552_v51, %v446_v42  ;;  %v569_v58 = vadd.f32 %v553_v52, %v447_v43  ;;  %v714_v59 = vadd.f32 %v698_v36, %v592_v53  ;;  %v594_v60 = vld [vmem:[#allocation2 + $0x10] sm:$0xff]  ;;  %v595_v31 = vld [vmem:[#allocation2 + $0x18] sm:$0xff] }
  0x5f   : > { %v715_v30 = vadd.f32 %v699_v37, %v593_v54  ;;  %v702_v61 = vmul.f32 %v2968_v11, %v669_v56  ;;  %v703_v62 = vmul.f32 %v2971_v12, %v669_v56  ;;  %v704_v63 = vmul.f32 %v2968_v11, %v673_v45  ;;  %v596_v3 = vld [vmem:[#allocation2 + $0x20] sm:$0xff]  ;;  %v601_v13 = vld [vmem:[#allocation2 + $0x48] sm:$0xff] }
  0x60   : > { %v705_v0 = vmul.f32 %v2971_v12, %v673_v45  ;;  %585 = vst.msk [vmem:[#allocation2 + $0x70] sm:$0xff] %vm570_vm1, %v568_v57  ;;  %586 = vst.msk [vmem:[#allocation2 + $0x78] sm:$0xff] %vm570_vm1, %v569_v58  ;;  %v716_v1 = vadd.f32 %v700_v55, %v594_v60  ;;  %v717_v2 = vadd.f32 %v701_v32, %v595_v31  ;;  %v597_v4 = vld [vmem:[#allocation2 + $0x28] sm:$0xff] }
  0x61   : > { %730 = vst.msk [vmem:[#allocation2] sm:$0xff] %vm570_vm1, %v714_v59  ;;  %731 = vst.msk [vmem:[#allocation2 + $0x8] sm:$0xff] %vm570_vm1, %v715_v30  ;;  %v677_v5 = vrot.slane %v639_v48, %v2902_v17  ;;  %v625_v6 = vcombine.high %v2931_v34, %v2931_v34  ;;  %v718_v8 = vadd.f32 %v702_v61, %v596_v3  ;;  %v598_v18 = vld [vmem:[#allocation2 + $0x30] sm:$0xff]  ;;  %v3066_v3 = vld [vmem:[%s2878_s13 + $0x18] sm:$0xff] }
  0x62   : > { %v719_v9 = vadd.f32 %v703_v62, %v597_v4  ;;  %v655_v14 = vcombine.high %v639_v48, %v639_v48  ;;  %v820_v15 = vrot.slane %v2935_v35, %v2902_v17  ;;  %732 = vst.msk [vmem:[#allocation2 + $0x10] sm:$0xff] %vm570_vm1, %v716_v1  ;;  %733 = vst.msk [vmem:[#allocation2 + $0x18] sm:$0xff] %vm570_vm1, %v717_v2  ;;  %v599_v19 = vld [vmem:[#allocation2 + $0x38] sm:$0xff]  ;;  %v602_v38 = vld [vmem:[#allocation2 + $0x50] sm:$0xff] }
  0x63   : > { %v706_v20 = vmul.f32 %v2968_v11, %v677_v5  ;;  %v707_v34 = vmul.f32 %v2971_v12, %v677_v5  ;;  %v653_v21 = vrot.slane %v625_v6, %v2900_v16  ;;  %v783_v26 = vcombine.high %v2913_v24, %v2913_v24  ;;  %734 = vst.msk [vmem:[#allocation2 + $0x20] sm:$0xff] %vm570_vm1, %v718_v8  ;;  %v603_v24 = vld [vmem:[#allocation2 + $0x58] sm:$0xff] }
  0x64   : > { %735 = vst.msk [vmem:[#allocation2 + $0x28] sm:$0xff] %vm570_vm1, %v719_v9  ;;  %v720_v27 = vadd.f32 %v704_v63, %v598_v18  ;;  %v721_v28 = vadd.f32 %v705_v0, %v599_v19  ;;  %v685_v29 = vrot.slane %v655_v14, %v2902_v17  ;;  %v857_v33 = vmul.f32 %v3022_v7, %v820_v15 }
  0x65   : > { %v722_v36 = vadd.f32 %v706_v20, %v600_v10  ;;  %v723_v37 = vadd.f32 %v707_v34, %v601_v13  ;;  %v681_v39 = vrot.slane %v653_v21, %v2902_v17  ;;  %v657_v40 = vcombine.high %v653_v21, %v653_v21  ;;  %v604_v41 = vld [vmem:[#allocation2 + $0x60] sm:$0xff]  ;;  %v605_v43 = vld [vmem:[#allocation2 + $0x68] sm:$0xff] }
  0x66   : > { %736 = vst.msk [vmem:[#allocation2 + $0x30] sm:$0xff] %vm570_vm1, %v720_v27  ;;  %737 = vst.msk [vmem:[#allocation2 + $0x38] sm:$0xff] %vm570_vm1, %v721_v28  ;;  %v710_v42 = vmul.f32 %v2968_v11, %v685_v29  ;;  %v711_v46 = vmul.f32 %v2971_v12, %v685_v29  ;;  %v858_v44 = vmul.f32 %v3032_v22, %v820_v15 }
  0x67   : > { %v805_v47 = vrot.slane %v783_v26, %v2900_v16  ;;  %738 = vst.msk [vmem:[#allocation2 + $0x40] sm:$0xff] %vm570_vm1, %v722_v36  ;;  %739 = vst.msk [vmem:[#allocation2 + $0x48] sm:$0xff] %vm570_vm1, %v723_v37  ;;  %v708_v48 = vmul.f32 %v2968_v11, %v681_v39  ;;  %v709_v49 = vmul.f32 %v2971_v12, %v681_v39  ;;  %v606_v54 = vld [vmem:[#allocation2 + $0x70] sm:$0xff]  ;;  %v607_v55 = vld [vmem:[#allocation2 + $0x78] sm:$0xff] }
  0x68   : > { %v689_v50 = vrot.slane %v657_v40, %v2902_v17  ;;  %v813_v51 = vcombine.high %v2935_v35, %v2935_v35  ;;  %v726_v52 = vadd.f32 %v710_v42, %v604_v41  ;;  %v727_v53 = vadd.f32 %v711_v46, %v605_v43  ;;  %v751_v32 = vld [vmem:[#allocation2] sm:$0xff]  ;;  %v752_v60 = vld [vmem:[#allocation2 + $0x8] sm:$0xff]  ;;  %v3096_v40 = vld [vmem:[%s2871_s15 + $0x38] sm:$0xff] }
  0x69   : > { %v824_v56 = vrot.slane %v805_v47, %v2902_v17  ;;  %v815_v45 = vcombine.high %v805_v47, %v805_v47  ;;  %v724_v57 = vadd.f32 %v708_v48, %v602_v38  ;;  %v725_v58 = vadd.f32 %v709_v49, %v603_v24  ;;  %v753_v61 = vld [vmem:[#allocation2 + $0x10] sm:$0xff]  ;;  %v754_v63 = vld [vmem:[#allocation2 + $0x18] sm:$0xff]  ;;  %v3099_v24 = vld [vmem:[%s2878_s13 + $0x20] sm:$0xff] }
  0x6a   : > { %v712_v59 = vmul.f32 %v2968_v11, %v689_v50  ;;  %v713_v30 = vmul.f32 %v2971_v12, %v689_v50  ;;  %742 = vst.msk [vmem:[#allocation2 + $0x60] sm:$0xff] %vm570_vm1, %v726_v52  ;;  %743 = vst.msk [vmem:[#allocation2 + $0x68] sm:$0xff] %vm570_vm1, %v727_v53  ;;  %v873_v35 = vadd.f32 %v857_v33, %v751_v32  ;;  %v755_v6 = vld [vmem:[#allocation2 + $0x20] sm:$0xff]  ;;  %v3091_v38 = vld [vmem:[%s2871_s15 + $0x30] sm:$0xff] }
  0x6b   : > { %v874_v31 = vadd.f32 %v858_v44, %v752_v60  ;;  %v859_v62 = vmul.f32 %v3022_v7, %v824_v56  ;;  %v860_v0 = vmul.f32 %v3032_v22, %v824_v56  ;;  %740 = vst.msk [vmem:[#allocation2 + $0x50] sm:$0xff] %vm570_vm1, %v724_v57  ;;  %741 = vst.msk [vmem:[#allocation2 + $0x58] sm:$0xff] %vm570_vm1, %v725_v58  ;;  %v756_v8 = vld [vmem:[#allocation2 + $0x28] sm:$0xff] }
  0x6c   : > { %v728_v11 = vadd.f32 %v712_v59, %v606_v54  ;;  %v729_v12 = vadd.f32 %v713_v30, %v607_v55  ;;  %v828_v1 = vrot.slane %v813_v51, %v2902_v17  ;;  %v832_v2 = vrot.slane %v815_v45, %v2902_v17  ;;  %889 = vst.msk [vmem:[#allocation2] sm:$0xff] %vm570_vm1, %v873_v35 }
  0x6d   : > { %890 = vst.msk [vmem:[#allocation2 + $0x8] sm:$0xff] %vm570_vm1, %v874_v31  ;;  %v875_v4 = vadd.f32 %v859_v62, %v753_v61  ;;  %v876_v5 = vadd.f32 %v860_v0, %v754_v63  ;;  %v782_v9 = vrot.slane %v768_v25, %v2900_v16  ;;  %v934_v10 = vrot.slane %v3066_v3, %v2900_v16  ;;  %v757_v15 = vld [vmem:[#allocation2 + $0x30] sm:$0xff]  ;;  %v758_v19 = vld [vmem:[#allocation2 + $0x38] sm:$0xff] }
  0x6e   : > { %744 = vst.msk [vmem:[#allocation2 + $0x70] sm:$0xff] %vm570_vm1, %v728_v11  ;;  %745 = vst.msk [vmem:[#allocation2 + $0x78] sm:$0xff] %vm570_vm1, %v729_v12  ;;  %v861_v13 = vmul.f32 %v3022_v7, %v828_v1  ;;  %v862_v14 = vmul.f32 %v3032_v22, %v828_v1  ;;  %v863_v18 = vmul.f32 %v3022_v7, %v832_v2  ;;  %v759_v41 = vld [vmem:[#allocation2 + $0x40] sm:$0xff]  ;;  %v760_v42 = vld [vmem:[#allocation2 + $0x48] sm:$0xff] }
  0x6f   : > { %v864_v20 = vmul.f32 %v3032_v22, %v832_v2  ;;  %891 = vst.msk [vmem:[#allocation2 + $0x10] sm:$0xff] %vm570_vm1, %v875_v4  ;;  %892 = vst.msk [vmem:[#allocation2 + $0x18] sm:$0xff] %vm570_vm1, %v876_v5  ;;  %v798_v23 = vrot.slane %v782_v9, %v2900_v16  ;;  %v784_v25 = vcombine.high %v782_v9, %v782_v9 }
  0x70   : > { %v3086_v34 = vrot.slane %v934_v10, %v2900_v16  ;;  %v942_v21 = vcombine.high %v934_v10, %v934_v10  ;;  %v877_v26 = vadd.f32 %v861_v13, %v755_v6  ;;  %v878_v27 = vadd.f32 %v862_v14, %v756_v8 }
  0x71   : > { %v879_v28 = vadd.f32 %v863_v18, %v757_v15  ;;  %v880_v29 = vadd.f32 %v864_v20, %v758_v19  ;;  %v836_v33 = vrot.slane %v798_v23, %v2902_v17  ;;  %v812_v36 = vrot.slane %v784_v25, %v2900_v16  ;;  %v763_v35 = vld [vmem:[#allocation2 + $0x60] sm:$0xff]  ;;  %v764_v31 = vld [vmem:[#allocation2 + $0x68] sm:$0xff] }
  0x72   : > { %v814_v37 = vcombine.high %v798_v23, %v798_v23  ;;  %v979_v39 = vrot.slane %v3086_v34, %v2902_v17  ;;  %893 = vst.msk [vmem:[#allocation2 + $0x20] sm:$0xff] %vm570_vm1, %v877_v26  ;;  %894 = vst.msk [vmem:[#allocation2 + $0x28] sm:$0xff] %vm570_vm1, %v878_v27  ;;  %v964_v43 = vrot.slane %v942_v21, %v2900_v16  ;;  %v761_v50 = vld [vmem:[#allocation2 + $0x50] sm:$0xff]  ;;  %v762_v53 = vld [vmem:[#allocation2 + $0x58] sm:$0xff] }
  0x73   : > { %895 = vst.msk [vmem:[#allocation2 + $0x30] sm:$0xff] %vm570_vm1, %v879_v28  ;;  %896 = vst.msk [vmem:[#allocation2 + $0x38] sm:$0xff] %vm570_vm1, %v880_v29  ;;  %v972_v46 = vcombine.high %v3086_v34, %v3086_v34  ;;  %v927_v44 = vcombine.high %v3066_v3, %v3066_v3  ;;  %v3112_v47 = vrot.slane %v3099_v24, %v2900_v16  ;;  %v910_v55 = vld [vmem:[#allocation2] sm:$0xff] }
  0x74   : > { %v865_v48 = vmul.f32 %v3022_v7, %v836_v33  ;;  %v866_v49 = vmul.f32 %v3032_v22, %v836_v33  ;;  %v840_v51 = vrot.slane %v812_v36, %v2902_v17  ;;  %v844_v52 = vrot.slane %v814_v37, %v2902_v17  ;;  %v911_v56 = vld [vmem:[#allocation2 + $0x8] sm:$0xff]  ;;  %v3149_v29 = vld [vmem:[%s2871_s15 + $0x40] sm:$0xff] }
  0x75   : > { %v816_v54 = vcombine.high %v812_v36, %v812_v36  ;;  %v1016_v32 = vmul.f32 %v3091_v38, %v979_v39  ;;  %v1017_v45 = vmul.f32 %v3096_v40, %v979_v39  ;;  %v983_v57 = vrot.slane %v964_v43, %v2902_v17  ;;  %v765_v2 = vld [vmem:[#allocation2 + $0x70] sm:$0xff]  ;;  %v766_v3 = vld [vmem:[#allocation2 + $0x78] sm:$0xff] }
  0x76   : > { %v881_v58 = vadd.f32 %v865_v48, %v759_v41  ;;  %v882_v59 = vadd.f32 %v866_v49, %v760_v42  ;;  %v867_v30 = vmul.f32 %v3022_v7, %v840_v51  ;;  %v868_v60 = vmul.f32 %v3032_v22, %v840_v51  ;;  %v912_v11 = vld [vmem:[#allocation2 + $0x10] sm:$0xff]  ;;  %v913_v13 = vld [vmem:[#allocation2 + $0x18] sm:$0xff]  ;;  %v3157_v42 = vld [vmem:[%s2871_s15 + $0x48] sm:$0xff] }
  0x77   : > { %v869_v61 = vmul.f32 %v3022_v7, %v844_v52  ;;  %v870_v62 = vmul.f32 %v3032_v22, %v844_v52  ;;  %v848_v63 = vrot.slane %v816_v54, %v2902_v17  ;;  %v1032_v0 = vadd.f32 %v1016_v32, %v910_v55 }
  0x78   : > { %897 = vst.msk [vmem:[#allocation2 + $0x40] sm:$0xff] %vm570_vm1, %v881_v58  ;;  %898 = vst.msk [vmem:[#allocation2 + $0x48] sm:$0xff] %vm570_vm1, %v882_v59  ;;  %v883_v12 = vadd.f32 %v867_v30, %v761_v50  ;;  %v884_v1 = vadd.f32 %v868_v60, %v762_v53  ;;  %v1033_v4 = vadd.f32 %v1017_v45, %v911_v56 }
  0x79   : > { %v1018_v5 = vmul.f32 %v3091_v38, %v983_v57  ;;  %v885_v6 = vadd.f32 %v869_v61, %v763_v35  ;;  %v886_v8 = vadd.f32 %v870_v62, %v764_v31  ;;  %v871_v9 = vmul.f32 %v3022_v7, %v848_v63  ;;  %1048 = vst.msk [vmem:[#allocation2] sm:$0xff] %vm570_vm1, %v1032_v0  ;;  %v914_v20 = vld [vmem:[#allocation2 + $0x20] sm:$0xff]  ;;  %v915_v23 = vld [vmem:[#allocation2 + $0x28] sm:$0xff] }
  0x7a   : > { %v872_v10 = vmul.f32 %v3032_v22, %v848_v63  ;;  %899 = vst.msk [vmem:[#allocation2 + $0x50] sm:$0xff] %vm570_vm1, %v883_v12  ;;  %900 = vst.msk [vmem:[#allocation2 + $0x58] sm:$0xff] %vm570_vm1, %v884_v1  ;;  %v1019_v15 = vmul.f32 %v3096_v40, %v983_v57  ;;  %v987_v18 = vrot.slane %v972_v46, %v2902_v17  ;;  %v916_v33 = vld [vmem:[#allocation2 + $0x30] sm:$0xff]  ;;  %v917_v36 = vld [vmem:[#allocation2 + $0x38] sm:$0xff] }
  0x7b   : > { %1049 = vst.msk [vmem:[#allocation2 + $0x8] sm:$0xff] %vm570_vm1, %v1033_v4  ;;  %v1034_v14 = vadd.f32 %v1018_v5, %v912_v11  ;;  %v974_v19 = vcombine.high %v964_v43, %v964_v43  ;;  %901 = vst.msk [vmem:[#allocation2 + $0x60] sm:$0xff] %vm570_vm1, %v885_v6  ;;  %v887_v7 = vadd.f32 %v871_v9, %v765_v2 }
  0x7c   : > { %902 = vst.msk [vmem:[#allocation2 + $0x68] sm:$0xff] %vm570_vm1, %v886_v8  ;;  %v888_v22 = vadd.f32 %v872_v10, %v766_v3  ;;  %v941_v25 = vrot.slane %v927_v44, %v2900_v16  ;;  %v3142_v34 = vrot.slane %v3112_v47, %v2900_v16  ;;  %v1035_v21 = vadd.f32 %v1019_v15, %v913_v13 }
  0x7d   : > { %1050 = vst.msk [vmem:[#allocation2 + $0x10] sm:$0xff] %vm570_vm1, %v1034_v14  ;;  %v1020_v26 = vmul.f32 %v3091_v38, %v987_v18  ;;  %v1021_v27 = vmul.f32 %v3096_v40, %v987_v18  ;;  %v991_v28 = vrot.slane %v974_v19, %v2902_v17  ;;  %903 = vst.msk [vmem:[#allocation2 + $0x70] sm:$0xff] %vm570_vm1, %v887_v7 }
  0x7e   : > { %904 = vst.msk [vmem:[#allocation2 + $0x78] sm:$0xff] %vm570_vm1, %v888_v22  ;;  %v957_v37 = vrot.slane %v941_v25, %v2900_v16  ;;  %v943_v39 = vcombine.high %v941_v25, %v941_v25  ;;  %v1138_v41 = vrot.slane %v3142_v34, %v2902_v17  ;;  %v1101_v43 = vcombine.high %v3112_v47, %v3112_v47 }
  0x7f   : > { %1051 = vst.msk [vmem:[#allocation2 + $0x18] sm:$0xff] %vm570_vm1, %v1035_v21  ;;  %v1036_v46 = vadd.f32 %v1020_v26, %v914_v20  ;;  %v1037_v44 = vadd.f32 %v1021_v27, %v915_v23  ;;  %v1022_v48 = vmul.f32 %v3091_v38, %v991_v28  ;;  %v1023_v49 = vmul.f32 %v3096_v40, %v991_v28  ;;  %v918_v55 = vld [vmem:[#allocation2 + $0x40] sm:$0xff]  ;;  %v919_v32 = vld [vmem:[#allocation2 + $0x48] sm:$0xff] }
  0x80   : > { %v995_v50 = vrot.slane %v957_v37, %v2902_v17  ;;  %v971_v51 = vrot.slane %v943_v39, %v2900_v16  ;;  %v973_v52 = vcombine.high %v957_v37, %v957_v37  ;;  %v1175_v53 = vmul.f32 %v3149_v29, %v1138_v41  ;;  %v1069_v56 = vld [vmem:[#allocation2] sm:$0xff]  ;;  %v2377_v27 = vld [vmem:[%s2878_s13 + $0x28] sm:$0xff] }
  0x81   : > { %1052 = vst.msk [vmem:[#allocation2 + $0x20] sm:$0xff] %vm570_vm1, %v1036_v46  ;;  %1053 = vst.msk [vmem:[#allocation2 + $0x28] sm:$0xff] %vm570_vm1, %v1037_v44  ;;  %v1038_v47 = vadd.f32 %v1022_v48, %v916_v33  ;;  %v1039_v54 = vadd.f32 %v1023_v49, %v917_v36  ;;  %v1176_v45 = vmul.f32 %v3157_v42, %v1138_v41  ;;  %v920_v31 = vld [vmem:[#allocation2 + $0x50] sm:$0xff]  ;;  %v921_v61 = vld [vmem:[#allocation2 + $0x58] sm:$0xff] }
  0x82   : > { %v1123_v57 = vrot.slane %v1101_v43, %v2900_v16  ;;  %v1024_v58 = vmul.f32 %v3091_v38, %v995_v50  ;;  %v1025_v59 = vmul.f32 %v3096_v40, %v995_v50  ;;  %v999_v30 = vrot.slane %v971_v51, %v2902_v17  ;;  %v1070_v35 = vld [vmem:[#allocation2 + $0x8] sm:$0xff]  ;;  %v922_v4 = vld [vmem:[#allocation2 + $0x60] sm:$0xff]  ;;  %v3208_v50 = vld [vmem:[%s2878_s13 + $0x30] sm:$0xff] }
  0x83   : > { %v1003_v60 = vrot.slane %v973_v52, %v2902_v17  ;;  %1054 = vst.msk [vmem:[#allocation2 + $0x30] sm:$0xff] %vm570_vm1, %v1038_v47  ;;  %1055 = vst.msk [vmem:[#allocation2 + $0x38] sm:$0xff] %vm570_vm1, %v1039_v54  ;;  %v975_v62 = vcombine.high %v971_v51, %v971_v51  ;;  %v1191_v63 = vadd.f32 %v1175_v53, %v1069_v56  ;;  %v923_v5 = vld [vmem:[#allocation2 + $0x68] sm:$0xff] }
  0x84   : > { %v1192_v0 = vadd.f32 %v1176_v45, %v1070_v35  ;;  %v1142_v11 = vrot.slane %v1123_v57, %v2902_v17  ;;  %v1040_v12 = vadd.f32 %v1024_v58, %v918_v55  ;;  %v1041_v1 = vadd.f32 %v1025_v59, %v919_v32  ;;  %v1071_v10 = vld [vmem:[#allocation2 + $0x10] sm:$0xff] }
  0x85   : > { %v1026_v2 = vmul.f32 %v3091_v38, %v999_v30  ;;  %v1027_v3 = vmul.f32 %v3096_v40, %v999_v30  ;;  %v1028_v6 = vmul.f32 %v3091_v38, %v1003_v60  ;;  %v1029_v8 = vmul.f32 %v3096_v40, %v1003_v60  ;;  %1207 = vst.msk [vmem:[#allocation2] sm:$0xff] %vm570_vm1, %v1191_v63  ;;  %v924_v18 = vld [vmem:[#allocation2 + $0x70] sm:$0xff]  ;;  %v925_v19 = vld [vmem:[#allocation2 + $0x78] sm:$0xff] }
  0x86   : > { %v1007_v9 = vrot.slane %v975_v62, %v2902_v17  ;;  %1208 = vst.msk [vmem:[#allocation2 + $0x8] sm:$0xff] %vm570_vm1, %v1192_v0  ;;  %v1177_v13 = vmul.f32 %v3149_v29, %v1142_v11  ;;  %1056 = vst.msk [vmem:[#allocation2 + $0x40] sm:$0xff] %vm570_vm1, %v1040_v12  ;;  %v1072_v7 = vld [vmem:[#allocation2 + $0x18] sm:$0xff]  ;;  %v1178_v22 = vmul.f32 %v3157_v42, %v1142_v11 }
  0x87   : > { %1057 = vst.msk [vmem:[#allocation2 + $0x48] sm:$0xff] %vm570_vm1, %v1041_v1  ;;  %v1042_v14 = vadd.f32 %v1026_v2, %v920_v31  ;;  %v1043_v15 = vadd.f32 %v1027_v3, %v921_v61  ;;  %v1131_v20 = vcombine.high %v3142_v34, %v3142_v34  ;;  %v1044_v23 = vadd.f32 %v1028_v6, %v922_v4  ;;  %v3226_v60 = vld [vmem:[%s2871_s15 + $0x58] sm:$0xff] }
  0x88   : > { %v1045_v25 = vadd.f32 %v1029_v8, %v923_v5  ;;  %v1030_v21 = vmul.f32 %v3091_v38, %v1007_v9  ;;  %v1031_v26 = vmul.f32 %v3096_v40, %v1007_v9  ;;  %v1193_v28 = vadd.f32 %v1177_v13, %v1071_v10  ;;  %v1073_v38 = vld [vmem:[#allocation2 + $0x20] sm:$0xff]  ;;  %v1074_v41 = vld [vmem:[#allocation2 + $0x28] sm:$0xff] }
  0x89   : > { %1058 = vst.msk [vmem:[#allocation2 + $0x50] sm:$0xff] %vm570_vm1, %v1042_v14  ;;  %1059 = vst.msk [vmem:[#allocation2 + $0x58] sm:$0xff] %vm570_vm1, %v1043_v15  ;;  %v1194_v33 = vadd.f32 %v1178_v22, %v1072_v7  ;;  %v1146_v36 = vrot.slane %v1131_v20, %v2902_v17  ;;  %v1133_v37 = vcombine.high %v1123_v57, %v1123_v57  ;;  %v3221_v57 = vld [vmem:[%s2871_s15 + $0x50] sm:$0xff] }
  0x8a   : > { %1060 = vst.msk [vmem:[#allocation2 + $0x60] sm:$0xff] %vm570_vm1, %v1044_v23  ;;  %1061 = vst.msk [vmem:[#allocation2 + $0x68] sm:$0xff] %vm570_vm1, %v1045_v25  ;;  %v1046_v34 = vadd.f32 %v1030_v21, %v924_v18  ;;  %v1047_v39 = vadd.f32 %v1031_v26, %v925_v19  ;;  %v1086_v40 = vcombine.high %v3099_v24, %v3099_v24  ;;  %v1075_v24 = vld [vmem:[#allocation2 + $0x30] sm:$0xff]  ;;  %v1076_v51 = vld [vmem:[#allocation2 + $0x38] sm:$0xff] }
  0x8b   : > { %v1252_v43 = vrot.slane %v2377_v27, %v2900_v16  ;;  %1209 = vst.msk [vmem:[#allocation2 + $0x10] sm:$0xff] %vm570_vm1, %v1193_v28  ;;  %1210 = vst.msk [vmem:[#allocation2 + $0x18] sm:$0xff] %vm570_vm1, %v1194_v33  ;;  %v1179_v46 = vmul.f32 %v3149_v29, %v1146_v36  ;;  %v1180_v44 = vmul.f32 %v3157_v42, %v1146_v36 }
  0x8c   : > { %v1150_v48 = vrot.slane %v1133_v37, %v2902_v17  ;;  %v1245_v49 = vcombine.high %v2377_v27, %v2377_v27  ;;  %1062 = vst.msk [vmem:[#allocation2 + $0x70] sm:$0xff] %vm570_vm1, %v1046_v34  ;;  %1063 = vst.msk [vmem:[#allocation2 + $0x78] sm:$0xff] %vm570_vm1, %v1047_v39  ;;  %v1100_v52 = vrot.slane %v1086_v40, %v2900_v16  ;;  %v1228_v1 = vld [vmem:[#allocation2] sm:$0xff] }
  0x8d   : > { %v1268_v53 = vrot.slane %v1252_v43, %v2900_v16  ;;  %v1260_v47 = vcombine.high %v1252_v43, %v1252_v43  ;;  %v3216_v54 = vrot.slane %v3208_v50, %v2900_v16  ;;  %v1195_v55 = vadd.f32 %v1179_v46, %v1073_v38  ;;  %v1229_v3 = vld [vmem:[#allocation2 + $0x8] sm:$0xff]  ;;  %v1077_v4 = vld [vmem:[#allocation2 + $0x40] sm:$0xff] }
  0x8e   : > { %v1196_v32 = vadd.f32 %v1180_v44, %v1074_v41  ;;  %v1181_v56 = vmul.f32 %v3149_v29, %v1150_v48  ;;  %v1182_v45 = vmul.f32 %v3157_v42, %v1150_v48  ;;  %v1116_v58 = vrot.slane %v1100_v52, %v2900_v16  ;;  %v1078_v5 = vld [vmem:[#allocation2 + $0x48] sm:$0xff] }
  0x8f   : > { %v1102_v59 = vcombine.high %v1100_v52, %v1100_v52  ;;  %v1297_v30 = vrot.slane %v1268_v53, %v2902_v17  ;;  %v3229_v35 = vrot.slane %v1260_v47, %v2900_v16  ;;  %1211 = vst.msk [vmem:[#allocation2 + $0x20] sm:$0xff] %vm570_vm1, %v1195_v55  ;;  %v1290_v62 = vcombine.high %v1268_v53, %v1268_v53 }
  0x90   : > { %1212 = vst.msk [vmem:[#allocation2 + $0x28] sm:$0xff] %vm570_vm1, %v1196_v32  ;;  %v1197_v31 = vadd.f32 %v1181_v56, %v1075_v24  ;;  %v1198_v61 = vadd.f32 %v1182_v45, %v1076_v51  ;;  %v3234_v63 = vrot.slane %v1245_v49, %v2900_v16  ;;  %v1154_v0 = vrot.slane %v1116_v58, %v2902_v17  ;;  %v1079_v7 = vld [vmem:[#allocation2 + $0x50] sm:$0xff]  ;;  %v1080_v22 = vld [vmem:[#allocation2 + $0x58] sm:$0xff] }
  0x91   : > { %v1130_v11 = vrot.slane %v1102_v59, %v2900_v16  ;;  %v1132_v12 = vcombine.high %v1116_v58, %v1116_v58  ;;  %v1334_v2 = vmul.f32 %v3221_v57, %v1297_v30  ;;  %v1335_v6 = vmul.f32 %v3226_v60, %v1297_v30  ;;  %v1081_v36 = vld [vmem:[#allocation2 + $0x60] sm:$0xff]  ;;  %v1082_v37 = vld [vmem:[#allocation2 + $0x68] sm:$0xff] }
  0x92   : > { %1213 = vst.msk [vmem:[#allocation2 + $0x30] sm:$0xff] %vm570_vm1, %v1197_v31  ;;  %1214 = vst.msk [vmem:[#allocation2 + $0x38] sm:$0xff] %vm570_vm1, %v1198_v61  ;;  %v1301_v8 = vrot.slane %v3229_v35, %v2902_v17  ;;  %v1305_v9 = vrot.slane %v1290_v62, %v2902_v17  ;;  %v1292_v10 = vcombine.high %v3229_v35, %v3229_v35  ;;  %v1230_v19 = vld [vmem:[#allocation2 + $0x10] sm:$0xff]  ;;  %v1231_v40 = vld [vmem:[#allocation2 + $0x18] sm:$0xff] }
  0x93   : > { %v1183_v13 = vmul.f32 %v3149_v29, %v1154_v0  ;;  %v1184_v14 = vmul.f32 %v3157_v42, %v1154_v0  ;;  %v1158_v15 = vrot.slane %v1130_v11, %v2902_v17  ;;  %v1162_v18 = vrot.slane %v1132_v12, %v2902_v17  ;;  %v1083_v44 = vld [vmem:[#allocation2 + $0x70] sm:$0xff]  ;;  %v1084_v48 = vld [vmem:[#allocation2 + $0x78] sm:$0xff] }
  0x94   : > { %v1134_v20 = vcombine.high %v1130_v11, %v1130_v11  ;;  %v1350_v23 = vadd.f32 %v1334_v2, %v1228_v1  ;;  %v1351_v25 = vadd.f32 %v1335_v6, %v1229_v3  ;;  %v1336_v21 = vmul.f32 %v3221_v57, %v1301_v8  ;;  %v3287_v3 = vld [vmem:[%s2871_s15 + $0x60] sm:$0xff] }
  0x95   : > { %v1199_v26 = vadd.f32 %v1183_v13, %v1077_v4  ;;  %v1200_v27 = vadd.f32 %v1184_v14, %v1078_v5  ;;  %v1185_v28 = vmul.f32 %v3149_v29, %v1158_v15  ;;  %v1186_v33 = vmul.f32 %v3157_v42, %v1158_v15  ;;  %v3290_v4 = vld [vmem:[%s2871_s15 + $0x68] sm:$0xff] }
  0x96   : > { %v1187_v34 = vmul.f32 %v3149_v29, %v1162_v18  ;;  %v1188_v39 = vmul.f32 %v3157_v42, %v1162_v18  ;;  %v1166_v38 = vrot.slane %v1134_v20, %v2902_v17  ;;  %1366 = vst.msk [vmem:[#allocation2] sm:$0xff] %vm570_vm1, %v1350_v23  ;;  %1367 = vst.msk [vmem:[#allocation2 + $0x8] sm:$0xff] %vm570_vm1, %v1351_v25  ;;  %v1232_v24 = vld [vmem:[#allocation2 + $0x20] sm:$0xff] }
  0x97   : > { %v1352_v41 = vadd.f32 %v1336_v21, %v1230_v19  ;;  %1215 = vst.msk [vmem:[#allocation2 + $0x40] sm:$0xff] %vm570_vm1, %v1199_v26  ;;  %1216 = vst.msk [vmem:[#allocation2 + $0x48] sm:$0xff] %vm570_vm1, %v1200_v27  ;;  %v1201_v43 = vadd.f32 %v1185_v28, %v1079_v7  ;;  %v1202_v46 = vadd.f32 %v1186_v33, %v1080_v22  ;;  %v1233_v32 = vld [vmem:[#allocation2 + $0x28] sm:$0xff] }
  0x98   : > { %v1337_v49 = vmul.f32 %v3226_v60, %v1301_v8  ;;  %v1338_v51 = vmul.f32 %v3221_v57, %v1305_v9  ;;  %v1203_v52 = vadd.f32 %v1187_v34, %v1081_v36  ;;  %v1204_v53 = vadd.f32 %v1188_v39, %v1082_v37 }
  0x99   : > { %v1189_v47 = vmul.f32 %v3149_v29, %v1166_v38  ;;  %v1190_v55 = vmul.f32 %v3157_v42, %v1166_v38  ;;  %1368 = vst.msk [vmem:[#allocation2 + $0x10] sm:$0xff] %vm570_vm1, %v1352_v41  ;;  %1217 = vst.msk [vmem:[#allocation2 + $0x50] sm:$0xff] %vm570_vm1, %v1201_v43  ;;  %v1339_v58 = vmul.f32 %v3226_v60, %v1305_v9  ;;  %v1234_v42 = vld [vmem:[#allocation2 + $0x30] sm:$0xff]  ;;  %v1235_v35 = vld [vmem:[#allocation2 + $0x38] sm:$0xff] }
  0x9a   : > { %1218 = vst.msk [vmem:[#allocation2 + $0x58] sm:$0xff] %vm570_vm1, %v1202_v46  ;;  %v1353_v56 = vadd.f32 %v1337_v49, %v1231_v40  ;;  %v1354_v45 = vadd.f32 %v1338_v51, %v1232_v24  ;;  %v1309_v59 = vrot.slane %v1292_v10, %v2902_v17  ;;  %1219 = vst.msk [vmem:[#allocation2 + $0x60] sm:$0xff] %vm570_vm1, %v1203_v52 }
  0x9b   : > { %1220 = vst.msk [vmem:[#allocation2 + $0x68] sm:$0xff] %vm570_vm1, %v1204_v53  ;;  %v1205_v29 = vadd.f32 %v1189_v47, %v1083_v44  ;;  %v1206_v30 = vadd.f32 %v1190_v55, %v1084_v48  ;;  %v1275_v31 = vrot.slane %v3234_v63, %v2900_v16  ;;  %v1261_v61 = vcombine.high %v3234_v63, %v3234_v63 }
  0x9c   : > { %1369 = vst.msk [vmem:[#allocation2 + $0x18] sm:$0xff] %vm570_vm1, %v1353_v56  ;;  %1370 = vst.msk [vmem:[#allocation2 + $0x20] sm:$0xff] %vm570_vm1, %v1354_v45  ;;  %v1355_v62 = vadd.f32 %v1339_v58, %v1233_v32  ;;  %v1340_v0 = vmul.f32 %v3221_v57, %v1309_v59  ;;  %v1341_v11 = vmul.f32 %v3226_v60, %v1309_v59 }
  0x9d   : > { %v1427_v12 = vrot.slane %v3216_v54, %v2900_v16  ;;  %1221 = vst.msk [vmem:[#allocation2 + $0x70] sm:$0xff] %vm570_vm1, %v1205_v29  ;;  %1222 = vst.msk [vmem:[#allocation2 + $0x78] sm:$0xff] %vm570_vm1, %v1206_v30  ;;  %v1313_v1 = vrot.slane %v1275_v31, %v2902_v17  ;;  %v1289_v63 = vrot.slane %v1261_v61, %v2900_v16  ;;  %v1387_v22 = vld [vmem:[#allocation2] sm:$0xff]  ;;  %v1388_v23 = vld [vmem:[#allocation2 + $0x8] sm:$0xff] }
  0x9e   : > { %v1291_v2 = vcombine.high %v1275_v31, %v1275_v31  ;;  %v1419_v5 = vcombine.high %v3216_v54, %v3216_v54  ;;  %1371 = vst.msk [vmem:[#allocation2 + $0x28] sm:$0xff] %vm570_vm1, %v1355_v62  ;;  %v1356_v6 = vadd.f32 %v1340_v0, %v1234_v42  ;;  %v1357_v8 = vadd.f32 %v1341_v11, %v1235_v35  ;;  %v1236_v13 = vld [vmem:[#allocation2 + $0x40] sm:$0xff]  ;;  %v1237_v15 = vld [vmem:[#allocation2 + $0x48] sm:$0xff] }
  0x9f   : > { %v1456_v9 = vrot.slane %v1427_v12, %v2902_v17  ;;  %v1449_v10 = vcombine.high %v1427_v12, %v1427_v12  ;;  %v1342_v14 = vmul.f32 %v3221_v57, %v1313_v1  ;;  %v1343_v18 = vmul.f32 %v3226_v60, %v1313_v1 }
  0xa0   : > { %v1317_v19 = vrot.slane %v1289_v63, %v2902_v17  ;;  %v1321_v7 = vrot.slane %v1291_v2, %v2902_v17  ;;  %1372 = vst.msk [vmem:[#allocation2 + $0x30] sm:$0xff] %vm570_vm1, %v1356_v6  ;;  %1373 = vst.msk [vmem:[#allocation2 + $0x38] sm:$0xff] %vm570_vm1, %v1357_v8  ;;  %v1293_v54 = vcombine.high %v1289_v63, %v1289_v63  ;;  %v1238_v28 = vld [vmem:[#allocation2 + $0x50] sm:$0xff] }
  0xa1   : > { %v1493_v20 = vmul.f32 %v3287_v3, %v1456_v9  ;;  %v1494_v25 = vmul.f32 %v3290_v4, %v1456_v9  ;;  %v1441_v21 = vrot.slane %v1419_v5, %v2900_v16  ;;  %v1358_v26 = vadd.f32 %v1342_v14, %v1236_v13  ;;  %v1239_v36 = vld [vmem:[#allocation2 + $0x58] sm:$0xff]  ;;  %v1240_v34 = vld [vmem:[#allocation2 + $0x60] sm:$0xff]  ;;  %v1389_v49 = vld [vmem:[#allocation2 + $0x10] sm:$0xff] }
  0xa2   : > { %v1359_v27 = vadd.f32 %v1343_v18, %v1237_v15  ;;  %v1344_v33 = vmul.f32 %v3221_v57, %v1317_v19  ;;  %v1345_v37 = vmul.f32 %v3226_v60, %v1317_v19  ;;  %v1346_v39 = vmul.f32 %v3221_v57, %v1321_v7  ;;  %v1241_v38 = vld [vmem:[#allocation2 + $0x68] sm:$0xff]  ;;  %v3343_v19 = vld [vmem:[%s2871_s15 + $0x70] sm:$0xff] }
  0xa3   : > { %v1347_v41 = vmul.f32 %v3226_v60, %v1321_v7  ;;  %v1325_v40 = vrot.slane %v1293_v54, %v2902_v17  ;;  %v1509_v43 = vadd.f32 %v1493_v20, %v1387_v22  ;;  %1374 = vst.msk [vmem:[#allocation2 + $0x40] sm:$0xff] %vm570_vm1, %v1358_v26  ;;  %v1510_v48 = vadd.f32 %v1494_v25, %v1388_v23  ;;  %v1390_v56 = vld [vmem:[#allocation2 + $0x18] sm:$0xff]  ;;  %v1391_v42 = vld [vmem:[#allocation2 + $0x20] sm:$0xff] }
  0xa4   : > { %1375 = vst.msk [vmem:[#allocation2 + $0x48] sm:$0xff] %vm570_vm1, %v1359_v27  ;;  %v1360_v46 = vadd.f32 %v1344_v33, %v1238_v28  ;;  %v1361_v44 = vadd.f32 %v1345_v37, %v1239_v36  ;;  %v1460_v24 = vrot.slane %v1441_v21, %v2902_v17  ;;  %v1362_v51 = vadd.f32 %v1346_v39, %v1240_v34  ;;  %v1242_v53 = vld [vmem:[#allocation2 + $0x70] sm:$0xff]  ;;  %v1243_v55 = vld [vmem:[#allocation2 + $0x78] sm:$0xff] }
  0xa5   : > { %v1363_v52 = vadd.f32 %v1347_v41, %v1241_v38  ;;  %v1348_v47 = vmul.f32 %v3221_v57, %v1325_v40  ;;  %v1349_v32 = vmul.f32 %v3226_v60, %v1325_v40  ;;  %1525 = vst.msk [vmem:[#allocation2] sm:$0xff] %vm570_vm1, %v1509_v43  ;;  %1526 = vst.msk [vmem:[#allocation2 + $0x8] sm:$0xff] %vm570_vm1, %v1510_v48  ;;  %v2383_v57 = vld [vmem:[%s2878_s13 + $0x38] sm:$0xff]  ;;  %v1392_v35 = vld [vmem:[#allocation2 + $0x28] sm:$0xff] }
  0xa6   : > { %1376 = vst.msk [vmem:[#allocation2 + $0x50] sm:$0xff] %vm570_vm1, %v1360_v46  ;;  %1377 = vst.msk [vmem:[#allocation2 + $0x58] sm:$0xff] %vm570_vm1, %v1361_v44  ;;  %v1495_v45 = vmul.f32 %v3287_v3, %v1460_v24  ;;  %v1496_v58 = vmul.f32 %v3290_v4, %v1460_v24  ;;  %v1464_v59 = vrot.slane %v1449_v10, %v2902_v17  ;;  %v3346_v7 = vld [vmem:[%s2871_s15 + $0x78] sm:$0xff] }
  0xa7   : > { %v1451_v29 = vcombine.high %v1441_v21, %v1441_v21  ;;  %1378 = vst.msk [vmem:[#allocation2 + $0x60] sm:$0xff] %vm570_vm1, %v1362_v51  ;;  %1379 = vst.msk [vmem:[#allocation2 + $0x68] sm:$0xff] %vm570_vm1, %v1363_v52  ;;  %v1364_v60 = vadd.f32 %v1348_v47, %v1242_v53  ;;  %v1365_v30 = vadd.f32 %v1349_v32, %v1243_v55  ;;  %v1393_v8 = vld [vmem:[#allocation2 + $0x30] sm:$0xff]  ;;  %v1394_v9 = vld [vmem:[#allocation2 + $0x38] sm:$0xff] }
  0xa8   : > { %v1404_v31 = vcombine.high %v3208_v50, %v3208_v50  ;;  %v1570_v61 = vrot.slane %v2383_v57, %v2900_v16  ;;  %v1511_v62 = vadd.f32 %v1495_v45, %v1389_v49  ;;  %v1512_v0 = vadd.f32 %v1496_v58, %v1390_v56 }
  0xa9   : > { %v1497_v11 = vmul.f32 %v3287_v3, %v1464_v59  ;;  %v1498_v12 = vmul.f32 %v3290_v4, %v1464_v59  ;;  %1380 = vst.msk [vmem:[#allocation2 + $0x70] sm:$0xff] %vm570_vm1, %v1364_v60  ;;  %1381 = vst.msk [vmem:[#allocation2 + $0x78] sm:$0xff] %vm570_vm1, %v1365_v30  ;;  %v1468_v1 = vrot.slane %v1451_v29, %v2902_v17 }
  0xaa   : > { %v1418_v63 = vrot.slane %v1404_v31, %v2900_v16  ;;  %v3335_v50 = vrot.slane %v1570_v61, %v2900_v16  ;;  %v1578_v2 = vcombine.high %v1570_v61, %v1570_v61  ;;  %1527 = vst.msk [vmem:[#allocation2 + $0x10] sm:$0xff] %vm570_vm1, %v1511_v62  ;;  %1528 = vst.msk [vmem:[#allocation2 + $0x18] sm:$0xff] %vm570_vm1, %v1512_v0  ;;  %v1395_v36 = vld [vmem:[#allocation2 + $0x40] sm:$0xff] }
  0xab   : > { %v1513_v5 = vadd.f32 %v1497_v11, %v1391_v42  ;;  %v1514_v6 = vadd.f32 %v1498_v12, %v1392_v35  ;;  %v1563_v10 = vcombine.high %v2383_v57, %v2383_v57  ;;  %v1499_v13 = vmul.f32 %v3287_v3, %v1468_v1  ;;  %v1396_v37 = vld [vmem:[#allocation2 + $0x48] sm:$0xff] }
  0xac   : > { %v1500_v14 = vmul.f32 %v3290_v4, %v1468_v1  ;;  %v1434_v15 = vrot.slane %v1418_v63, %v2900_v16  ;;  %v1420_v18 = vcombine.high %v1418_v63, %v1418_v63  ;;  %v1615_v22 = vrot.slane %v3335_v50, %v2902_v17  ;;  %v1546_v28 = vld [vmem:[#allocation2] sm:$0xff]  ;;  %v1547_v33 = vld [vmem:[#allocation2 + $0x8] sm:$0xff] }
  0xad   : > { %1529 = vst.msk [vmem:[#allocation2 + $0x20] sm:$0xff] %vm570_vm1, %v1513_v5  ;;  %1530 = vst.msk [vmem:[#allocation2 + $0x28] sm:$0xff] %vm570_vm1, %v1514_v6  ;;  %v3353_v54 = vrot.slane %v1578_v2, %v2900_v16  ;;  %v1608_v20 = vcombine.high %v3335_v50, %v3335_v50  ;;  %v3358_v23 = vrot.slane %v1563_v10, %v2900_v16  ;;  %v1397_v48 = vld [vmem:[#allocation2 + $0x50] sm:$0xff]  ;;  %v1398_v49 = vld [vmem:[#allocation2 + $0x58] sm:$0xff] }
  0xae   : > { %v1515_v25 = vadd.f32 %v1499_v13, %v1393_v8  ;;  %v1516_v21 = vadd.f32 %v1500_v14, %v1394_v9  ;;  %v1472_v26 = vrot.slane %v1434_v15, %v2902_v17  ;;  %v1448_v27 = vrot.slane %v1420_v18, %v2900_v16  ;;  %v1399_v45 = vld [vmem:[#allocation2 + $0x60] sm:$0xff]  ;;  %v1400_v58 = vld [vmem:[#allocation2 + $0x68] sm:$0xff] }
  0xaf   : > { %v1450_v34 = vcombine.high %v1434_v15, %v1434_v15  ;;  %v1652_v39 = vmul.f32 %v3343_v19, %v1615_v22  ;;  %v1653_v38 = vmul.f32 %v3346_v7, %v1615_v22  ;;  %v1619_v41 = vrot.slane %v3353_v54, %v2902_v17 }
  0xb0   : > { %1531 = vst.msk [vmem:[#allocation2 + $0x30] sm:$0xff] %vm570_vm1, %v1515_v25  ;;  %1532 = vst.msk [vmem:[#allocation2 + $0x38] sm:$0xff] %vm570_vm1, %v1516_v21  ;;  %v1501_v40 = vmul.f32 %v3287_v3, %v1472_v26  ;;  %v1502_v43 = vmul.f32 %v3290_v4, %v1472_v26  ;;  %v1476_v46 = vrot.slane %v1448_v27, %v2902_v17  ;;  %v1401_v61 = vld [vmem:[#allocation2 + $0x70] sm:$0xff]  ;;  %v1402_v62 = vld [vmem:[#allocation2 + $0x78] sm:$0xff] }
  0xb1   : > { %v1452_v44 = vcombine.high %v1448_v27, %v1448_v27  ;;  %v1480_v24 = vrot.slane %v1450_v34, %v2902_v17  ;;  %v1668_v51 = vadd.f32 %v1652_v39, %v1546_v28  ;;  %v1669_v52 = vadd.f32 %v1653_v38, %v1547_v33  ;;  %v1548_v59 = vld [vmem:[#allocation2 + $0x10] sm:$0xff]  ;;  %v1549_v42 = vld [vmem:[#allocation2 + $0x18] sm:$0xff] }
  0xb2   : > { %v1654_v53 = vmul.f32 %v3343_v19, %v1619_v41  ;;  %v1517_v47 = vadd.f32 %v1501_v40, %v1395_v36  ;;  %v1518_v55 = vadd.f32 %v1502_v43, %v1396_v37  ;;  %v1503_v32 = vmul.f32 %v3287_v3, %v1476_v46 }
  0xb3   : > { %v1504_v56 = vmul.f32 %v3290_v4, %v1476_v46  ;;  %v1505_v29 = vmul.f32 %v3287_v3, %v1480_v24  ;;  %v1506_v57 = vmul.f32 %v3290_v4, %v1480_v24  ;;  %v1484_v60 = vrot.slane %v1452_v44, %v2902_v17  ;;  %1684 = vst.msk [vmem:[#allocation2] sm:$0xff] %vm570_vm1, %v1668_v51 }
  0xb4   : > { %1685 = vst.msk [vmem:[#allocation2 + $0x8] sm:$0xff] %vm570_vm1, %v1669_v52  ;;  %v1670_v30 = vadd.f32 %v1654_v53, %v1548_v59  ;;  %1533 = vst.msk [vmem:[#allocation2 + $0x40] sm:$0xff] %vm570_vm1, %v1517_v47  ;;  %v1519_v35 = vadd.f32 %v1503_v32, %v1397_v48  ;;  %v1655_v0 = vmul.f32 %v3346_v7, %v1619_v41  ;;  %v1550_v2 = vld [vmem:[#allocation2 + $0x20] sm:$0xff]  ;;  %v1551_v5 = vld [vmem:[#allocation2 + $0x28] sm:$0xff] }
  0xb5   : > { %1534 = vst.msk [vmem:[#allocation2 + $0x48] sm:$0xff] %vm570_vm1, %v1518_v55  ;;  %v1520_v31 = vadd.f32 %v1504_v56, %v1398_v49  ;;  %v1623_v11 = vrot.slane %v1608_v20, %v2902_v17  ;;  %v1521_v12 = vadd.f32 %v1505_v29, %v1399_v45  ;;  %v1522_v1 = vadd.f32 %v1506_v57, %v1400_v58 }
  0xb6   : > { %v1507_v63 = vmul.f32 %v3287_v3, %v1484_v60  ;;  %v1508_v50 = vmul.f32 %v3290_v4, %v1484_v60  ;;  %1686 = vst.msk [vmem:[#allocation2 + $0x10] sm:$0xff] %vm570_vm1, %v1670_v30  ;;  %1535 = vst.msk [vmem:[#allocation2 + $0x50] sm:$0xff] %vm570_vm1, %v1519_v35  ;;  %v1671_v6 = vadd.f32 %v1655_v0, %v1549_v42 }
  0xb7   : > { %1536 = vst.msk [vmem:[#allocation2 + $0x58] sm:$0xff] %vm570_vm1, %v1520_v31  ;;  %v1656_v8 = vmul.f32 %v3343_v19, %v1623_v11  ;;  %v1657_v9 = vmul.f32 %v3346_v7, %v1623_v11  ;;  %v1610_v10 = vcombine.high %v3353_v54, %v3353_v54  ;;  %1537 = vst.msk [vmem:[#allocation2 + $0x60] sm:$0xff] %vm570_vm1, %v1521_v12  ;;  %v1552_v54 = vld [vmem:[#allocation2 + $0x30] sm:$0xff]  ;;  %v1553_v20 = vld [vmem:[#allocation2 + $0x38] sm:$0xff] }
  0xb8   : > { %1538 = vst.msk [vmem:[#allocation2 + $0x68] sm:$0xff] %vm570_vm1, %v1522_v1  ;;  %v1523_v3 = vadd.f32 %v1507_v63, %v1401_v61  ;;  %v1524_v4 = vadd.f32 %v1508_v50, %v1402_v62  ;;  %v1593_v13 = vrot.slane %v3358_v23, %v2900_v16  ;;  %v1579_v14 = vcombine.high %v3358_v23, %v3358_v23 }
  0xb9   : > { %1687 = vst.msk [vmem:[#allocation2 + $0x18] sm:$0xff] %vm570_vm1, %v1671_v6  ;;  %v1672_v15 = vadd.f32 %v1656_v8, %v1550_v2  ;;  %v1673_v18 = vadd.f32 %v1657_v9, %v1551_v5  ;;  %v1627_v22 = vrot.slane %v1610_v10, %v2902_v17 }
  0xba   : > { %1539 = vst.msk [vmem:[#allocation2 + $0x70] sm:$0xff] %vm570_vm1, %v1523_v3  ;;  %1540 = vst.msk [vmem:[#allocation2 + $0x78] sm:$0xff] %vm570_vm1, %v1524_v4  ;;  %v1631_v25 = vrot.slane %v1593_v13, %v2902_v17  ;;  %v1607_v21 = vrot.slane %v1579_v14, %v2900_v16  ;;  %v1609_v26 = vcombine.high %v1593_v13, %v1593_v13 }
  0xbb   : > { %1688 = vst.msk [vmem:[#allocation2 + $0x20] sm:$0xff] %vm570_vm1, %v1672_v15  ;;  %1689 = vst.msk [vmem:[#allocation2 + $0x28] sm:$0xff] %vm570_vm1, %v1673_v18  ;;  %v1658_v23 = vmul.f32 %v3343_v19, %v1627_v22  ;;  %v1659_v27 = vmul.f32 %v3346_v7, %v1627_v22  ;;  %v1554_v28 = vld [vmem:[#allocation2 + $0x40] sm:$0xff]  ;;  %v1705_v30 = vld [vmem:[#allocation2 + $0x8] sm:$0xff] (!%p2386_p6) }
  0xbc   : > { %v1660_v33 = vmul.f32 %v3343_v19, %v1631_v25  ;;  %v1555_v36 = vld [vmem:[#allocation2 + $0x48] sm:$0xff]  ;;  %v1661_v37 = vmul.f32 %v3346_v7, %v1631_v25  ;;  %v1635_v34 = vrot.slane %v1607_v21, %v2902_v17  ;;  %v1639_v39 = vrot.slane %v1609_v26, %v2902_v17 }
  0xbd   : > { %v1674_v16 = vadd.f32 %v1658_v23, %v1552_v54  ;;  %v1675_v38 = vadd.f32 %v1659_v27, %v1553_v20  ;;  %v1611_v41 = vcombine.high %v1607_v21, %v1607_v21  ;;  %v1556_v46 = vld [vmem:[#allocation2 + $0x50] sm:$0xff]  ;;  %v1725_v35 = vsel (!%p2386_p6), %vm570_vm1, %v1705_v30, 0.0 }
  0xbe   : > { %v1676_v40 = vadd.f32 %v1660_v33, %v1554_v28  ;;  %v1677_v43 = vadd.f32 %v1661_v37, %v1555_v36  ;;  %v1662_v44 = vmul.f32 %v3343_v19, %v1635_v34  ;;  %v1557_v48 = vld [vmem:[#allocation2 + $0x58] sm:$0xff]  ;;  %v1663_v49 = vmul.f32 %v3346_v7, %v1635_v34  ;;  %v1558_v24 = vld [vmem:[#allocation2 + $0x60] sm:$0xff]  ;;  %1726 = vadd.xlane.f32.xlu1 (!%p2386_p6), %v1725_v35  ;;  %v1706_v0 = vld [vmem:[#allocation2 + $0x10] sm:$0xff] (!%p2386_p6) }
  0xbf   : > { %1690 = vst.msk [vmem:[#allocation2 + $0x30] sm:$0xff] %vm570_vm1, %v1674_v16  ;;  %1691 = vst.msk [vmem:[#allocation2 + $0x38] sm:$0xff] %vm570_vm1, %v1675_v38  ;;  %v1664_v51 = vmul.f32 %v3343_v19, %v1639_v39  ;;  %v1559_v52 = vld [vmem:[#allocation2 + $0x68] sm:$0xff]  ;;  %v1665_v53 = vmul.f32 %v3346_v7, %v1639_v39  ;;  %v1643_v47 = vrot.slane %v1611_v41, %v2902_v17  ;;  %1703 = sbr.rel (%p2386_p6) target bundleno = 759 (0x2f7), region = 94  ;;  %v1728_v12 = vsel (!%p2386_p6), %vm570_vm1, %v1706_v0, 0.0 }
  0xc0   : > { %1692 = vst.msk [vmem:[#allocation2 + $0x40] sm:$0xff] %vm570_vm1, %v1676_v40  ;;  %1693 = vst.msk [vmem:[#allocation2 + $0x48] sm:$0xff] %vm570_vm1, %v1677_v43  ;;  %v1678_v55 = vadd.f32 %v1662_v44, %v1556_v46  ;;  %v1679_v32 = vadd.f32 %v1663_v49, %v1557_v48  ;;  %v3437_v63 = vld [vmem:[#allocation2 + $0x18] sm:$0xff] (!%p2386_p6) }
  0xc1   : > { %v1680_v56 = vadd.f32 %v1664_v51, %v1558_v24  ;;  %v1681_v45 = vadd.f32 %v1665_v53, %v1559_v52  ;;  %v1560_v58 = vld [vmem:[#allocation2 + $0x70] sm:$0xff]  ;;  %v1666_v59 = vmul.f32 %v3343_v19, %v1643_v47  ;;  %v1561_v29 = vld [vmem:[#allocation2 + $0x78] sm:$0xff]  ;;  %v1667_v57 = vmul.f32 %v3346_v7, %v1643_v47  ;;  %v1704_v19 = vld [vmem:[#allocation2] sm:$0xff] (!%p2386_p6) }
  0xc2   : > { %1694 = vst.msk [vmem:[#allocation2 + $0x50] sm:$0xff] %vm570_vm1, %v1678_v55  ;;  %1695 = vst.msk [vmem:[#allocation2 + $0x58] sm:$0xff] %vm570_vm1, %v1679_v32  ;;  %v1722_v42 = vsel (!%p2386_p6), %vm570_vm1, %v1704_v19, 0.0  ;;  %v1731_v2 = vsel (!%p2386_p6), %vm570_vm1, %v3437_v63, 0.0  ;;  %v3445_v6 = vld [vmem:[#allocation2 + $0x20] sm:$0xff] (!%p2386_p6)  ;;  %v3453_v3 = vld [vmem:[#allocation2 + $0x28] sm:$0xff] (!%p2386_p6) }
  0xc3   : > { %1696 = vst.msk [vmem:[#allocation2 + $0x60] sm:$0xff] %vm570_vm1, %v1680_v56  ;;  %1697 = vst.msk [vmem:[#allocation2 + $0x68] sm:$0xff] %vm570_vm1, %v1681_v45  ;;  %v1682_v17 = vadd.f32 %v1666_v59, %v1560_v58  ;;  %v1683_v60 = vadd.f32 %v1667_v57, %v1561_v29  ;;  %1723 = vadd.xlane.f32.xlu0 (!%p2386_p6), %v1722_v42  ;;  %v1734_v9 = vsel (!%p2386_p6), %vm570_vm1, %v3445_v6, 0.0  ;;  %v1737_v13 = vsel (!%p2386_p6), %vm570_vm1, %v3453_v3, 0.0 }
  0xc5   : > { %1698 = vst.msk [vmem:[#allocation2 + $0x70] sm:$0xff] %vm570_vm1, %v1682_v17  ;;  %1699 = vst.msk [vmem:[#allocation2 + $0x78] sm:$0xff] %vm570_vm1, %v1683_v60 }
  0xc6   : > { %v3461_v15 = vld [vmem:[#allocation2 + $0x30] sm:$0xff]  ;;  %v3469_v20 = vld [vmem:[#allocation2 + $0x38] sm:$0xff] }
  0xc7   : > { %v1712_v7 = vld [vmem:[#allocation2 + $0x40] sm:$0xff]  ;;  %v1713_v31 = vld [vmem:[#allocation2 + $0x48] sm:$0xff]  ;;  %v1740_v22 = vsel %vm570_vm1, %v3461_v15, 0.0  ;;  %v1743_v21 = vsel %vm570_vm1, %v3469_v20, 0.0 }
  0xc8   : > { %v1746_v61 = vsel %vm570_vm1, %v1712_v7, 0.0  ;;  %v1749_v62 = vsel %vm570_vm1, %v1713_v31, 0.0 }
  0xc9   : > { %v1714_v11 = vld [vmem:[#allocation2 + $0x50] sm:$0xff]  ;;  %1747 = vadd.xlane.f32.xlu0 %v1746_v61  ;;  %1750 = vadd.xlane.f32.xlu1 %v1749_v62  ;;  %v3439_v50 = vld [vmem:[#allocation2 + $0x58] sm:$0xff] }
  0xca   : > { %v1752_v1 = vsel %vm570_vm1, %v1714_v11, 0.0  ;;  %v1755_v5 = vsel %vm570_vm1, %v3439_v50, 0.0  ;;  %v3447_v8 = vld [vmem:[#allocation2 + $0x60] sm:$0xff]  ;;  %v3455_v4 = vld [vmem:[#allocation2 + $0x68] sm:$0xff] }
  0xcb   : > { %v1758_v10 = vsel %vm570_vm1, %v3447_v8, 0.0  ;;  %v1761_v14 = vsel %vm570_vm1, %v3455_v4, 0.0 }
  0xcc   : > { %v3463_v18 = vld [vmem:[#allocation2 + $0x70] sm:$0xff]  ;;  %v3471_v25 = vld [vmem:[#allocation2 + $0x78] sm:$0xff] }
  0xcd   : > { %1729 = vadd.xlane.f32.xlu0 %v1728_v12  ;;  %1753 = vadd.xlane.f32.xlu1 %v1752_v1  ;;  %v1764_v54 = vsel %vm570_vm1, %v3463_v18, 0.0  ;;  %v1767_v26 = vsel %vm570_vm1, %v3471_v25, 0.0 }
  0xd1   : > { %1732 = vadd.xlane.f32.xlu0 %v1731_v2  ;;  %1756 = vadd.xlane.f32.xlu1 %v1755_v5 }
  0xd5   : > { %1735 = vadd.xlane.f32.xlu0 %v1734_v9  ;;  %1759 = vadd.xlane.f32.xlu1 %v1758_v10 }
  0xd9   : > { %1738 = vadd.xlane.f32.xlu0 %v1737_v13  ;;  %1762 = vadd.xlane.f32.xlu1 %v1761_v14 }
  0xdd   : > { %1741 = vadd.xlane.f32.xlu0 %v1740_v22  ;;  %1765 = vadd.xlane.f32.xlu1 %v1764_v54 }
  0xe1   : > { %1744 = vadd.xlane.f32.xlu0 %v1743_v21  ;;  %1768 = vadd.xlane.f32.xlu1 %v1767_v26 }
 0x14b   : > { %v1727_v27 = vpop.xlane.xlu1 %1726 }
 0x14c   : > { %v1772_v33 = vmul.f32 0.03125, %v1727_v27 }
 0x14e   : > { %v3479_v37 = vsub.f32 %v1705_v30, %v1772_v33 }
 0x150   : > { %v1724_v23 = vpop.xlane.xlu0 %1723  ;;  %v1804_v40 = vmul.f32 %v3479_v37, %v3479_v37 }
 0x151   : > { %v1771_v28 = vmul.f32 0.03125, %v1724_v23 }
 0x152   : > { %v1822_v24 = vsel %vm570_vm1, %v1804_v40, 0.0 }
 0x153   : > { %v3477_v36 = vsub.f32 %v1704_v19, %v1771_v28 }
 0x155   : > { %v1803_v41 = vmul.f32 %v3477_v36, %v3477_v36 }
 0x156   : > { %v1748_v34 = vpop.xlane.xlu0 %1747  ;;  %v1751_v39 = vpop.xlane.xlu1 %1750 }
 0x157   : > { %v1779_v16 = vmul.f32 0.03125, %v1748_v34  ;;  %v1780_v38 = vmul.f32 0.03125, %v1751_v39  ;;  %v1819_v44 = vsel %vm570_vm1, %v1803_v41, 0.0 }
 0x158   : > { %1820 = vadd.xlane.f32.xlu0 %v1819_v44 }
 0x159   : > { %v3485_v43 = vsub.f32 %v1712_v7, %v1779_v16  ;;  %v3487_v46 = vsub.f32 %v1713_v31, %v1780_v38 }
 0x15a   : > { %v1730_v48 = vpop.xlane.xlu0 %1729  ;;  %v1754_v49 = vpop.xlane.xlu1 %1753 }
 0x15b   : > { %v1773_v51 = vmul.f32 0.03125, %v1730_v48  ;;  %v1781_v52 = vmul.f32 0.03125, %v1754_v49  ;;  %v1811_v53 = vmul.f32 %v3485_v43, %v3485_v43  ;;  %v1812_v47 = vmul.f32 %v3487_v46, %v3487_v46 }
 0x15c   : > { %1823 = vadd.xlane.f32.xlu0 %v1822_v24 }
 0x15d   : > { %v3495_v55 = vsub.f32 %v1706_v0, %v1773_v51  ;;  %v3497_v32 = vsub.f32 %v1714_v11, %v1781_v52  ;;  %v1843_v56 = vsel %vm570_vm1, %v1811_v53, 0.0  ;;  %v1846_v59 = vsel %vm570_vm1, %v1812_v47, 0.0  ;;  %v1976_v47 = vld [vmem:[%s3796_s5 + $0x8] sm:$0xff] }
 0x15e   : > { %1844 = vadd.xlane.f32.xlu1 %v1843_v56  ;;  %v1733_v45 = vpop.xlane.xlu0 %1732  ;;  %v1757_v58 = vpop.xlane.xlu1 %1756 }
 0x15f   : > { %v1774_v29 = vmul.f32 0.03125, %v1733_v45  ;;  %v1782_v57 = vmul.f32 0.03125, %v1757_v58  ;;  %v1805_v17 = vmul.f32 %v3495_v55, %v3495_v55  ;;  %v1813_v60 = vmul.f32 %v3497_v32, %v3497_v32  ;;  %v1977_v45 = vld [vmem:[%s3796_s5 + $0x10] sm:$0xff]  ;;  %v1978_v58 = vld [vmem:[%s3796_s5 + $0x18] sm:$0xff] }
 0x161   : > { %v3506_v19 = vsub.f32 %v3437_v63, %v1774_v29  ;;  %v3509_v30 = vsub.f32 %v3439_v50, %v1782_v57  ;;  %v1825_v7 = vsel %vm570_vm1, %v1805_v17, 0.0  ;;  %v1849_v31 = vsel %vm570_vm1, %v1813_v60, 0.0 }
 0x162   : > { %1847 = vadd.xlane.f32.xlu1 %v1846_v59  ;;  %1826 = vadd.xlane.f32.xlu0 %v1825_v7  ;;  %v1736_v42 = vpop.xlane.xlu0 %1735  ;;  %v1760_v35 = vpop.xlane.xlu1 %1759  ;;  %v2473_v59 = vpack.c.bf16 %v1978_v58, %v1977_v45 }
 0x163   : > { %v1775_v61 = vmul.f32 0.03125, %v1736_v42  ;;  %v1783_v62 = vmul.f32 0.03125, %v1760_v35  ;;  %v1806_v0 = vmul.f32 %v3506_v19, %v3506_v19  ;;  %v1814_v11 = vmul.f32 %v3509_v30, %v3509_v30 }
 0x165   : > { %v3518_v12 = vsub.f32 %v3445_v6, %v1775_v61  ;;  %v3521_v1 = vsub.f32 %v3447_v8, %v1783_v62  ;;  %v1828_v63 = vsel %vm570_vm1, %v1806_v0, 0.0  ;;  %v1852_v5 = vsel %vm570_vm1, %v1814_v11, 0.0 }
 0x166   : > { %1850 = vadd.xlane.f32.xlu1 %v1849_v31  ;;  %1829 = vadd.xlane.f32.xlu0 %v1828_v63  ;;  %v1739_v50 = vpop.xlane.xlu0 %1738  ;;  %v1763_v2 = vpop.xlane.xlu1 %1762 }
 0x167   : > { %v1776_v9 = vmul.f32 0.03125, %v1739_v50  ;;  %v1784_v10 = vmul.f32 0.03125, %v1763_v2  ;;  %v1807_v13 = vmul.f32 %v3518_v12, %v3518_v12  ;;  %v1815_v6 = vmul.f32 %v3521_v1, %v3521_v1 }
 0x169   : > { %v3530_v14 = vsub.f32 %v3453_v3, %v1776_v9  ;;  %v3533_v8 = vsub.f32 %v3455_v4, %v1784_v10  ;;  %v1831_v22 = vsel %vm570_vm1, %v1807_v13, 0.0  ;;  %v1855_v26 = vsel %vm570_vm1, %v1815_v6, 0.0 }
 0x16a   : > { %1853 = vadd.xlane.f32.xlu1 %v1852_v5  ;;  %1832 = vadd.xlane.f32.xlu0 %v1831_v22  ;;  %v1742_v54 = vpop.xlane.xlu0 %1741  ;;  %v1766_v21 = vpop.xlane.xlu1 %1765 }
 0x16b   : > { %v1777_v23 = vmul.f32 0.03125, %v1742_v54  ;;  %v1785_v27 = vmul.f32 0.03125, %v1766_v21  ;;  %v1808_v28 = vmul.f32 %v3530_v14, %v3530_v14  ;;  %v1816_v3 = vmul.f32 %v3533_v8, %v3533_v8  ;;  %v3582_v21 = vld [vmem:[%s3794_s3] ss:$0 sm:$0xff] }
 0x16d   : > { %v3542_v33 = vsub.f32 %v3461_v15, %v1777_v23  ;;  %v3545_v4 = vsub.f32 %v3463_v18, %v1785_v27  ;;  %v1834_v34 = vsel %vm570_vm1, %v1808_v28, 0.0  ;;  %v1858_v38 = vsel %vm570_vm1, %v1816_v3, 0.0 }
 0x16e   : > { %1856 = vadd.xlane.f32.xlu1 %v1855_v26  ;;  %1835 = vadd.xlane.f32.xlu0 %v1834_v34  ;;  %v1745_v39 = vpop.xlane.xlu0 %1744  ;;  %v1769_v16 = vpop.xlane.xlu1 %1768  ;;  %v3588_v34 = vld [vmem:[%s3795_s4] ss:$0 sm:$0xff] }
 0x16f   : > { %v1778_v41 = vmul.f32 0.03125, %v1745_v39  ;;  %v1786_v40 = vmul.f32 0.03125, %v1769_v16  ;;  %v1809_v44 = vmul.f32 %v3542_v33, %v3542_v33  ;;  %v1817_v15 = vmul.f32 %v3545_v4, %v3545_v4 }
 0x171   : > { %v3554_v48 = vsub.f32 %v3469_v20, %v1778_v41  ;;  %v3557_v18 = vsub.f32 %v3471_v25, %v1786_v40  ;;  %v1837_v49 = vsel %vm570_vm1, %v1809_v44, 0.0  ;;  %v1861_v24 = vsel %vm570_vm1, %v1817_v15, 0.0  ;;  %v1975_v25 = vld [vmem:[%s3796_s5] sm:$0xff] }
 0x172   : > { %1859 = vadd.xlane.f32.xlu1 %v1858_v38  ;;  %1838 = vadd.xlane.f32.xlu0 %v1837_v49  ;;  %v2469_v56 = vpack.c.bf16 %v1976_v47, %v1975_v25 }
 0x173   : > { %v1810_v51 = vmul.f32 %v3554_v48, %v3554_v48  ;;  %v1818_v52 = vmul.f32 %v3557_v18, %v3557_v18 }
 0x174   : > { %2470 = vmatprep.subr.bf16.mxu0 %v2469_v56  ;;  %2477 = vmatprep.subr.bf16.mxu1 %v2469_v56 }
 0x175   : > { %v1840_v53 = vsel %vm570_vm1, %v1810_v51, 0.0  ;;  %v1864_v20 = vsel %vm570_vm1, %v1818_v52, 0.0  ;;  %2472 = vmatpush3.bf16.msra.mxu0 %v2469_v56  ;;  %2479 = vmatpush3.bf16.msra.mxu1 %v2469_v56 }
 0x176   : > { %1862 = vadd.xlane.f32.xlu1 %v1861_v24  ;;  %1841 = vadd.xlane.f32.xlu0 %v1840_v53 }
 0x177   : > { %2474 = vmatprep.subr.bf16.mxu0 %v2473_v59  ;;  %2478 = vmatprep.subr.bf16.mxu1 %v2473_v59 }
 0x179   : > { %2476 = vmatpush3.bf16.msra.mxu0 %v2473_v59  ;;  %2480 = vmatpush3.bf16.msra.mxu1 %v2473_v59 }
 0x17a   : > { %1865 = vadd.xlane.f32.xlu1 %v1864_v20 }
 0x1e5   : > { %v1821_v29 = vpop.xlane.xlu0 %1820 }
 0x1e6   : > { %v1867_v57 = vmul.f32 0.03125, %v1821_v29 }
 0x1e8   : > { %v1883_v17 = vadd.f32 1e-05, %v1867_v57 }
 0x1e9   : > { %v1824_v7 = vpop.xlane.xlu0 %1823 }
 0x1ea   : > { %2572 = vrsqrt.f32 %v1883_v17  ;;  %v1868_v35 = vmul.f32 0.03125, %v1824_v7 }
 0x1eb   : > { %v1845_v60 = vpop.xlane.xlu1 %1844 }
 0x1ec   : > { %v1875_v42 = vmul.f32 0.03125, %v1845_v60  ;;  %v1884_v61 = vadd.f32 1e-05, %v1868_v35 }
 0x1ee   : > { %v1891_v31 = vadd.f32 1e-05, %v1875_v42 }
 0x1ef   : > { %v1848_v62 = vpop.xlane.xlu1 %1847  ;;  %v1827_v0 = vpop.xlane.xlu0 %1826 }
 0x1f0   : > { %2574 = vrsqrt.f32 %v1891_v31  ;;  %v1876_v11 = vmul.f32 0.03125, %v1848_v62  ;;  %v1869_v63 = vmul.f32 0.03125, %v1827_v0 }
 0x1f1   : > { %2576 = vrsqrt.f32 %v1884_v61 }
 0x1f2   : > { %v1892_v50 = vadd.f32 1e-05, %v1876_v11  ;;  %v1885_v2 = vadd.f32 1e-05, %v1869_v63 }
 0x1f3   : > { %v1851_v5 = vpop.xlane.xlu1 %1850  ;;  %v1830_v9 = vpop.xlane.xlu0 %1829 }
 0x1f4   : > { %2578 = vrsqrt.f32 %v1892_v50  ;;  %v1877_v10 = vmul.f32 0.03125, %v1851_v5  ;;  %v1870_v13 = vmul.f32 0.03125, %v1830_v9  ;;  %v2573_v6 = vpop.eup %2572 }
 0x1f5   : > { %2580 = vrsqrt.f32 %v1885_v2  ;;  %v1915_v27 = vmul.f32 %v2573_v6, %v3477_v36 }
 0x1f6   : > { %v1893_v22 = vadd.f32 1e-05, %v1877_v10  ;;  %v1886_v54 = vadd.f32 1e-05, %v1870_v13 }
 0x1f7   : > { %v1854_v26 = vpop.xlane.xlu1 %1853  ;;  %v1833_v23 = vpop.xlane.xlu0 %1832  ;;  %v1937_v39 = vmul.f32 %v3582_v21, %v1915_v27 }
 0x1f8   : > { %2582 = vrsqrt.f32 %v1893_v22  ;;  %v1878_v28 = vmul.f32 0.03125, %v1854_v26  ;;  %v1871_v3 = vmul.f32 0.03125, %v1833_v23 }
 0x1f9   : > { %2584 = vrsqrt.f32 %v1886_v54  ;;  %v1959_v49 = vadd.f32 %v3588_v34, %v1937_v39 }
 0x1fa   : > { %v2575_v16 = vpop.eup %2574  ;;  %v1894_v38 = vadd.f32 1e-05, %v1878_v28  ;;  %v1887_v41 = vadd.f32 1e-05, %v1871_v3 }
 0x1fb   : > { %v2577_v40 = vpop.eup %2576  ;;  %v1857_v44 = vpop.xlane.xlu1 %1856  ;;  %v1923_v36 = vmul.f32 %v2575_v16, %v3485_v43  ;;  %2445 = vmatprep.mubr.msk.f32.mxu0 %vm570_vm1, %v1959_v49 }
 0x1fc   : > { %v1836_v15 = vpop.xlane.xlu0 %1835  ;;  %2586 = vrsqrt.f32 %v1894_v38  ;;  %v1879_v24 = vmul.f32 0.03125, %v1857_v44  ;;  %v1916_v52 = vmul.f32 %v2577_v40, %v3479_v37 }
 0x1fd   : > { %v1872_v51 = vmul.f32 0.03125, %v1836_v15  ;;  %2588 = vrsqrt.f32 %v1887_v41  ;;  %v1945_v53 = vmul.f32 %v3582_v21, %v1923_v36 }
 0x1fe   : > { %v2579_v20 = vpop.eup %2578  ;;  %v1895_v25 = vadd.f32 1e-05, %v1879_v24  ;;  %v1938_v56 = vmul.f32 %v3582_v21, %v1916_v52 }
 0x1ff   : > { %v1888_v47 = vadd.f32 1e-05, %v1872_v51  ;;  %v2581_v45 = vpop.eup %2580  ;;  %v1860_v58 = vpop.xlane.xlu1 %1859  ;;  %v1967_v43 = vadd.f32 %v3588_v34, %v1945_v53  ;;  %v1924_v29 = vmul.f32 %v2579_v20, %v3487_v46 }
 0x200   : > { %v1839_v59 = vpop.xlane.xlu0 %1838  ;;  %2590 = vrsqrt.f32 %v1895_v25  ;;  %v1880_v57 = vmul.f32 0.03125, %v1860_v58  ;;  %v1960_v17 = vadd.f32 %v3588_v34, %v1938_v56  ;;  %v1917_v60 = vmul.f32 %v2581_v45, %v3495_v55 }
 0x201   : > { %v1873_v37 = vmul.f32 0.03125, %v1839_v59  ;;  %2592 = vrsqrt.f32 %v1888_v47  ;;  %2457 = vmatprep.mubr.msk.f32.mxu1 %vm570_vm1, %v1967_v43  ;;  %v1946_v7 = vmul.f32 %v3582_v21, %v1924_v29 }
 0x202   : > { %v2583_v42 = vpop.eup %2582  ;;  %v1896_v35 = vadd.f32 1e-05, %v1880_v57  ;;  %2446 = vmatmul.mubr.msk.f32.vlgmr.msra.gmra.mrb[0].mxu0 %vm570_vm1, %v1960_v17  ;;  %v1939_v0 = vmul.f32 %v3582_v21, %v1917_v60  ;;  %v3656_v17 = vld [vmem:[%s3797_s6] ss:$0 sm:$0xff]  ;;  %v2180_v60 = vld [vmem:[%s2876_s27 + $0x8] sm:$0xff] }
 0x203   : > { %v1889_v31 = vadd.f32 1e-05, %v1873_v37  ;;  %v2585_v61 = vpop.eup %2584  ;;  %v1863_v62 = vpop.xlane.xlu1 %1862  ;;  %v1968_v11 = vadd.f32 %v3588_v34, %v1946_v7  ;;  %v1925_v63 = vmul.f32 %v2583_v42, %v3497_v32  ;;  %v2179_v42 = vld [vmem:[%s2876_s27] sm:$0xff] }
 0x204   : > { %v1842_v46 = vpop.xlane.xlu0 %1841  ;;  %2594 = vrsqrt.f32 %v1896_v35  ;;  %v1881_v50 = vmul.f32 0.03125, %v1863_v62  ;;  %v1918_v55 = vmul.f32 %v2585_v61, %v3506_v19  ;;  %v1961_v5 = vadd.f32 %v3588_v34, %v1939_v0  ;;  %v2188_v61 = vld [vmem:[%s2876_s27 + $0x48] sm:$0xff] }
 0x205   : > { %v1874_v2 = vmul.f32 0.03125, %v1842_v46  ;;  %2596 = vrsqrt.f32 %v1889_v31  ;;  %2458 = vmatmul.mubr.msk.f32.vlgmr.msra.gmra.mrb[0].mxu1 %vm570_vm1, %v1968_v11  ;;  %v1947_v9 = vmul.f32 %v3582_v21, %v1925_v63  ;;  %v2187_v11 = vld [vmem:[%s2876_s27 + $0x40] sm:$0xff] }
 0x206   : > { %v2587_v10 = vpop.eup %2586  ;;  %v1897_v13 = vadd.f32 1e-05, %v1881_v50  ;;  %v1940_v22 = vmul.f32 %v3582_v21, %v1918_v55  ;;  %2448 = vmatprep.mubr.msk.f32.mxu0 %vm570_vm1, %v1961_v5  ;;  %v2182_v5 = vld [vmem:[%s2876_s27 + $0x18] sm:$0xff] }
 0x207   : > { %v1890_v6 = vadd.f32 1e-05, %v1874_v2  ;;  %v2589_v54 = vpop.eup %2588  ;;  %v1866_v32 = vpop.xlane.xlu1 %1865  ;;  %v1969_v26 = vadd.f32 %v3588_v34, %v1947_v9  ;;  %v1926_v19 = vmul.f32 %v2587_v10, %v3509_v30 }
 0x208   : > { %2598 = vrsqrt.f32 %v1897_v13  ;;  %v1882_v23 = vmul.f32 0.03125, %v1866_v32  ;;  %v1962_v27 = vadd.f32 %v3588_v34, %v1940_v22  ;;  %v1919_v28 = vmul.f32 %v2589_v54, %v3518_v12  ;;  %v2181_v13 = vld [vmem:[%s2876_s27 + $0x10] sm:$0xff]  ;;  %v2190_v32 = vld [vmem:[%s2876_s27 + $0x58] sm:$0xff] }
 0x209   : > { %2600 = vrsqrt.f32 %v1890_v6  ;;  %2460 = vmatprep.mubr.msk.f32.mxu1 %vm570_vm1, %v1969_v26  ;;  %v1948_v3 = vmul.f32 %v3582_v21, %v1926_v19 }
 0x20a   : > { %v2591_v39 = vpop.eup %2590  ;;  %v1898_v16 = vadd.f32 1e-05, %v1882_v23  ;;  %2449 = vmatmul.mubr.msk.f32.gmra.mrb[2].mxu0 %vm570_vm1, %v1962_v27  ;;  %v1941_v38 = vmul.f32 %v3582_v21, %v1919_v28  ;;  %v2189_v27 = vld [vmem:[%s2876_s27 + $0x50] sm:$0xff] }
 0x20b   : > { %v2593_v41 = vpop.eup %2592  ;;  %v1970_v30 = vadd.f32 %v3588_v34, %v1948_v3  ;;  %v1927_v40 = vmul.f32 %v2591_v39, %v3521_v1 }
 0x20c   : > { %2602 = vrsqrt.f32 %v1898_v16  ;;  %v1963_v44 = vadd.f32 %v3588_v34, %v1941_v38  ;;  %v1920_v12 = vmul.f32 %v2593_v41, %v3530_v14  ;;  %v2184_v38 = vld [vmem:[%s2876_s27 + $0x28] sm:$0xff] }
 0x20d   : > { %2461 = vmatmul.mubr.msk.f32.gmra.mrb[2].mxu1 %vm570_vm1, %v1970_v30  ;;  %v1949_v15 = vmul.f32 %v3582_v21, %v1927_v40  ;;  %v2183_v40 = vld [vmem:[%s2876_s27 + $0x20] sm:$0xff] }
 0x20e   : > { %v2595_v49 = vpop.eup %2594  ;;  %2451 = vmatprep.mubr.msk.f32.mxu0 %vm570_vm1, %v1963_v44  ;;  %v1942_v36 = vmul.f32 %v3582_v21, %v1920_v12 }
 0x20f   : > { %v2597_v24 = vpop.eup %2596  ;;  %v1971_v51 = vadd.f32 %v3588_v34, %v1949_v15  ;;  %v1928_v52 = vmul.f32 %v2595_v49, %v3533_v8  ;;  %v2192_v49 = vld [vmem:[%s2876_s27 + $0x68] sm:$0xff] }
 0x210   : > { %v1964_v1 = vadd.f32 %v3588_v34, %v1942_v36  ;;  %v1921_v53 = vmul.f32 %v2597_v24, %v3542_v33 }
 0x211   : > { %2463 = vmatprep.mubr.msk.f32.mxu1 %vm570_vm1, %v1971_v51  ;;  %v1950_v14 = vmul.f32 %v3582_v21, %v1928_v52  ;;  %v2191_v52 = vld [vmem:[%s2876_s27 + $0x60] sm:$0xff] }
 0x212   : > { %v2599_v20 = vpop.eup %2598  ;;  %2452 = vmatmul.mubr.msk.f32.gmra.mrb[4].mxu0 %vm570_vm1, %v1964_v1  ;;  %v1943_v25 = vmul.f32 %v3582_v21, %v1921_v53 }
 0x213   : > { %v2601_v47 = vpop.eup %2600  ;;  %v1972_v56 = vadd.f32 %v3588_v34, %v1950_v14  ;;  %v1929_v45 = vmul.f32 %v2599_v20, %v3545_v4 }
 0x214   : > { %v1965_v8 = vadd.f32 %v3588_v34, %v1943_v25  ;;  %v1922_v58 = vmul.f32 %v2601_v47, %v3554_v48  ;;  %v2186_v25 = vld [vmem:[%s2876_s27 + $0x38] sm:$0xff] }
 0x215   : > { %2464 = vmatmul.mubr.msk.f32.gmra.mrb[4].mxu1 %vm570_vm1, %v1972_v56  ;;  %v1951_v33 = vmul.f32 %v3582_v21, %v1929_v45  ;;  %v2185_v45 = vld [vmem:[%s2876_s27 + $0x30] sm:$0xff] }
 0x216   : > { %v2603_v59 = vpop.eup %2602  ;;  %2454 = vmatprep.mubr.msk.f32.mxu0 %vm570_vm1, %v1965_v8  ;;  %v1944_v43 = vmul.f32 %v3582_v21, %v1922_v58 }
 0x217   : > { %v1973_v29 = vadd.f32 %v3588_v34, %v1951_v33  ;;  %v1930_v57 = vmul.f32 %v2603_v59, %v3557_v18  ;;  %v2194_v59 = vld [vmem:[%s2876_s27 + $0x78] sm:$0xff] }
 0x218   : > { %v1966_v4 = vadd.f32 %v3588_v34, %v1944_v43 }
 0x219   : > { %2466 = vmatprep.mubr.msk.f32.mxu1 %vm570_vm1, %v1973_v29  ;;  %v1952_v48 = vmul.f32 %v3582_v21, %v1930_v57 }
 0x21a   : > { %2455 = vmatmul.mubr.msk.f32.gmra.mrb[6].mxu0 %vm570_vm1, %v1966_v4  ;;  %v2193_v4 = vld [vmem:[%s2876_s27 + $0x70] sm:$0xff] }
 0x21b   : > { %v1974_v37 = vadd.f32 %v3588_v34, %v1952_v48 }
 0x21d   : > { %2467 = vmatmul.mubr.msk.f32.gmra.mrb[6].mxu1 %vm570_vm1, %v1974_v37 }
 0x2d5   : > { %v2447_v18 = vpop.f32.mrb[0].mxu0 }
 0x2d6   : > { %v2106_v7 = vadd.f32 %v2447_v18, %v3656_v17  ;;  %v2100_v21 = vpop.f32.mrb[1].mxu0 }
 0x2d7   : > { %v2101_v35 = vadd.f32 %v3656_v17, %v2100_v21 }
 0x2d8   : > { %v2196_v34 = vmul.f32 %v2180_v60, %v2106_v7  ;;  %v2459_v31 = vpop.f32.mrb[0].mxu1 }
 0x2d9   : > { %v2195_v62 = vmul.f32 %v2179_v42, %v2101_v35  ;;  %v2146_v46 = vadd.f32 %v2459_v31, %v3656_v17  ;;  %v2140_v0 = vpop.f32.mrb[1].mxu1 }
 0x2da   : > { %2212 = vst.msk [vmem:[%s2880_s14 + $0x8] sm:$0xff] %vm570_vm1, %v2196_v34  ;;  %v2141_v63 = vadd.f32 %v3656_v17, %v2140_v0 }
 0x2db   : > { %2211 = vst.msk [vmem:[%s2880_s14] sm:$0xff] %vm570_vm1, %v2195_v62  ;;  %v2204_v50 = vmul.f32 %v2188_v61, %v2146_v46 }
 0x2dc   : > { %v2203_v2 = vmul.f32 %v2187_v11, %v2141_v63 }
 0x2dd   : > { %2220 = vst.msk [vmem:[%s2880_s14 + $0x48] sm:$0xff] %vm570_vm1, %v2204_v50  ;;  %v2450_v55 = vpop.f32.mrb[2].mxu0 }
 0x2de   : > { %2219 = vst.msk [vmem:[%s2880_s14 + $0x40] sm:$0xff] %vm570_vm1, %v2203_v2  ;;  %v2116_v9 = vadd.f32 %v2450_v55, %v3656_v17  ;;  %v2110_v10 = vpop.f32.mrb[3].mxu0 }
 0x2df   : > { %v2111_v6 = vadd.f32 %v3656_v17, %v2110_v10 }
 0x2e0   : > { %v2198_v22 = vmul.f32 %v2182_v5, %v2116_v9  ;;  %v2462_v54 = vpop.f32.mrb[2].mxu1 }
 0x2e1   : > { %v2197_v26 = vmul.f32 %v2181_v13, %v2111_v6  ;;  %v2156_v19 = vadd.f32 %v2462_v54, %v3656_v17  ;;  %v2150_v23 = vpop.f32.mrb[3].mxu1 }
 0x2e2   : > { %2214 = vst.msk [vmem:[%s2880_s14 + $0x18] sm:$0xff] %vm570_vm1, %v2198_v22  ;;  %v2151_v28 = vadd.f32 %v3656_v17, %v2150_v23 }
 0x2e3   : > { %2213 = vst.msk [vmem:[%s2880_s14 + $0x10] sm:$0xff] %vm570_vm1, %v2197_v26  ;;  %v2206_v3 = vmul.f32 %v2190_v32, %v2156_v19 }
 0x2e4   : > { %v2205_v39 = vmul.f32 %v2189_v27, %v2151_v28 }
 0x2e5   : > { %2222 = vst.msk [vmem:[%s2880_s14 + $0x58] sm:$0xff] %vm570_vm1, %v2206_v3  ;;  %v2453_v16 = vpop.f32.mrb[4].mxu0 }
 0x2e6   : > { %2221 = vst.msk [vmem:[%s2880_s14 + $0x50] sm:$0xff] %vm570_vm1, %v2205_v39  ;;  %v2126_v41 = vadd.f32 %v2453_v16, %v3656_v17  ;;  %v2120_v30 = vpop.f32.mrb[5].mxu0 }
 0x2e7   : > { %v2121_v44 = vadd.f32 %v3656_v17, %v2120_v30 }
 0x2e8   : > { %v2200_v12 = vmul.f32 %v2184_v38, %v2126_v41  ;;  %v2465_v15 = vpop.f32.mrb[4].mxu1 }
 0x2e9   : > { %v2199_v36 = vmul.f32 %v2183_v40, %v2121_v44  ;;  %v2166_v24 = vadd.f32 %v2465_v15, %v3656_v17  ;;  %v2160_v51 = vpop.f32.mrb[5].mxu1 }
 0x2ea   : > { %2216 = vst.msk [vmem:[%s2880_s14 + $0x28] sm:$0xff] %vm570_vm1, %v2200_v12  ;;  %v2161_v1 = vadd.f32 %v3656_v17, %v2160_v51 }
 0x2eb   : > { %2215 = vst.msk [vmem:[%s2880_s14 + $0x20] sm:$0xff] %vm570_vm1, %v2199_v36  ;;  %v2208_v53 = vmul.f32 %v2192_v49, %v2166_v24 }
 0x2ec   : > { %v2207_v14 = vmul.f32 %v2191_v52, %v2161_v1 }
 0x2ed   : > { %2224 = vst.msk [vmem:[%s2880_s14 + $0x68] sm:$0xff] %vm570_vm1, %v2208_v53  ;;  %v2456_v20 = vpop.f32.mrb[6].mxu0 }
 0x2ee   : > { %2223 = vst.msk [vmem:[%s2880_s14 + $0x60] sm:$0xff] %vm570_vm1, %v2207_v14  ;;  %v2136_v47 = vadd.f32 %v2456_v20, %v3656_v17  ;;  %v2130_v56 = vpop.f32.mrb[7].mxu0 }
 0x2ef   : > { %v2131_v8 = vadd.f32 %v3656_v17, %v2130_v56 }
 0x2f0   : > { %v2202_v58 = vmul.f32 %v2186_v25, %v2136_v47  ;;  %v2468_v33 = vpop.f32.mrb[6].mxu1 }
 0x2f1   : > { %v2201_v43 = vmul.f32 %v2185_v45, %v2131_v8  ;;  %v2176_v29 = vadd.f32 %v2468_v33, %v3656_v17  ;;  %v2170_v57 = vpop.f32.mrb[7].mxu1 }
 0x2f2   : > { %2218 = vst.msk [vmem:[%s2880_s14 + $0x38] sm:$0xff] %vm570_vm1, %v2202_v58  ;;  %v2171_v48 = vadd.f32 %v3656_v17, %v2170_v57 }
 0x2f3   : > { %2217 = vst.msk [vmem:[%s2880_s14 + $0x30] sm:$0xff] %vm570_vm1, %v2201_v43  ;;  %v2210_v37 = vmul.f32 %v2194_v59, %v2176_v29 }
 0x2f4   : > { %v2209_v18 = vmul.f32 %v2193_v4, %v2171_v48 }
 0x2f5   : > { %2226 = vst.msk [vmem:[%s2880_s14 + $0x78] sm:$0xff] %vm570_vm1, %v2210_v37 }
 0x2f6   : > { %2225 = vst.msk [vmem:[%s2880_s14 + $0x70] sm:$0xff] %vm570_vm1, %v2209_v18 }
 0x2f7 PF: > { %s2416_s29 = sshll.u32 %s2702_s30, 11  ;;  %s2242_s17 = sshll.u32 %s2880_s14, 4  ;;  %s3729_s17 = int_to_ptr.vmem [resolvable:$true] %s2242_s17 }
 0x2f8   : > { %s3726_s9 = scalar_lea.hbm %s3798_s7, %s2416_s29  ;;  %s3815_s22 = sand.u32 1, %s2682_s25  }
 0x2f9   : > { %s3733_s12 = scalar_lea.sflag [#allocation5], %s3815_s22  ;;  %s2604_s16 = scalar_lea.vmem %s3729_s17, 2048 }
 0x2fa   : > { %p2605_p8 = scmp.ne.s32.totalorder %s3729_s17, %s2604_s16  ;;  %s2718_s30 = smov [#allocation4]  }
 0x2fb   : > { %s2608_s20 = sshll.u32 %s2718_s30, 4  ;;  %s2609_s20 = int_to_ptr.vmem [resolvable:$false] %s2608_s20 }
 0x2fc   : > { %p2606_p9 = pnand %p2605_p8, %p2833_p7  ;;  %s2610_s21 = scalar_lea.vmem %s2609_s20, 4096 }
 0x2fd   : > { %p2611_p11 = scmp.lt.s32.totalorder %s3729_s17, %s2609_s20  ;;  %p2612_p13 = scmp.lt.s32.totalorder %s2610_s21, %s2604_s16 }
 0x2fe   : > { %p2607_p10 = pneg %p2606_p9 }
 0x2ff   : > { %p2613_p0 = por %p2612_p13, %p2611_p11 }
 0x301   : > { %p2614_p1 = pnand %p2613_p0, %p2607_p10 }
 0x303   : > { %2617 = shalt.err (!%p2614_p1)
}
 0x304   : > { %s2618_s14 = scalar_lea.hbm %s3726_s9, 2048  ;;  %s2622_s13 = scalar_lea.hbm %s3798_s7, 4096 }
 0x305   : > { %p2619_p2 = scmp.ne.s32.totalorder %s3726_s9, %s2618_s14  ;;  %p2623_p5 = scmp.lt.u32.totalorder %s3726_s9, %s3798_s7 }
 0x306   : > { %p2624_p6 = scmp.lt.u32.totalorder %s2622_s13, %s2618_s14  ;;  %p2626_p9 = scmp.lt.u32.totalorder %s2618_s14, %s3726_s9 }
 0x307   : > { %p2620_p3 = pnand %p2619_p2, %p2833_p7 }
 0x308   : > { %p2625_p8 = por %p2624_p6, %p2623_p5 }
 0x309   : > { %p2621_p4 = pneg %p2620_p3 }
 0x30a   : > { %p2627_p10 = por %p2626_p9, %p2625_p8 }
 0x30c   : > { %p2628_p11 = pnand %p2627_p10, %p2621_p4 }
 0x30e   : > { %2631 = shalt.err (!%p2628_p11)
}
 0x30f   : > { %s2719_s8 = smov 128   ;;  %s2720_s27 = smov 8  }
 0x310   : > { %2481 = dma.vmem_to_hbm [thread:$0]  (%p2833_p7), %s3729_s17, 2048, %s3726_s9, %s3733_s12, %s2719_s8, %s2719_s8, %s2720_s27  }
 0x311 PF: > { %p2487_p13 = scmp.ge.s32.totalorder %s2714_s10, 2  ;;  %s2257_s16 = sand.u32 1, %s2678_s24  }
 0x312   : > { %s2258_s30 = scalar_lea.sflag [#allocation5], %s2257_s16 }
 0x313   : > { %p2484_p0 = pnand %p2487_p13, %p2841_p12 }
 0x315   : > { %2673 = dma.done.wait (!%p2484_p0), %s2258_s30, 2048  }
 0x316   : > { %2675 = vsyncadd (!%p2484_p0), %s2258_s30, 4294965248  ;;  %s20_s10 = sadd.s32 1, %s2714_s10   ;;  %s3817_s29 = sld [smem:[#allocation7_spill]] }
 0x317   : > { %p17_p1 = scmp.ge.s32.totalorder %s20_s10, 6   ;;  %s3818_s30 = sld [smem:[#allocation8_spill]] }
 0x318   : > { %s3819_s8 = sld [smem:[#allocation9_spill]]  ;;  %s3820_s9 = sld [smem:[#allocation10_spill]] }
 0x319   : > { %s3821_s24 = smov %s2682_s25  ;;  %s3822_s25 = smov %s2686_s26 }
 0x31a   : > { %s3823_s26 = smov %s2846_s23  ;;  %s3824_s27 = smov %s2694_s28 }
 0x31b   : > { %s3825_s28 = smov %s2849_s11  ;;  %19 = sbr.rel (!%p17_p1) target bundleno = 8 (0x8), region = 154 }
 0x322   :  { %2263 = vsyncpa [#allocation5], 1 }
 0x323   :  { %2265 = vsyncpa [#allocation5 + $0x1], 1 }

</bundles_post_ra>
